<compile_context>
chip_gen: v6e
topology: v6e:2x2x1
jax: 0.10.0
libtpu: 0.0.40
codegen_flags: <defaults>
</compile_context>

<pallas_src>
import functools

import jax
import jax.numpy as jnp
import numpy as np
from jax.experimental import pallas as pl
from jax.experimental.pallas import tpu as pltpu

LN_EPS = 1e-5  # PyTorch nn.LayerNorm default

# v7x has 64 MiB VMEM per TensorCore (v5e/v6e: 128 MiB). Keep each kernel's
# pipelined working set comfortably below the smallest generation.
_VMEM_LIMIT = 48 * 1024 * 1024       # scoped VMEM limit handed to Mosaic
_VMEM_BUDGET = 32 * 1024 * 1024      # target working set used to derive tile sizes


def _round_up(x, m):
    return (x + m - 1) // m * m


def _pick_lstm_chunk(T, B, H, budget=_VMEM_BUDGET):
    # Per grid step: 2 dirs x 2 buffers x ([tc,B,4H] xw + [tc,B,H] hseq), all bf16.
    bytes_per_t = 2 * 2 * 2 * (B * 4 * H + B * H)
    tc = int(max(1, min(T, 64, budget // max(bytes_per_t, 1))))
    while T % tc:
        tc -= 1
    return tc


def _pick_gate_tiles(B, S, H, budget=_VMEM_BUDGET):
    # f32 working set per grid step: key block (x2 bufs) + query/out blocks (x2 bufs
    # each) + ~3 [bb,tq,S] softmax intermediates + reply_c.
    def cost(bb, tq):
        return 4 * (2 * bb * S * H + 4 * bb * tq * H + 3 * bb * tq * S + bb * tq * H)

    bbs = [d for d in (8, 4, 2, 1) if B % d == 0] if B > 8 else [B]
    tqs = [S] + [t for t in range(S - S % 8, 0, -8) if t and S % t == 0]
    for bb in bbs:
        for tq in tqs:
            if cost(bb, tq) <= budget:
                return bb, tq
    return bbs[-1], tqs[-1]


# ----------------------------------------------------------------------------
# Kernel 1: bidirectional LSTM recurrence, both directions interleaved per chunk.
#   grid = (T // t_chunk,)  ["arbitrary": h/c scratch carries across chunks, and is
#                            only valid because it is reset at program_id(0)==0]
#   xw      : [2, T, B, 4H] bf16   precomputed x @ W_ih + b (input projection hoisted)
#   whh     : [2, H, 4H]    bf16   recurrent weights (i|f|g|o fused)
#   hseq_f/b: [T, B, H]     bf16   per-step hidden states (backward time-aligned)
#   clast   : [2, B, H]     f32    final cell state per direction
# ----------------------------------------------------------------------------
def _bilstm_chunk_kernel(t_chunk, H, unroll,
                         xwf_ref, xwb_ref, whhf_ref, whhb_ref,
                         hseqf_ref, hseqb_ref, clast_ref,
                         hf, cf, hb, cb):
    @pl.when(pl.program_id(0) == 0)
    def _():
        hf[...] = jnp.zeros_like(hf)
        cf[...] = jnp.zeros_like(cf)
        hb[...] = jnp.zeros_like(hb)
        cb[...] = jnp.zeros_like(cb)

    whh_f = whhf_ref[...]  # [H, 4H] bf16, single-buffered (grid-invariant)
    whh_b = whhb_ref[...]

    def gates_to_hc(gates, c_prev):
        i = jax.nn.sigmoid(gates[:, 0 * H:1 * H])
        f = jax.nn.sigmoid(gates[:, 1 * H:2 * H])
        g = jnp.tanh(gates[:, 2 * H:3 * H])
        o = jax.nn.sigmoid(gates[:, 3 * H:4 * H])
        c_new = f * c_prev + i * g
        h_new = o * jnp.tanh(c_new)
        return h_new, c_new

    def step(k, carry):
        tb = t_chunk - 1 - k  # backward direction walks its chunk in reverse
        # Issue both directions' recurrent matmuls before the nonlinearities so the
        # two independent chains overlap on the MXU/EUP (single-TC v5e/v6e win).
        # TODO(synk): on v7x, whh could be held weight-stationary across the chunk
        # via pltpu.matmul_push_rhs / matmul_acc_lhs; plain jnp.dot kept for clarity.
        gf = xwf_ref[k].astype(jnp.float32) + jnp.dot(
            hf[...], whh_f, preferred_element_type=jnp.float32)     # [B, 4H]
        gb = xwb_ref[tb].astype(jnp.float32) + jnp.dot(
            hb[...], whh_b, preferred_element_type=jnp.float32)     # [B, 4H]
        h_f_new, c_f_new = gates_to_hc(gf, cf[...])
        h_b_new, c_b_new = gates_to_hc(gb, cb[...])
        # h is only ever consumed as a bf16 MXU operand / bf16 hseq row -> store bf16.
        hf_bf = h_f_new.astype(jnp.bfloat16)
        hb_bf = h_b_new.astype(jnp.bfloat16)
        hf[...] = hf_bf
        cf[...] = c_f_new
        hb[...] = hb_bf
        cb[...] = c_b_new
        hseqf_ref[k] = hf_bf
        hseqb_ref[tb] = hb_bf
        return carry

    jax.lax.fori_loop(0, t_chunk, step, 0, unroll=unroll)
    clast_ref[0] = cf[...]
    clast_ref[1] = cb[...]


def bidirectional_lstm(xw, whh_bf):
    """xw: [2, T, B, 4H] bf16 (x @ W_ih + b), whh_bf: [2, H, 4H] bf16."""
    _, T, B, H4 = xw.shape
    H = H4 // 4
    t_chunk = _pick_lstm_chunk(T, B, H)
    nc = T // t_chunk
    unroll = t_chunk <= 16

    grid_spec = pltpu.PrefetchScalarGridSpec(
        num_scalar_prefetch=0, grid=(nc,),
        in_specs=[
            # forward walks chunks 0..nc-1, backward walks nc-1..0 (no HBM reversal)
            pl.BlockSpec((None, t_chunk, B, H4), lambda c: (0, c, 0, 0)),
            pl.BlockSpec((None, t_chunk, B, H4), lambda c: (1, nc - 1 - c, 0, 0)),
            # grid-invariant recurrent weights: single-buffered to save VMEM
            pl.BlockSpec((None, H, H4), lambda c: (0, 0, 0),
                         pipeline_mode=pl.Buffered(buffer_count=1)),
            pl.BlockSpec((None, H, H4), lambda c: (1, 0, 0),
                         pipeline_mode=pl.Buffered(buffer_count=1)),
        ],
        out_specs=[
            pl.BlockSpec((t_chunk, B, H), lambda c: (c, 0, 0)),
            pl.BlockSpec((t_chunk, B, H), lambda c: (nc - 1 - c, 0, 0)),
            pl.BlockSpec((2, B, H), lambda c: (0, 0, 0)),
        ],
        scratch_shapes=[pltpu.VMEM((B, H), jnp.bfloat16),   # h fwd (bf16 MXU operand)
                        pltpu.VMEM((B, H), jnp.float32),    # c fwd
                        pltpu.VMEM((B, H), jnp.bfloat16),   # h bwd
                        pltpu.VMEM((B, H), jnp.float32)])   # c bwd
    hseq_f, hseq_b, clast = pl.pallas_call(
        functools.partial(_bilstm_chunk_kernel, t_chunk, H, unroll),
        out_shape=(jax.ShapeDtypeStruct((T, B, H), jnp.bfloat16),
                   jax.ShapeDtypeStruct((T, B, H), jnp.bfloat16),
                   jax.ShapeDtypeStruct((2, B, H), jnp.float32)),
        grid_spec=grid_spec,
        compiler_params=pltpu.CompilerParams(
            dimension_semantics=("arbitrary",),
            vmem_limit_bytes=_VMEM_LIMIT),
    )(xw, xw, whh_bf, whh_bf)
    return hseq_f, hseq_b, clast


# ----------------------------------------------------------------------------
# Kernel 2: fc_lstm + layernorm_lstm fused, concat-free (y = xa@Wa + xb@Wb + b)
# ----------------------------------------------------------------------------
def _dual_fc_ln_kernel(xa_ref, xb_ref, wa_ref, wb_ref, b_ref, g_ref, beta_ref,
                       o_ref):
    y = (jnp.dot(xa_ref[...], wa_ref[...], preferred_element_type=jnp.float32)
         + jnp.dot(xb_ref[...], wb_ref[...], preferred_element_type=jnp.float32)
         + b_ref[...])
    # single-pass LN statistics: var = E[x^2] - E[x]^2 (one fused cross-lane reduce)
    mean = jnp.mean(y, axis=-1, keepdims=True)
    var = jnp.mean(y * y, axis=-1, keepdims=True) - mean * mean
    o_ref[...] = (y - mean) * jax.lax.rsqrt(var + LN_EPS) * g_ref[...] + beta_ref[...]


def dual_fc_layernorm(xa, xb, wa_bf, wb_bf, b, gamma, beta, tile_rows=512):
    """xa/xb: [N, H] bf16; wa_bf/wb_bf: [H, Hout] bf16; b/gamma/beta: [1, Hout] f32."""
    N, H = xa.shape
    Hout = wa_bf.shape[1]
    tile = min(tile_rows, _round_up(N, 8))
    n_pad = _round_up(N, tile)
    if n_pad != N:
        xa = jnp.pad(xa, ((0, n_pad - N), (0, 0)))
        xb = jnp.pad(xb, ((0, n_pad - N), (0, 0)))

    def wspec():
        return pl.BlockSpec((H, Hout), lambda i: (0, 0),
                            pipeline_mode=pl.Buffered(buffer_count=1))

    def vspec():
        return pl.BlockSpec((1, Hout), lambda i: (0, 0))

    out = pl.pallas_call(
        _dual_fc_ln_kernel,
        out_shape=jax.ShapeDtypeStruct((n_pad, Hout), jnp.float32),
        grid_spec=pltpu.PrefetchScalarGridSpec(
            num_scalar_prefetch=0, grid=(n_pad // tile,),
            in_specs=[pl.BlockSpec((tile, H), lambda i: (i, 0)),
                      pl.BlockSpec((tile, H), lambda i: (i, 0)),
                      wspec(), wspec(), vspec(), vspec(), vspec()],
            out_specs=pl.BlockSpec((tile, Hout), lambda i: (i, 0))),
        compiler_params=pltpu.CompilerParams(
            dimension_semantics=("parallel",),
            vmem_limit_bytes=_VMEM_LIMIT),
    )(xa, xb, wa_bf, wb_bf, b, gamma, beta)
    return out[:N]


# ----------------------------------------------------------------------------
# Kernel 3: content-selection gate, tiled over (batch blocks, query tiles)
#   scores/exp/alpha are [bb, tq, S] (bounded by tq), keys stay resident per b-block.
# ----------------------------------------------------------------------------
def _content_gate_kernel(bb, tq, H, q_ref, k_ref, wr_ref, wga_ref, wgb_ref,
                         bg_ref, g_ref, beta_ref, o_ref):
    q = q_ref[...]                                          # [bb, tq, H] f32
    q2_bf = q.reshape(bb * tq, H).astype(jnp.bfloat16)
    k_bf = k_ref[...].astype(jnp.bfloat16)                  # [bb, S, H]

    a = jnp.dot(q2_bf, wr_ref[...],
                preferred_element_type=jnp.float32)         # [bb*tq, H]
    scores = jnp.einsum('bqk,btk->bqt',
                        a.reshape(bb, tq, H).astype(jnp.bfloat16), k_bf,
                        preferred_element_type=jnp.float32)  # [bb, tq, S]
    scores = scores - jnp.max(scores, axis=-1, keepdims=True)
    e = jnp.exp(scores)
    alpha = e * pl.reciprocal(jnp.sum(e, axis=-1, keepdims=True), approx=True)
    reply_c = jnp.einsum('bqt,bth->bqh', alpha.astype(jnp.bfloat16), k_bf,
                         preferred_element_type=jnp.float32)  # [bb, tq, H]

    # fc_gate on cat(rp, reply_c) without building the concat: two H-wide matmuls.
    y = (jnp.dot(q2_bf, wga_ref[...], preferred_element_type=jnp.float32)
         + jnp.dot(reply_c.reshape(bb * tq, H).astype(jnp.bfloat16), wgb_ref[...],
                   preferred_element_type=jnp.float32)
         + bg_ref[...])                                      # [bb*tq, H]
    mean = jnp.mean(y, axis=-1, keepdims=True)
    var = jnp.mean(y * y, axis=-1, keepdims=True) - mean * mean
    gate = jax.nn.sigmoid((y - mean) * jax.lax.rsqrt(var + LN_EPS)
                          * g_ref[...] + beta_ref[...])
    o_ref[...] = gate.reshape(bb, tq, H) * q


def content_selection_gate(reply_pre, w_reply, w_gate, b_gate, gamma, beta):
    B, S, H = reply_pre.shape
    bb, tq = _pick_gate_tiles(B, S, H)

    def wspec():
        return pl.BlockSpec((H, H), lambda b, q: (0, 0),
                            pipeline_mode=pl.Buffered(buffer_count=1))

    def vspec():
        return pl.BlockSpec((1, H), lambda b, q: (0, 0))

    grid_spec = pltpu.PrefetchScalarGridSpec(
        num_scalar_prefetch=0, grid=(B // bb, S // tq),
        in_specs=[pl.BlockSpec((bb, tq, H), lambda b, q: (b, q, 0)),   # query tile
                  pl.BlockSpec((bb, S, H), lambda b, q: (b, 0, 0)),    # keys/values
                  wspec(), wspec(), wspec(), vspec(), vspec(), vspec()],
        out_specs=pl.BlockSpec((bb, tq, H), lambda b, q: (b, q, 0)))
    return pl.pallas_call(
        functools.partial(_content_gate_kernel, bb, tq, H),
        out_shape=jax.ShapeDtypeStruct((B, S, H), jnp.float32),
        grid_spec=grid_spec,
        compiler_params=pltpu.CompilerParams(
            dimension_semantics=("parallel", "parallel"),
            vmem_limit_bytes=_VMEM_LIMIT),
    )(reply_pre, reply_pre,
      w_reply.astype(jnp.bfloat16),
      w_gate[:H].astype(jnp.bfloat16),
      w_gate[H:].astype(jnp.bfloat16),
      b_gate, gamma, beta)


# ----------------------------------------------------------------------------
# Parameters (deterministic, synthetic) and full forward
# ----------------------------------------------------------------------------
def init_params(key, field_vocab, pos_size, word_vocab, e_field, e_pos, e_word,
                hidden):
    ks = jax.random.split(key, 12)
    din = e_word + e_field + 2 * e_pos  # LSTM cell input: concat(seq_input, field_pos)

    def n(k, shape, scale=0.1):
        return (scale * jax.random.normal(k, shape)).astype(jnp.float32)

    return dict(
        field_emb=n(ks[0], (field_vocab, e_field), 1.0),
        pos_emb=n(ks[1], (pos_size, e_pos), 1.0),
        word_emb=n(ks[2], (word_vocab, e_word), 1.0),
        # LSTM weights with fused gate layout [.., 4H] = i|f|g|o, directions stacked.
        wih=n(ks[3], (2, din, 4 * hidden)),
        whh=n(ks[4], (2, hidden, 4 * hidden)),
        b=n(ks[5], (2, 1, 4 * hidden)),
        fc_lstm_w=n(ks[6], (2 * hidden, hidden)), fc_lstm_b=n(ks[7], (1, hidden)),
        ln_lstm_g=jnp.ones((1, hidden), jnp.float32),
        ln_lstm_b=jnp.zeros((1, hidden), jnp.float32),
        weight_reply=n(ks[8], (hidden, hidden), 1.0),
        fc_gate_w=n(ks[9], (2 * hidden, hidden)), fc_gate_b=n(ks[10], (1, hidden)),
        ln_gate_g=jnp.ones((1, hidden), jnp.float32),
        ln_gate_b=jnp.zeros((1, hidden), jnp.float32),
    )


def encoder_attn_forward(params, encoder_input):
    # encoder_input: [S, B, 4] int32 (field / pos / rpos / word ids)
    S, B, _ = encoder_input.shape
    H = params['fc_lstm_w'].shape[1]

    field_e = jnp.take(params['field_emb'], encoder_input[:, :, 0], axis=0)
    pos_e = jnp.take(params['pos_emb'], encoder_input[:, :, 1], axis=0)
    rpos_e = jnp.take(params['pos_emb'], encoder_input[:, :, 2], axis=0)
    val_e = jnp.take(params['word_emb'], encoder_input[:, :, 3], axis=0)

    # dropout: eval-mode identity (no train-time RNG reproduced)
    # TODO(synk): BidirectionalLSTM / CustomLstmCell sources are not provided; modeled
    # as a standard bi-LSTM whose per-step input is concat(seq_input, field_pos).
    x = jnp.concatenate([field_e, val_e, pos_e, rpos_e], axis=2)       # [S, B, Din]

    # Hoisted input projection, stored in bf16 (halves the recurrence's dominant
    # DMA stream); in-kernel gate math accumulates in f32.
    xw = (jnp.einsum('tbd,zdg->ztbg', x.astype(jnp.bfloat16),
                     params['wih'].astype(jnp.bfloat16),
                     preferred_element_type=jnp.float32)
          + params['b'][:, None]).astype(jnp.bfloat16)                 # [2, S, B, 4H]

    hseq_f, hseq_b, clast = bidirectional_lstm(xw, params['whh'].astype(jnp.bfloat16))

    # fc_lstm + layernorm_lstm: one fused call over (encoder_output rows, h_n, c_n),
    # the [., 2H] concat replaced by two H-wide matmuls; activations stay bf16 on HBM.
    xa = jnp.concatenate([hseq_f.reshape(S * B, H), hseq_f[-1],
                          clast[0].astype(jnp.bfloat16)], axis=0)
    xb = jnp.concatenate([hseq_b.reshape(S * B, H), hseq_b[0],
                          clast[1].astype(jnp.bfloat16)], axis=0)
    fused = dual_fc_layernorm(
        xa, xb,
        params['fc_lstm_w'][:H].astype(jnp.bfloat16),
        params['fc_lstm_w'][H:].astype(jnp.bfloat16),
        params['fc_lstm_b'], params['ln_lstm_g'], params['ln_lstm_b'])
    eo = fused[:S * B].reshape(S, B, H)
    h_n = fused[S * B:S * B + B]
    c_n = fused[S * B + B:]

    # TODO(synk): this [S,B,H]->[B,S,H] transpose is the one remaining XLA-level HBM
    # round trip; it can be folded into the gate kernel (batch-major read of
    # [tq,B,H] blocks + in-kernel pltpu.einshape relayout) — kept out to stay on the
    # known-good batched-einsum lowering path.
    reply_pre = jnp.transpose(eo, (1, 0, 2))                           # [B, S, H]
    content_selection = content_selection_gate(
        reply_pre, params['weight_reply'],
        params['fc_gate_w'], params['fc_gate_b'],
        params['ln_gate_g'], params['ln_gate_b'])
    return content_selection, (h_n, c_n)


# ----------------------------------------------------------------------------
# Pure-JAX reference (mirrors the kernels' bf16 operand / xw / hidden-state rounding)
# ----------------------------------------------------------------------------
def _bdot(a, b):
    return jnp.dot(a.astype(jnp.bfloat16), b.astype(jnp.bfloat16),
                   preferred_element_type=jnp.float32)


def _ref_ln(y, g, b):
    m = jnp.mean(y, -1, keepdims=True)
    v = jnp.mean(jnp.square(y - m), -1, keepdims=True)
    return (y - m) * jax.lax.rsqrt(v + LN_EPS) * g + b


def reference_forward(params, encoder_input):
    H = params['fc_lstm_w'].shape[1]
    field_e = params['field_emb'][encoder_input[:, :, 0]]
    pos_e = params['pos_emb'][encoder_input[:, :, 1]]
    rpos_e = params['pos_emb'][encoder_input[:, :, 2]]
    val_e = params['word_emb'][encoder_input[:, :, 3]]
    x = jnp.concatenate([field_e, val_e, pos_e, rpos_e], axis=2)

    # mirror bf16 storage of the hoisted input projection
    xw = (jnp.einsum('tbd,zdg->ztbg', x.astype(jnp.bfloat16),
                     params['wih'].astype(jnp.bfloat16),
                     preferred_element_type=jnp.float32)
          + params['b'][:, None]).astype(jnp.bfloat16)

    def run_lstm(xw_d, whh):
        B = xw_d.shape[1]

        def step(carry, xw_t):
            h, c = carry
            gates = xw_t.astype(jnp.float32) + _bdot(h, whh)
            i = jax.nn.sigmoid(gates[:, :H])
            f = jax.nn.sigmoid(gates[:, H:2 * H])
            g = jnp.tanh(gates[:, 2 * H:3 * H])
            o = jax.nn.sigmoid(gates[:, 3 * H:])
            c = f * c + i * g
            h = (o * jnp.tanh(c)).astype(jnp.bfloat16)   # mirror bf16 hidden state
            return (h, c), h

        init = (jnp.zeros((B, H), jnp.bfloat16), jnp.zeros((B, H), jnp.float32))
        (h, c), hs = jax.lax.scan(step, init, xw_d)
        return hs, h, c

    h_f, hn_f, cn_f = run_lstm(xw[0], params['whh'][0])
    h_b_r, hn_b, cn_b = run_lstm(xw[1][::-1], params['whh'][1])
    enc = jnp.concatenate([h_f, h_b_r[::-1]], axis=2)

    fc = lambda z: _ref_ln(_bdot(z, params['fc_lstm_w']) + params['fc_lstm_b'],
                           params['ln_lstm_g'], params['ln_lstm_b'])
    eo = fc(enc)
    h_n = fc(jnp.concatenate([hn_f, hn_b], axis=1))
    c_n = fc(jnp.concatenate([cn_f, cn_b], axis=1))

    rp = jnp.transpose(eo, (1, 0, 2))                                  # [B, S, H]
    rp_bf = rp.astype(jnp.bfloat16)
    a = jnp.einsum('bsh,hk->bsk', rp_bf,
                   params['weight_reply'].astype(jnp.bfloat16),
                   preferred_element_type=jnp.float32)
    scores = jnp.einsum('bsk,btk->bst', a.astype(jnp.bfloat16), rp_bf,
                        preferred_element_type=jnp.float32)
    alpha = jax.nn.softmax(scores, axis=2)
    rc = jnp.einsum('bst,bth->bsh', alpha.astype(jnp.bfloat16), rp_bf,
                    preferred_element_type=jnp.float32)
    cat = jnp.concatenate([rp, rc], axis=2)
    gate = jax.nn.sigmoid(_ref_ln(
        _bdot(cat, params['fc_gate_w']) + params['fc_gate_b'],
        params['ln_gate_g'], params['ln_gate_b']))
    return gate * rp, (h_n, c_n)


# ----------------------------------------------------------------------------
if __name__ == "__main__":
    field_vocab, pos_size, word_vocab = 10, 12, 20
    e_field, e_pos, e_word, hidden = 8, 4, 8, 16
    S, B = 8, 2

    key = jax.random.PRNGKey(0)
    pkey, ikey = jax.random.split(key)
    params = init_params(pkey, field_vocab, pos_size, word_vocab,
                         e_field, e_pos, e_word, hidden)
    ks = jax.random.split(ikey, 4)
    encoder_input = jnp.stack([
        jax.random.randint(ks[0], (S, B), 0, field_vocab),
        jax.random.randint(ks[1], (S, B), 0, pos_size),
        jax.random.randint(ks[2], (S, B), 0, pos_size),
        jax.random.randint(ks[3], (S, B), 0, word_vocab)], axis=-1).astype(jnp.int32)

    cs, (h_n, c_n) = jax.block_until_ready(
        jax.jit(encoder_attn_forward)(params, encoder_input))

    ref_cs, (ref_h, ref_c) = reference_forward(params, encoder_input)
    assert cs.shape == (B, S, hidden)
    assert h_n.shape == (B, hidden) and c_n.shape == (B, hidden)
    np.testing.assert_allclose(np.asarray(cs), np.asarray(ref_cs), atol=2e-2, rtol=2e-2)
    np.testing.assert_allclose(np.asarray(h_n), np.asarray(ref_h), atol=2e-2, rtol=2e-2)
    np.testing.assert_allclose(np.asarray(c_n), np.asarray(ref_c), atol=2e-2, rtol=2e-2)

    print("KERNEL_OK")
</pallas_src>

<mosaic_0001>
module attributes {stable_mosaic.version = 11 : i64} {
  func.func @_bilstm_chunk_kernel(%arg0: i32, %arg1: memref<1x8x2x64xbf16, #tpu.memory_space<vmem>>, %arg2: memref<1x8x2x64xbf16, #tpu.memory_space<vmem>>, %arg3: memref<1x16x64xbf16, #tpu.memory_space<vmem>>, %arg4: memref<1x16x64xbf16, #tpu.memory_space<vmem>>, %arg5: memref<8x2x16xbf16, #tpu.memory_space<vmem>>, %arg6: memref<8x2x16xbf16, #tpu.memory_space<vmem>>, %arg7: memref<2x2x16xf32, #tpu.memory_space<vmem>>, %arg8: memref<2x16xbf16, #tpu.memory_space<vmem>>, %arg9: memref<2x16xf32, #tpu.memory_space<vmem>>, %arg10: memref<2x16xbf16, #tpu.memory_space<vmem>>, %arg11: memref<2x16xf32, #tpu.memory_space<vmem>>) attributes {dimension_semantics = [#tpu.dimension_semantics<arbitrary>], iteration_bounds = array<i64: 1>, scalar_prefetch = 0 : i64, scratch_operands = 4 : i64, tpu.core_type = #tpu.core_type<tc>, window_params = [{transform_indices = @transform_0, window_bounds = array<i64: 1, 8, 2, 64>}, {transform_indices = @transform_1, window_bounds = array<i64: 1, 8, 2, 64>}, {pipeline_mode = #tpu.pipeline_mode<synchronous>, transform_indices = @transform_2, window_bounds = array<i64: 1, 16, 64>}, {pipeline_mode = #tpu.pipeline_mode<synchronous>, transform_indices = @transform_3, window_bounds = array<i64: 1, 16, 64>}, {transform_indices = @transform_4, window_bounds = array<i64: 8, 2, 16>}, {transform_indices = @transform_5, window_bounds = array<i64: 8, 2, 16>}, {pipeline_mode = #tpu.pipeline_mode<synchronous>, transform_indices = @transform_6, window_bounds = array<i64: 2, 2, 16>}]} {
    %c0_i32 = arith.constant 0 : i32
    %0 = arith.cmpi eq, %arg0, %c0_i32 : i32
    %1 = arith.extui %0 : i1 to i32
    %c0_i32_0 = arith.constant 0 : i32
    %2 = arith.cmpi ne, %1, %c0_i32_0 : i32
    scf.if %2 {
      %cst_295 = arith.constant 0.000000e+00 : bf16
      %663 = vector.broadcast %cst_295 : bf16 to vector<2x16xbf16>
      %c0_296 = arith.constant 0 : index
      %c0_297 = arith.constant 0 : index
      %664 = vector.load %arg8[%c0_296, %c0_297] : memref<2x16xbf16, #tpu.memory_space<vmem>>, vector<2x16xbf16>
      tpu.vector_store %arg8[%c0_296, %c0_297], %663 {strides = array<i32>} : memref<2x16xbf16, #tpu.memory_space<vmem>>, vector<2x16xbf16>,
      %cst_298 = arith.constant 0.000000e+00 : f32
      %665 = vector.broadcast %cst_298 : f32 to vector<2x16xf32>
      %c0_299 = arith.constant 0 : index
      %c0_300 = arith.constant 0 : index
      %666 = vector.load %arg9[%c0_299, %c0_300] : memref<2x16xf32, #tpu.memory_space<vmem>>, vector<2x16xf32>
      tpu.vector_store %arg9[%c0_299, %c0_300], %665 {strides = array<i32>} : memref<2x16xf32, #tpu.memory_space<vmem>>, vector<2x16xf32>,
      %cst_301 = arith.constant 0.000000e+00 : bf16
      %667 = vector.broadcast %cst_301 : bf16 to vector<2x16xbf16>
      %c0_302 = arith.constant 0 : index
      %c0_303 = arith.constant 0 : index
      %668 = vector.load %arg10[%c0_302, %c0_303] : memref<2x16xbf16, #tpu.memory_space<vmem>>, vector<2x16xbf16>
      tpu.vector_store %arg10[%c0_302, %c0_303], %667 {strides = array<i32>} : memref<2x16xbf16, #tpu.memory_space<vmem>>, vector<2x16xbf16>,
      %cst_304 = arith.constant 0.000000e+00 : f32
      %669 = vector.broadcast %cst_304 : f32 to vector<2x16xf32>
      %c0_305 = arith.constant 0 : index
      %c0_306 = arith.constant 0 : index
      %670 = vector.load %arg11[%c0_305, %c0_306] : memref<2x16xf32, #tpu.memory_space<vmem>>, vector<2x16xf32>
      tpu.vector_store %arg11[%c0_305, %c0_306], %669 {strides = array<i32>} : memref<2x16xf32, #tpu.memory_space<vmem>>, vector<2x16xf32>,
    } else {
    }
    %c0 = arith.constant 0 : index
    %c0_1 = arith.constant 0 : index
    %c0_2 = arith.constant 0 : index
    %3 = vector.load %arg3[%c0, %c0_1, %c0_2] : memref<1x16x64xbf16, #tpu.memory_space<vmem>>, vector<1x16x64xbf16>
    %4 = vector.shape_cast %3 : vector<1x16x64xbf16> to vector<16x64xbf16>
    %c0_3 = arith.constant 0 : index
    %c0_4 = arith.constant 0 : index
    %c0_5 = arith.constant 0 : index
    %5 = vector.load %arg4[%c0_3, %c0_4, %c0_5] : memref<1x16x64xbf16, #tpu.memory_space<vmem>>, vector<1x16x64xbf16>
    %6 = vector.shape_cast %5 : vector<1x16x64xbf16> to vector<16x64xbf16>
    %c0_i32_6 = arith.constant 0 : i32
    %c7_i32 = arith.constant 7 : i32
    %7 = arith.subi %c7_i32, %c0_i32_6 : i32
    %c0_7 = arith.constant 0 : index
    %8 = arith.index_cast %c0_i32_6 : i32 to index
    %c0_8 = arith.constant 0 : index
    %c0_9 = arith.constant 0 : index
    %9 = vector.load %arg1[%c0_7, %8, %c0_8, %c0_9] : memref<1x8x2x64xbf16, #tpu.memory_space<vmem>>, vector<1x1x2x64xbf16>
    %10 = vector.shape_cast %9 : vector<1x1x2x64xbf16> to vector<2x64xbf16>
    %11 = arith.extf %10 : vector<2x64xbf16> to vector<2x64xf32>
    %c0_10 = arith.constant 0 : index
    %c0_11 = arith.constant 0 : index
    %12 = vector.load %arg8[%c0_10, %c0_11] : memref<2x16xbf16, #tpu.memory_space<vmem>>, vector<2x16xbf16>
    %cst = arith.constant dense<0.000000e+00> : vector<2x64xf32>
    %13 = tpu.matmul %12, %4, %cst {dimension_numbers = #tpu.dot_dimension_numbers<[1], [0], [0], [1], [0, 0, 1, 1], [], []>} : vector<2x16xbf16>, vector<16x64xbf16>, vector<2x64xf32> -> vector<2x64xf32>
    %14 = arith.addf %11, %13 : vector<2x64xf32>
    %c0_12 = arith.constant 0 : index
    %15 = arith.index_cast %7 : i32 to index
    %c0_13 = arith.constant 0 : index
    %c0_14 = arith.constant 0 : index
    %16 = vector.load %arg2[%c0_12, %15, %c0_13, %c0_14] : memref<1x8x2x64xbf16, #tpu.memory_space<vmem>>, vector<1x1x2x64xbf16>
    %17 = vector.shape_cast %16 : vector<1x1x2x64xbf16> to vector<2x64xbf16>
    %18 = arith.extf %17 : vector<2x64xbf16> to vector<2x64xf32>
    %c0_15 = arith.constant 0 : index
    %c0_16 = arith.constant 0 : index
    %19 = vector.load %arg10[%c0_15, %c0_16] : memref<2x16xbf16, #tpu.memory_space<vmem>>, vector<2x16xbf16>
    %cst_17 = arith.constant dense<0.000000e+00> : vector<2x64xf32>
    %20 = tpu.matmul %19, %6, %cst_17 {dimension_numbers = #tpu.dot_dimension_numbers<[1], [0], [0], [1], [0, 0, 1, 1], [], []>} : vector<2x16xbf16>, vector<16x64xbf16>, vector<2x64xf32> -> vector<2x64xf32>
    %21 = arith.addf %18, %20 : vector<2x64xf32>
    %c0_18 = arith.constant 0 : index
    %c0_19 = arith.constant 0 : index
    %22 = vector.load %arg9[%c0_18, %c0_19] : memref<2x16xf32, #tpu.memory_space<vmem>>, vector<2x16xf32>
    %23 = vector.extract_strided_slice %14 {offsets = [0, 0], sizes = [2, 16], strides = [1, 1]} : vector<2x64xf32> to vector<2x16xf32>
    %24 = arith.negf %23 : vector<2x16xf32>
    %25 = math.exp %24 : vector<2x16xf32>
    %cst_20 = arith.constant 1.000000e+00 : f32
    %26 = vector.broadcast %cst_20 : f32 to vector<2x16xf32>
    %27 = arith.addf %26, %25 : vector<2x16xf32>
    %28 = arith.divf %26, %27 : vector<2x16xf32>
    %29 = vector.extract_strided_slice %14 {offsets = [0, 16], sizes = [2, 16], strides = [1, 1]} : vector<2x64xf32> to vector<2x16xf32>
    %30 = arith.negf %29 : vector<2x16xf32>
    %31 = math.exp %30 : vector<2x16xf32>
    %cst_21 = arith.constant 1.000000e+00 : f32
    %32 = vector.broadcast %cst_21 : f32 to vector<2x16xf32>
    %33 = arith.addf %32, %31 : vector<2x16xf32>
    %34 = arith.divf %32, %33 : vector<2x16xf32>
    %35 = vector.extract_strided_slice %14 {offsets = [0, 32], sizes = [2, 16], strides = [1, 1]} : vector<2x64xf32> to vector<2x16xf32>
    %36 = math.tanh %35 : vector<2x16xf32>
    %37 = vector.extract_strided_slice %14 {offsets = [0, 48], sizes = [2, 16], strides = [1, 1]} : vector<2x64xf32> to vector<2x16xf32>
    %38 = arith.negf %37 : vector<2x16xf32>
    %39 = math.exp %38 : vector<2x16xf32>
    %cst_22 = arith.constant 1.000000e+00 : f32
    %40 = vector.broadcast %cst_22 : f32 to vector<2x16xf32>
    %41 = arith.addf %40, %39 : vector<2x16xf32>
    %42 = arith.divf %40, %41 : vector<2x16xf32>
    %43 = arith.mulf %34, %22 : vector<2x16xf32>
    %44 = arith.mulf %28, %36 : vector<2x16xf32>
    %45 = arith.addf %43, %44 : vector<2x16xf32>
    %46 = math.tanh %45 : vector<2x16xf32>
    %47 = arith.mulf %42, %46 : vector<2x16xf32>
    %c0_23 = arith.constant 0 : index
    %c0_24 = arith.constant 0 : index
    %48 = vector.load %arg11[%c0_23, %c0_24] : memref<2x16xf32, #tpu.memory_space<vmem>>, vector<2x16xf32>
    %49 = vector.extract_strided_slice %21 {offsets = [0, 0], sizes = [2, 16], strides = [1, 1]} : vector<2x64xf32> to vector<2x16xf32>
    %50 = arith.negf %49 : vector<2x16xf32>
    %51 = math.exp %50 : vector<2x16xf32>
    %cst_25 = arith.constant 1.000000e+00 : f32
    %52 = vector.broadcast %cst_25 : f32 to vector<2x16xf32>
    %53 = arith.addf %52, %51 : vector<2x16xf32>
    %54 = arith.divf %52, %53 : vector<2x16xf32>
    %55 = vector.extract_strided_slice %21 {offsets = [0, 16], sizes = [2, 16], strides = [1, 1]} : vector<2x64xf32> to vector<2x16xf32>
    %56 = arith.negf %55 : vector<2x16xf32>
    %57 = math.exp %56 : vector<2x16xf32>
    %cst_26 = arith.constant 1.000000e+00 : f32
    %58 = vector.broadcast %cst_26 : f32 to vector<2x16xf32>
    %59 = arith.addf %58, %57 : vector<2x16xf32>
    %60 = arith.divf %58, %59 : vector<2x16xf32>
    %61 = vector.extract_strided_slice %21 {offsets = [0, 32], sizes = [2, 16], strides = [1, 1]} : vector<2x64xf32> to vector<2x16xf32>
    %62 = math.tanh %61 : vector<2x16xf32>
    %63 = vector.extract_strided_slice %21 {offsets = [0, 48], sizes = [2, 16], strides = [1, 1]} : vector<2x64xf32> to vector<2x16xf32>
    %64 = arith.negf %63 : vector<2x16xf32>
    %65 = math.exp %64 : vector<2x16xf32>
    %cst_27 = arith.constant 1.000000e+00 : f32
    %66 = vector.broadcast %cst_27 : f32 to vector<2x16xf32>
    %67 = arith.addf %66, %65 : vector<2x16xf32>
    %68 = arith.divf %66, %67 : vector<2x16xf32>
    %69 = arith.mulf %60, %48 : vector<2x16xf32>
    %70 = arith.mulf %54, %62 : vector<2x16xf32>
    %71 = arith.addf %69, %70 : vector<2x16xf32>
    %72 = math.tanh %71 : vector<2x16xf32>
    %73 = arith.mulf %68, %72 : vector<2x16xf32>
    %74 = arith.truncf %47 : vector<2x16xf32> to vector<2x16xbf16>
    %75 = arith.truncf %73 : vector<2x16xf32> to vector<2x16xbf16>
    %c0_28 = arith.constant 0 : index
    %c0_29 = arith.constant 0 : index
    %76 = vector.load %arg8[%c0_28, %c0_29] : memref<2x16xbf16, #tpu.memory_space<vmem>>, vector<2x16xbf16>
    tpu.vector_store %arg8[%c0_28, %c0_29], %74 {strides = array<i32>} : memref<2x16xbf16, #tpu.memory_space<vmem>>, vector<2x16xbf16>,
    %c0_30 = arith.constant 0 : index
    %c0_31 = arith.constant 0 : index
    %77 = vector.load %arg9[%c0_30, %c0_31] : memref<2x16xf32, #tpu.memory_space<vmem>>, vector<2x16xf32>
    tpu.vector_store %arg9[%c0_30, %c0_31], %45 {strides = array<i32>} : memref<2x16xf32, #tpu.memory_space<vmem>>, vector<2x16xf32>,
    %c0_32 = arith.constant 0 : index
    %c0_33 = arith.constant 0 : index
    %78 = vector.load %arg10[%c0_32, %c0_33] : memref<2x16xbf16, #tpu.memory_space<vmem>>, vector<2x16xbf16>
    tpu.vector_store %arg10[%c0_32, %c0_33], %75 {strides = array<i32>} : memref<2x16xbf16, #tpu.memory_space<vmem>>, vector<2x16xbf16>,
    %c0_34 = arith.constant 0 : index
    %c0_35 = arith.constant 0 : index
    %79 = vector.load %arg11[%c0_34, %c0_35] : memref<2x16xf32, #tpu.memory_space<vmem>>, vector<2x16xf32>
    tpu.vector_store %arg11[%c0_34, %c0_35], %71 {strides = array<i32>} : memref<2x16xf32, #tpu.memory_space<vmem>>, vector<2x16xf32>,
    %80 = arith.index_cast %c0_i32_6 : i32 to index
    %c0_36 = arith.constant 0 : index
    %c0_37 = arith.constant 0 : index
    %81 = vector.load %arg5[%80, %c0_36, %c0_37] : memref<8x2x16xbf16, #tpu.memory_space<vmem>>, vector<1x2x16xbf16>
    %82 = vector.shape_cast %81 : vector<1x2x16xbf16> to vector<2x16xbf16>
    %83 = vector.shape_cast %74 : vector<2x16xbf16> to vector<1x2x16xbf16>
    tpu.vector_store %arg5[%80, %c0_36, %c0_37], %83 {strides = array<i32>} : memref<8x2x16xbf16, #tpu.memory_space<vmem>>, vector<1x2x16xbf16>,
    %84 = arith.index_cast %7 : i32 to index
    %c0_38 = arith.constant 0 : index
    %c0_39 = arith.constant 0 : index
    %85 = vector.load %arg6[%84, %c0_38, %c0_39] : memref<8x2x16xbf16, #tpu.memory_space<vmem>>, vector<1x2x16xbf16>
    %86 = vector.shape_cast %85 : vector<1x2x16xbf16> to vector<2x16xbf16>
    %87 = vector.shape_cast %75 : vector<2x16xbf16> to vector<1x2x16xbf16>
    tpu.vector_store %arg6[%84, %c0_38, %c0_39], %87 {strides = array<i32>} : memref<8x2x16xbf16, #tpu.memory_space<vmem>>, vector<1x2x16xbf16>,
    %c1_i32 = arith.constant 1 : i32
    %c7_i32_40 = arith.constant 7 : i32
    %88 = arith.subi %c7_i32_40, %c1_i32 : i32
    %c0_41 = arith.constant 0 : index
    %89 = arith.index_cast %c1_i32 : i32 to index
    %c0_42 = arith.constant 0 : index
    %c0_43 = arith.constant 0 : index
    %90 = vector.load %arg1[%c0_41, %89, %c0_42, %c0_43] : memref<1x8x2x64xbf16, #tpu.memory_space<vmem>>, vector<1x1x2x64xbf16>
    %91 = vector.shape_cast %90 : vector<1x1x2x64xbf16> to vector<2x64xbf16>
    %92 = arith.extf %91 : vector<2x64xbf16> to vector<2x64xf32>
    %c0_44 = arith.constant 0 : index
    %c0_45 = arith.constant 0 : index
    %93 = vector.load %arg8[%c0_44, %c0_45] : memref<2x16xbf16, #tpu.memory_space<vmem>>, vector<2x16xbf16>
    %cst_46 = arith.constant dense<0.000000e+00> : vector<2x64xf32>
    %94 = tpu.matmul %93, %4, %cst_46 {dimension_numbers = #tpu.dot_dimension_numbers<[1], [0], [0], [1], [0, 0, 1, 1], [], []>} : vector<2x16xbf16>, vector<16x64xbf16>, vector<2x64xf32> -> vector<2x64xf32>
    %95 = arith.addf %92, %94 : vector<2x64xf32>
    %c0_47 = arith.constant 0 : index
    %96 = arith.index_cast %88 : i32 to index
    %c0_48 = arith.constant 0 : index
    %c0_49 = arith.constant 0 : index
    %97 = vector.load %arg2[%c0_47, %96, %c0_48, %c0_49] : memref<1x8x2x64xbf16, #tpu.memory_space<vmem>>, vector<1x1x2x64xbf16>
    %98 = vector.shape_cast %97 : vector<1x1x2x64xbf16> to vector<2x64xbf16>
    %99 = arith.extf %98 : vector<2x64xbf16> to vector<2x64xf32>
    %c0_50 = arith.constant 0 : index
    %c0_51 = arith.constant 0 : index
    %100 = vector.load %arg10[%c0_50, %c0_51] : memref<2x16xbf16, #tpu.memory_space<vmem>>, vector<2x16xbf16>
    %cst_52 = arith.constant dense<0.000000e+00> : vector<2x64xf32>
    %101 = tpu.matmul %100, %6, %cst_52 {dimension_numbers = #tpu.dot_dimension_numbers<[1], [0], [0], [1], [0, 0, 1, 1], [], []>} : vector<2x16xbf16>, vector<16x64xbf16>, vector<2x64xf32> -> vector<2x64xf32>
    %102 = arith.addf %99, %101 : vector<2x64xf32>
    %c0_53 = arith.constant 0 : index
    %c0_54 = arith.constant 0 : index
    %103 = vector.load %arg9[%c0_53, %c0_54] : memref<2x16xf32, #tpu.memory_space<vmem>>, vector<2x16xf32>
    %104 = vector.extract_strided_slice %95 {offsets = [0, 0], sizes = [2, 16], strides = [1, 1]} : vector<2x64xf32> to vector<2x16xf32>
    %105 = arith.negf %104 : vector<2x16xf32>
    %106 = math.exp %105 : vector<2x16xf32>
    %cst_55 = arith.constant 1.000000e+00 : f32
    %107 = vector.broadcast %cst_55 : f32 to vector<2x16xf32>
    %108 = arith.addf %107, %106 : vector<2x16xf32>
    %109 = arith.divf %107, %108 : vector<2x16xf32>
    %110 = vector.extract_strided_slice %95 {offsets = [0, 16], sizes = [2, 16], strides = [1, 1]} : vector<2x64xf32> to vector<2x16xf32>
    %111 = arith.negf %110 : vector<2x16xf32>
    %112 = math.exp %111 : vector<2x16xf32>
    %cst_56 = arith.constant 1.000000e+00 : f32
    %113 = vector.broadcast %cst_56 : f32 to vector<2x16xf32>
    %114 = arith.addf %113, %112 : vector<2x16xf32>
    %115 = arith.divf %113, %114 : vector<2x16xf32>
    %116 = vector.extract_strided_slice %95 {offsets = [0, 32], sizes = [2, 16], strides = [1, 1]} : vector<2x64xf32> to vector<2x16xf32>
    %117 = math.tanh %116 : vector<2x16xf32>
    %118 = vector.extract_strided_slice %95 {offsets = [0, 48], sizes = [2, 16], strides = [1, 1]} : vector<2x64xf32> to vector<2x16xf32>
    %119 = arith.negf %118 : vector<2x16xf32>
    %120 = math.exp %119 : vector<2x16xf32>
    %cst_57 = arith.constant 1.000000e+00 : f32
    %121 = vector.broadcast %cst_57 : f32 to vector<2x16xf32>
    %122 = arith.addf %121, %120 : vector<2x16xf32>
    %123 = arith.divf %121, %122 : vector<2x16xf32>
    %124 = arith.mulf %115, %103 : vector<2x16xf32>
    %125 = arith.mulf %109, %117 : vector<2x16xf32>
    %126 = arith.addf %124, %125 : vector<2x16xf32>
    %127 = math.tanh %126 : vector<2x16xf32>
    %128 = arith.mulf %123, %127 : vector<2x16xf32>
    %c0_58 = arith.constant 0 : index
    %c0_59 = arith.constant 0 : index
    %129 = vector.load %arg11[%c0_58, %c0_59] : memref<2x16xf32, #tpu.memory_space<vmem>>, vector<2x16xf32>
    %130 = vector.extract_strided_slice %102 {offsets = [0, 0], sizes = [2, 16], strides = [1, 1]} : vector<2x64xf32> to vector<2x16xf32>
    %131 = arith.negf %130 : vector<2x16xf32>
    %132 = math.exp %131 : vector<2x16xf32>
    %cst_60 = arith.constant 1.000000e+00 : f32
    %133 = vector.broadcast %cst_60 : f32 to vector<2x16xf32>
    %134 = arith.addf %133, %132 : vector<2x16xf32>
    %135 = arith.divf %133, %134 : vector<2x16xf32>
    %136 = vector.extract_strided_slice %102 {offsets = [0, 16], sizes = [2, 16], strides = [1, 1]} : vector<2x64xf32> to vector<2x16xf32>
    %137 = arith.negf %136 : vector<2x16xf32>
    %138 = math.exp %137 : vector<2x16xf32>
    %cst_61 = arith.constant 1.000000e+00 : f32
    %139 = vector.broadcast %cst_61 : f32 to vector<2x16xf32>
    %140 = arith.addf %139, %138 : vector<2x16xf32>
    %141 = arith.divf %139, %140 : vector<2x16xf32>
    %142 = vector.extract_strided_slice %102 {offsets = [0, 32], sizes = [2, 16], strides = [1, 1]} : vector<2x64xf32> to vector<2x16xf32>
    %143 = math.tanh %142 : vector<2x16xf32>
    %144 = vector.extract_strided_slice %102 {offsets = [0, 48], sizes = [2, 16], strides = [1, 1]} : vector<2x64xf32> to vector<2x16xf32>
    %145 = arith.negf %144 : vector<2x16xf32>
    %146 = math.exp %145 : vector<2x16xf32>
    %cst_62 = arith.constant 1.000000e+00 : f32
    %147 = vector.broadcast %cst_62 : f32 to vector<2x16xf32>
    %148 = arith.addf %147, %146 : vector<2x16xf32>
    %149 = arith.divf %147, %148 : vector<2x16xf32>
    %150 = arith.mulf %141, %129 : vector<2x16xf32>
    %151 = arith.mulf %135, %143 : vector<2x16xf32>
    %152 = arith.addf %150, %151 : vector<2x16xf32>
    %153 = math.tanh %152 : vector<2x16xf32>
    %154 = arith.mulf %149, %153 : vector<2x16xf32>
    %155 = arith.truncf %128 : vector<2x16xf32> to vector<2x16xbf16>
    %156 = arith.truncf %154 : vector<2x16xf32> to vector<2x16xbf16>
    %c0_63 = arith.constant 0 : index
    %c0_64 = arith.constant 0 : index
    %157 = vector.load %arg8[%c0_63, %c0_64] : memref<2x16xbf16, #tpu.memory_space<vmem>>, vector<2x16xbf16>
    tpu.vector_store %arg8[%c0_63, %c0_64], %155 {strides = array<i32>} : memref<2x16xbf16, #tpu.memory_space<vmem>>, vector<2x16xbf16>,
    %c0_65 = arith.constant 0 : index
    %c0_66 = arith.constant 0 : index
    %158 = vector.load %arg9[%c0_65, %c0_66] : memref<2x16xf32, #tpu.memory_space<vmem>>, vector<2x16xf32>
    tpu.vector_store %arg9[%c0_65, %c0_66], %126 {strides = array<i32>} : memref<2x16xf32, #tpu.memory_space<vmem>>, vector<2x16xf32>,
    %c0_67 = arith.constant 0 : index
    %c0_68 = arith.constant 0 : index
    %159 = vector.load %arg10[%c0_67, %c0_68] : memref<2x16xbf16, #tpu.memory_space<vmem>>, vector<2x16xbf16>
    tpu.vector_store %arg10[%c0_67, %c0_68], %156 {strides = array<i32>} : memref<2x16xbf16, #tpu.memory_space<vmem>>, vector<2x16xbf16>,
    %c0_69 = arith.constant 0 : index
    %c0_70 = arith.constant 0 : index
    %160 = vector.load %arg11[%c0_69, %c0_70] : memref<2x16xf32, #tpu.memory_space<vmem>>, vector<2x16xf32>
    tpu.vector_store %arg11[%c0_69, %c0_70], %152 {strides = array<i32>} : memref<2x16xf32, #tpu.memory_space<vmem>>, vector<2x16xf32>,
    %161 = arith.index_cast %c1_i32 : i32 to index
    %c0_71 = arith.constant 0 : index
    %c0_72 = arith.constant 0 : index
    %162 = vector.load %arg5[%161, %c0_71, %c0_72] : memref<8x2x16xbf16, #tpu.memory_space<vmem>>, vector<1x2x16xbf16>
    %163 = vector.shape_cast %162 : vector<1x2x16xbf16> to vector<2x16xbf16>
    %164 = vector.shape_cast %155 : vector<2x16xbf16> to vector<1x2x16xbf16>
    tpu.vector_store %arg5[%161, %c0_71, %c0_72], %164 {strides = array<i32>} : memref<8x2x16xbf16, #tpu.memory_space<vmem>>, vector<1x2x16xbf16>,
    %165 = arith.index_cast %88 : i32 to index
    %c0_73 = arith.constant 0 : index
    %c0_74 = arith.constant 0 : index
    %166 = vector.load %arg6[%165, %c0_73, %c0_74] : memref<8x2x16xbf16, #tpu.memory_space<vmem>>, vector<1x2x16xbf16>
    %167 = vector.shape_cast %166 : vector<1x2x16xbf16> to vector<2x16xbf16>
    %168 = vector.shape_cast %156 : vector<2x16xbf16> to vector<1x2x16xbf16>
    tpu.vector_store %arg6[%165, %c0_73, %c0_74], %168 {strides = array<i32>} : memref<8x2x16xbf16, #tpu.memory_space<vmem>>, vector<1x2x16xbf16>,
    %c2_i32 = arith.constant 2 : i32
    %c7_i32_75 = arith.constant 7 : i32
    %169 = arith.subi %c7_i32_75, %c2_i32 : i32
    %c0_76 = arith.constant 0 : index
    %170 = arith.index_cast %c2_i32 : i32 to index
    %c0_77 = arith.constant 0 : index
    %c0_78 = arith.constant 0 : index
    %171 = vector.load %arg1[%c0_76, %170, %c0_77, %c0_78] : memref<1x8x2x64xbf16, #tpu.memory_space<vmem>>, vector<1x1x2x64xbf16>
    %172 = vector.shape_cast %171 : vector<1x1x2x64xbf16> to vector<2x64xbf16>
    %173 = arith.extf %172 : vector<2x64xbf16> to vector<2x64xf32>
    %c0_79 = arith.constant 0 : index
    %c0_80 = arith.constant 0 : index
    %174 = vector.load %arg8[%c0_79, %c0_80] : memref<2x16xbf16, #tpu.memory_space<vmem>>, vector<2x16xbf16>
    %cst_81 = arith.constant dense<0.000000e+00> : vector<2x64xf32>
    %175 = tpu.matmul %174, %4, %cst_81 {dimension_numbers = #tpu.dot_dimension_numbers<[1], [0], [0], [1], [0, 0, 1, 1], [], []>} : vector<2x16xbf16>, vector<16x64xbf16>, vector<2x64xf32> -> vector<2x64xf32>
    %176 = arith.addf %173, %175 : vector<2x64xf32>
    %c0_82 = arith.constant 0 : index
    %177 = arith.index_cast %169 : i32 to index
    %c0_83 = arith.constant 0 : index
    %c0_84 = arith.constant 0 : index
    %178 = vector.load %arg2[%c0_82, %177, %c0_83, %c0_84] : memref<1x8x2x64xbf16, #tpu.memory_space<vmem>>, vector<1x1x2x64xbf16>
    %179 = vector.shape_cast %178 : vector<1x1x2x64xbf16> to vector<2x64xbf16>
    %180 = arith.extf %179 : vector<2x64xbf16> to vector<2x64xf32>
    %c0_85 = arith.constant 0 : index
    %c0_86 = arith.constant 0 : index
    %181 = vector.load %arg10[%c0_85, %c0_86] : memref<2x16xbf16, #tpu.memory_space<vmem>>, vector<2x16xbf16>
    %cst_87 = arith.constant dense<0.000000e+00> : vector<2x64xf32>
    %182 = tpu.matmul %181, %6, %cst_87 {dimension_numbers = #tpu.dot_dimension_numbers<[1], [0], [0], [1], [0, 0, 1, 1], [], []>} : vector<2x16xbf16>, vector<16x64xbf16>, vector<2x64xf32> -> vector<2x64xf32>
    %183 = arith.addf %180, %182 : vector<2x64xf32>
    %c0_88 = arith.constant 0 : index
    %c0_89 = arith.constant 0 : index
    %184 = vector.load %arg9[%c0_88, %c0_89] : memref<2x16xf32, #tpu.memory_space<vmem>>, vector<2x16xf32>
    %185 = vector.extract_strided_slice %176 {offsets = [0, 0], sizes = [2, 16], strides = [1, 1]} : vector<2x64xf32> to vector<2x16xf32>
    %186 = arith.negf %185 : vector<2x16xf32>
    %187 = math.exp %186 : vector<2x16xf32>
    %cst_90 = arith.constant 1.000000e+00 : f32
    %188 = vector.broadcast %cst_90 : f32 to vector<2x16xf32>
    %189 = arith.addf %188, %187 : vector<2x16xf32>
    %190 = arith.divf %188, %189 : vector<2x16xf32>
    %191 = vector.extract_strided_slice %176 {offsets = [0, 16], sizes = [2, 16], strides = [1, 1]} : vector<2x64xf32> to vector<2x16xf32>
    %192 = arith.negf %191 : vector<2x16xf32>
    %193 = math.exp %192 : vector<2x16xf32>
    %cst_91 = arith.constant 1.000000e+00 : f32
    %194 = vector.broadcast %cst_91 : f32 to vector<2x16xf32>
    %195 = arith.addf %194, %193 : vector<2x16xf32>
    %196 = arith.divf %194, %195 : vector<2x16xf32>
    %197 = vector.extract_strided_slice %176 {offsets = [0, 32], sizes = [2, 16], strides = [1, 1]} : vector<2x64xf32> to vector<2x16xf32>
    %198 = math.tanh %197 : vector<2x16xf32>
    %199 = vector.extract_strided_slice %176 {offsets = [0, 48], sizes = [2, 16], strides = [1, 1]} : vector<2x64xf32> to vector<2x16xf32>
    %200 = arith.negf %199 : vector<2x16xf32>
    %201 = math.exp %200 : vector<2x16xf32>
    %cst_92 = arith.constant 1.000000e+00 : f32
    %202 = vector.broadcast %cst_92 : f32 to vector<2x16xf32>
    %203 = arith.addf %202, %201 : vector<2x16xf32>
    %204 = arith.divf %202, %203 : vector<2x16xf32>
    %205 = arith.mulf %196, %184 : vector<2x16xf32>
    %206 = arith.mulf %190, %198 : vector<2x16xf32>
    %207 = arith.addf %205, %206 : vector<2x16xf32>
    %208 = math.tanh %207 : vector<2x16xf32>
    %209 = arith.mulf %204, %208 : vector<2x16xf32>
    %c0_93 = arith.constant 0 : index
    %c0_94 = arith.constant 0 : index
    %210 = vector.load %arg11[%c0_93, %c0_94] : memref<2x16xf32, #tpu.memory_space<vmem>>, vector<2x16xf32>
    %211 = vector.extract_strided_slice %183 {offsets = [0, 0], sizes = [2, 16], strides = [1, 1]} : vector<2x64xf32> to vector<2x16xf32>
    %212 = arith.negf %211 : vector<2x16xf32>
    %213 = math.exp %212 : vector<2x16xf32>
    %cst_95 = arith.constant 1.000000e+00 : f32
    %214 = vector.broadcast %cst_95 : f32 to vector<2x16xf32>
    %215 = arith.addf %214, %213 : vector<2x16xf32>
    %216 = arith.divf %214, %215 : vector<2x16xf32>
    %217 = vector.extract_strided_slice %183 {offsets = [0, 16], sizes = [2, 16], strides = [1, 1]} : vector<2x64xf32> to vector<2x16xf32>
    %218 = arith.negf %217 : vector<2x16xf32>
    %219 = math.exp %218 : vector<2x16xf32>
    %cst_96 = arith.constant 1.000000e+00 : f32
    %220 = vector.broadcast %cst_96 : f32 to vector<2x16xf32>
    %221 = arith.addf %220, %219 : vector<2x16xf32>
    %222 = arith.divf %220, %221 : vector<2x16xf32>
    %223 = vector.extract_strided_slice %183 {offsets = [0, 32], sizes = [2, 16], strides = [1, 1]} : vector<2x64xf32> to vector<2x16xf32>
    %224 = math.tanh %223 : vector<2x16xf32>
    %225 = vector.extract_strided_slice %183 {offsets = [0, 48], sizes = [2, 16], strides = [1, 1]} : vector<2x64xf32> to vector<2x16xf32>
    %226 = arith.negf %225 : vector<2x16xf32>
    %227 = math.exp %226 : vector<2x16xf32>
    %cst_97 = arith.constant 1.000000e+00 : f32
    %228 = vector.broadcast %cst_97 : f32 to vector<2x16xf32>
    %229 = arith.addf %228, %227 : vector<2x16xf32>
    %230 = arith.divf %228, %229 : vector<2x16xf32>
    %231 = arith.mulf %222, %210 : vector<2x16xf32>
    %232 = arith.mulf %216, %224 : vector<2x16xf32>
    %233 = arith.addf %231, %232 : vector<2x16xf32>
    %234 = math.tanh %233 : vector<2x16xf32>
    %235 = arith.mulf %230, %234 : vector<2x16xf32>
    %236 = arith.truncf %209 : vector<2x16xf32> to vector<2x16xbf16>
    %237 = arith.truncf %235 : vector<2x16xf32> to vector<2x16xbf16>
    %c0_98 = arith.constant 0 : index
    %c0_99 = arith.constant 0 : index
    %238 = vector.load %arg8[%c0_98, %c0_99] : memref<2x16xbf16, #tpu.memory_space<vmem>>, vector<2x16xbf16>
    tpu.vector_store %arg8[%c0_98, %c0_99], %236 {strides = array<i32>} : memref<2x16xbf16, #tpu.memory_space<vmem>>, vector<2x16xbf16>,
    %c0_100 = arith.constant 0 : index
    %c0_101 = arith.constant 0 : index
    %239 = vector.load %arg9[%c0_100, %c0_101] : memref<2x16xf32, #tpu.memory_space<vmem>>, vector<2x16xf32>
    tpu.vector_store %arg9[%c0_100, %c0_101], %207 {strides = array<i32>} : memref<2x16xf32, #tpu.memory_space<vmem>>, vector<2x16xf32>,
    %c0_102 = arith.constant 0 : index
    %c0_103 = arith.constant 0 : index
    %240 = vector.load %arg10[%c0_102, %c0_103] : memref<2x16xbf16, #tpu.memory_space<vmem>>, vector<2x16xbf16>
    tpu.vector_store %arg10[%c0_102, %c0_103], %237 {strides = array<i32>} : memref<2x16xbf16, #tpu.memory_space<vmem>>, vector<2x16xbf16>,
    %c0_104 = arith.constant 0 : index
    %c0_105 = arith.constant 0 : index
    %241 = vector.load %arg11[%c0_104, %c0_105] : memref<2x16xf32, #tpu.memory_space<vmem>>, vector<2x16xf32>
    tpu.vector_store %arg11[%c0_104, %c0_105], %233 {strides = array<i32>} : memref<2x16xf32, #tpu.memory_space<vmem>>, vector<2x16xf32>,
    %242 = arith.index_cast %c2_i32 : i32 to index
    %c0_106 = arith.constant 0 : index
    %c0_107 = arith.constant 0 : index
    %243 = vector.load %arg5[%242, %c0_106, %c0_107] : memref<8x2x16xbf16, #tpu.memory_space<vmem>>, vector<1x2x16xbf16>
    %244 = vector.shape_cast %243 : vector<1x2x16xbf16> to vector<2x16xbf16>
    %245 = vector.shape_cast %236 : vector<2x16xbf16> to vector<1x2x16xbf16>
    tpu.vector_store %arg5[%242, %c0_106, %c0_107], %245 {strides = array<i32>} : memref<8x2x16xbf16, #tpu.memory_space<vmem>>, vector<1x2x16xbf16>,
    %246 = arith.index_cast %169 : i32 to index
    %c0_108 = arith.constant 0 : index
    %c0_109 = arith.constant 0 : index
    %247 = vector.load %arg6[%246, %c0_108, %c0_109] : memref<8x2x16xbf16, #tpu.memory_space<vmem>>, vector<1x2x16xbf16>
    %248 = vector.shape_cast %247 : vector<1x2x16xbf16> to vector<2x16xbf16>
    %249 = vector.shape_cast %237 : vector<2x16xbf16> to vector<1x2x16xbf16>
    tpu.vector_store %arg6[%246, %c0_108, %c0_109], %249 {strides = array<i32>} : memref<8x2x16xbf16, #tpu.memory_space<vmem>>, vector<1x2x16xbf16>,
    %c3_i32 = arith.constant 3 : i32
    %c7_i32_110 = arith.constant 7 : i32
    %250 = arith.subi %c7_i32_110, %c3_i32 : i32
    %c0_111 = arith.constant 0 : index
    %251 = arith.index_cast %c3_i32 : i32 to index
    %c0_112 = arith.constant 0 : index
    %c0_113 = arith.constant 0 : index
    %252 = vector.load %arg1[%c0_111, %251, %c0_112, %c0_113] : memref<1x8x2x64xbf16, #tpu.memory_space<vmem>>, vector<1x1x2x64xbf16>
    %253 = vector.shape_cast %252 : vector<1x1x2x64xbf16> to vector<2x64xbf16>
    %254 = arith.extf %253 : vector<2x64xbf16> to vector<2x64xf32>
    %c0_114 = arith.constant 0 : index
    %c0_115 = arith.constant 0 : index
    %255 = vector.load %arg8[%c0_114, %c0_115] : memref<2x16xbf16, #tpu.memory_space<vmem>>, vector<2x16xbf16>
    %cst_116 = arith.constant dense<0.000000e+00> : vector<2x64xf32>
    %256 = tpu.matmul %255, %4, %cst_116 {dimension_numbers = #tpu.dot_dimension_numbers<[1], [0], [0], [1], [0, 0, 1, 1], [], []>} : vector<2x16xbf16>, vector<16x64xbf16>, vector<2x64xf32> -> vector<2x64xf32>
    %257 = arith.addf %254, %256 : vector<2x64xf32>
    %c0_117 = arith.constant 0 : index
    %258 = arith.index_cast %250 : i32 to index
    %c0_118 = arith.constant 0 : index
    %c0_119 = arith.constant 0 : index
    %259 = vector.load %arg2[%c0_117, %258, %c0_118, %c0_119] : memref<1x8x2x64xbf16, #tpu.memory_space<vmem>>, vector<1x1x2x64xbf16>
    %260 = vector.shape_cast %259 : vector<1x1x2x64xbf16> to vector<2x64xbf16>
    %261 = arith.extf %260 : vector<2x64xbf16> to vector<2x64xf32>
    %c0_120 = arith.constant 0 : index
    %c0_121 = arith.constant 0 : index
    %262 = vector.load %arg10[%c0_120, %c0_121] : memref<2x16xbf16, #tpu.memory_space<vmem>>, vector<2x16xbf16>
    %cst_122 = arith.constant dense<0.000000e+00> : vector<2x64xf32>
    %263 = tpu.matmul %262, %6, %cst_122 {dimension_numbers = #tpu.dot_dimension_numbers<[1], [0], [0], [1], [0, 0, 1, 1], [], []>} : vector<2x16xbf16>, vector<16x64xbf16>, vector<2x64xf32> -> vector<2x64xf32>
    %264 = arith.addf %261, %263 : vector<2x64xf32>
    %c0_123 = arith.constant 0 : index
    %c0_124 = arith.constant 0 : index
    %265 = vector.load %arg9[%c0_123, %c0_124] : memref<2x16xf32, #tpu.memory_space<vmem>>, vector<2x16xf32>
    %266 = vector.extract_strided_slice %257 {offsets = [0, 0], sizes = [2, 16], strides = [1, 1]} : vector<2x64xf32> to vector<2x16xf32>
    %267 = arith.negf %266 : vector<2x16xf32>
    %268 = math.exp %267 : vector<2x16xf32>
    %cst_125 = arith.constant 1.000000e+00 : f32
    %269 = vector.broadcast %cst_125 : f32 to vector<2x16xf32>
    %270 = arith.addf %269, %268 : vector<2x16xf32>
    %271 = arith.divf %269, %270 : vector<2x16xf32>
    %272 = vector.extract_strided_slice %257 {offsets = [0, 16], sizes = [2, 16], strides = [1, 1]} : vector<2x64xf32> to vector<2x16xf32>
    %273 = arith.negf %272 : vector<2x16xf32>
    %274 = math.exp %273 : vector<2x16xf32>
    %cst_126 = arith.constant 1.000000e+00 : f32
    %275 = vector.broadcast %cst_126 : f32 to vector<2x16xf32>
    %276 = arith.addf %275, %274 : vector<2x16xf32>
    %277 = arith.divf %275, %276 : vector<2x16xf32>
    %278 = vector.extract_strided_slice %257 {offsets = [0, 32], sizes = [2, 16], strides = [1, 1]} : vector<2x64xf32> to vector<2x16xf32>
    %279 = math.tanh %278 : vector<2x16xf32>
    %280 = vector.extract_strided_slice %257 {offsets = [0, 48], sizes = [2, 16], strides = [1, 1]} : vector<2x64xf32> to vector<2x16xf32>
    %281 = arith.negf %280 : vector<2x16xf32>
    %282 = math.exp %281 : vector<2x16xf32>
    %cst_127 = arith.constant 1.000000e+00 : f32
    %283 = vector.broadcast %cst_127 : f32 to vector<2x16xf32>
    %284 = arith.addf %283, %282 : vector<2x16xf32>
    %285 = arith.divf %283, %284 : vector<2x16xf32>
    %286 = arith.mulf %277, %265 : vector<2x16xf32>
    %287 = arith.mulf %271, %279 : vector<2x16xf32>
    %288 = arith.addf %286, %287 : vector<2x16xf32>
    %289 = math.tanh %288 : vector<2x16xf32>
    %290 = arith.mulf %285, %289 : vector<2x16xf32>
    %c0_128 = arith.constant 0 : index
    %c0_129 = arith.constant 0 : index
    %291 = vector.load %arg11[%c0_128, %c0_129] : memref<2x16xf32, #tpu.memory_space<vmem>>, vector<2x16xf32>
    %292 = vector.extract_strided_slice %264 {offsets = [0, 0], sizes = [2, 16], strides = [1, 1]} : vector<2x64xf32> to vector<2x16xf32>
    %293 = arith.negf %292 : vector<2x16xf32>
    %294 = math.exp %293 : vector<2x16xf32>
    %cst_130 = arith.constant 1.000000e+00 : f32
    %295 = vector.broadcast %cst_130 : f32 to vector<2x16xf32>
    %296 = arith.addf %295, %294 : vector<2x16xf32>
    %297 = arith.divf %295, %296 : vector<2x16xf32>
    %298 = vector.extract_strided_slice %264 {offsets = [0, 16], sizes = [2, 16], strides = [1, 1]} : vector<2x64xf32> to vector<2x16xf32>
    %299 = arith.negf %298 : vector<2x16xf32>
    %300 = math.exp %299 : vector<2x16xf32>
    %cst_131 = arith.constant 1.000000e+00 : f32
    %301 = vector.broadcast %cst_131 : f32 to vector<2x16xf32>
    %302 = arith.addf %301, %300 : vector<2x16xf32>
    %303 = arith.divf %301, %302 : vector<2x16xf32>
    %304 = vector.extract_strided_slice %264 {offsets = [0, 32], sizes = [2, 16], strides = [1, 1]} : vector<2x64xf32> to vector<2x16xf32>
    %305 = math.tanh %304 : vector<2x16xf32>
    %306 = vector.extract_strided_slice %264 {offsets = [0, 48], sizes = [2, 16], strides = [1, 1]} : vector<2x64xf32> to vector<2x16xf32>
    %307 = arith.negf %306 : vector<2x16xf32>
    %308 = math.exp %307 : vector<2x16xf32>
    %cst_132 = arith.constant 1.000000e+00 : f32
    %309 = vector.broadcast %cst_132 : f32 to vector<2x16xf32>
    %310 = arith.addf %309, %308 : vector<2x16xf32>
    %311 = arith.divf %309, %310 : vector<2x16xf32>
    %312 = arith.mulf %303, %291 : vector<2x16xf32>
    %313 = arith.mulf %297, %305 : vector<2x16xf32>
    %314 = arith.addf %312, %313 : vector<2x16xf32>
    %315 = math.tanh %314 : vector<2x16xf32>
    %316 = arith.mulf %311, %315 : vector<2x16xf32>
    %317 = arith.truncf %290 : vector<2x16xf32> to vector<2x16xbf16>
    %318 = arith.truncf %316 : vector<2x16xf32> to vector<2x16xbf16>
    %c0_133 = arith.constant 0 : index
    %c0_134 = arith.constant 0 : index
    %319 = vector.load %arg8[%c0_133, %c0_134] : memref<2x16xbf16, #tpu.memory_space<vmem>>, vector<2x16xbf16>
    tpu.vector_store %arg8[%c0_133, %c0_134], %317 {strides = array<i32>} : memref<2x16xbf16, #tpu.memory_space<vmem>>, vector<2x16xbf16>,
    %c0_135 = arith.constant 0 : index
    %c0_136 = arith.constant 0 : index
    %320 = vector.load %arg9[%c0_135, %c0_136] : memref<2x16xf32, #tpu.memory_space<vmem>>, vector<2x16xf32>
    tpu.vector_store %arg9[%c0_135, %c0_136], %288 {strides = array<i32>} : memref<2x16xf32, #tpu.memory_space<vmem>>, vector<2x16xf32>,
    %c0_137 = arith.constant 0 : index
    %c0_138 = arith.constant 0 : index
    %321 = vector.load %arg10[%c0_137, %c0_138] : memref<2x16xbf16, #tpu.memory_space<vmem>>, vector<2x16xbf16>
    tpu.vector_store %arg10[%c0_137, %c0_138], %318 {strides = array<i32>} : memref<2x16xbf16, #tpu.memory_space<vmem>>, vector<2x16xbf16>,
    %c0_139 = arith.constant 0 : index
    %c0_140 = arith.constant 0 : index
    %322 = vector.load %arg11[%c0_139, %c0_140] : memref<2x16xf32, #tpu.memory_space<vmem>>, vector<2x16xf32>
    tpu.vector_store %arg11[%c0_139, %c0_140], %314 {strides = array<i32>} : memref<2x16xf32, #tpu.memory_space<vmem>>, vector<2x16xf32>,
    %323 = arith.index_cast %c3_i32 : i32 to index
    %c0_141 = arith.constant 0 : index
    %c0_142 = arith.constant 0 : index
    %324 = vector.load %arg5[%323, %c0_141, %c0_142] : memref<8x2x16xbf16, #tpu.memory_space<vmem>>, vector<1x2x16xbf16>
    %325 = vector.shape_cast %324 : vector<1x2x16xbf16> to vector<2x16xbf16>
    %326 = vector.shape_cast %317 : vector<2x16xbf16> to vector<1x2x16xbf16>
    tpu.vector_store %arg5[%323, %c0_141, %c0_142], %326 {strides = array<i32>} : memref<8x2x16xbf16, #tpu.memory_space<vmem>>, vector<1x2x16xbf16>,
    %327 = arith.index_cast %250 : i32 to index
    %c0_143 = arith.constant 0 : index
    %c0_144 = arith.constant 0 : index
    %328 = vector.load %arg6[%327, %c0_143, %c0_144] : memref<8x2x16xbf16, #tpu.memory_space<vmem>>, vector<1x2x16xbf16>
    %329 = vector.shape_cast %328 : vector<1x2x16xbf16> to vector<2x16xbf16>
    %330 = vector.shape_cast %318 : vector<2x16xbf16> to vector<1x2x16xbf16>
    tpu.vector_store %arg6[%327, %c0_143, %c0_144], %330 {strides = array<i32>} : memref<8x2x16xbf16, #tpu.memory_space<vmem>>, vector<1x2x16xbf16>,
    %c4_i32 = arith.constant 4 : i32
    %c7_i32_145 = arith.constant 7 : i32
    %331 = arith.subi %c7_i32_145, %c4_i32 : i32
    %c0_146 = arith.constant 0 : index
    %332 = arith.index_cast %c4_i32 : i32 to index
    %c0_147 = arith.constant 0 : index
    %c0_148 = arith.constant 0 : index
    %333 = vector.load %arg1[%c0_146, %332, %c0_147, %c0_148] : memref<1x8x2x64xbf16, #tpu.memory_space<vmem>>, vector<1x1x2x64xbf16>
    %334 = vector.shape_cast %333 : vector<1x1x2x64xbf16> to vector<2x64xbf16>
    %335 = arith.extf %334 : vector<2x64xbf16> to vector<2x64xf32>
    %c0_149 = arith.constant 0 : index
    %c0_150 = arith.constant 0 : index
    %336 = vector.load %arg8[%c0_149, %c0_150] : memref<2x16xbf16, #tpu.memory_space<vmem>>, vector<2x16xbf16>
    %cst_151 = arith.constant dense<0.000000e+00> : vector<2x64xf32>
    %337 = tpu.matmul %336, %4, %cst_151 {dimension_numbers = #tpu.dot_dimension_numbers<[1], [0], [0], [1], [0, 0, 1, 1], [], []>} : vector<2x16xbf16>, vector<16x64xbf16>, vector<2x64xf32> -> vector<2x64xf32>
    %338 = arith.addf %335, %337 : vector<2x64xf32>
    %c0_152 = arith.constant 0 : index
    %339 = arith.index_cast %331 : i32 to index
    %c0_153 = arith.constant 0 : index
    %c0_154 = arith.constant 0 : index
    %340 = vector.load %arg2[%c0_152, %339, %c0_153, %c0_154] : memref<1x8x2x64xbf16, #tpu.memory_space<vmem>>, vector<1x1x2x64xbf16>
    %341 = vector.shape_cast %340 : vector<1x1x2x64xbf16> to vector<2x64xbf16>
    %342 = arith.extf %341 : vector<2x64xbf16> to vector<2x64xf32>
    %c0_155 = arith.constant 0 : index
    %c0_156 = arith.constant 0 : index
    %343 = vector.load %arg10[%c0_155, %c0_156] : memref<2x16xbf16, #tpu.memory_space<vmem>>, vector<2x16xbf16>
    %cst_157 = arith.constant dense<0.000000e+00> : vector<2x64xf32>
    %344 = tpu.matmul %343, %6, %cst_157 {dimension_numbers = #tpu.dot_dimension_numbers<[1], [0], [0], [1], [0, 0, 1, 1], [], []>} : vector<2x16xbf16>, vector<16x64xbf16>, vector<2x64xf32> -> vector<2x64xf32>
    %345 = arith.addf %342, %344 : vector<2x64xf32>
    %c0_158 = arith.constant 0 : index
    %c0_159 = arith.constant 0 : index
    %346 = vector.load %arg9[%c0_158, %c0_159] : memref<2x16xf32, #tpu.memory_space<vmem>>, vector<2x16xf32>
    %347 = vector.extract_strided_slice %338 {offsets = [0, 0], sizes = [2, 16], strides = [1, 1]} : vector<2x64xf32> to vector<2x16xf32>
    %348 = arith.negf %347 : vector<2x16xf32>
    %349 = math.exp %348 : vector<2x16xf32>
    %cst_160 = arith.constant 1.000000e+00 : f32
    %350 = vector.broadcast %cst_160 : f32 to vector<2x16xf32>
    %351 = arith.addf %350, %349 : vector<2x16xf32>
    %352 = arith.divf %350, %351 : vector<2x16xf32>
    %353 = vector.extract_strided_slice %338 {offsets = [0, 16], sizes = [2, 16], strides = [1, 1]} : vector<2x64xf32> to vector<2x16xf32>
    %354 = arith.negf %353 : vector<2x16xf32>
    %355 = math.exp %354 : vector<2x16xf32>
    %cst_161 = arith.constant 1.000000e+00 : f32
    %356 = vector.broadcast %cst_161 : f32 to vector<2x16xf32>
    %357 = arith.addf %356, %355 : vector<2x16xf32>
    %358 = arith.divf %356, %357 : vector<2x16xf32>
    %359 = vector.extract_strided_slice %338 {offsets = [0, 32], sizes = [2, 16], strides = [1, 1]} : vector<2x64xf32> to vector<2x16xf32>
    %360 = math.tanh %359 : vector<2x16xf32>
    %361 = vector.extract_strided_slice %338 {offsets = [0, 48], sizes = [2, 16], strides = [1, 1]} : vector<2x64xf32> to vector<2x16xf32>
    %362 = arith.negf %361 : vector<2x16xf32>
    %363 = math.exp %362 : vector<2x16xf32>
    %cst_162 = arith.constant 1.000000e+00 : f32
    %364 = vector.broadcast %cst_162 : f32 to vector<2x16xf32>
    %365 = arith.addf %364, %363 : vector<2x16xf32>
    %366 = arith.divf %364, %365 : vector<2x16xf32>
    %367 = arith.mulf %358, %346 : vector<2x16xf32>
    %368 = arith.mulf %352, %360 : vector<2x16xf32>
    %369 = arith.addf %367, %368 : vector<2x16xf32>
    %370 = math.tanh %369 : vector<2x16xf32>
    %371 = arith.mulf %366, %370 : vector<2x16xf32>
    %c0_163 = arith.constant 0 : index
    %c0_164 = arith.constant 0 : index
    %372 = vector.load %arg11[%c0_163, %c0_164] : memref<2x16xf32, #tpu.memory_space<vmem>>, vector<2x16xf32>
    %373 = vector.extract_strided_slice %345 {offsets = [0, 0], sizes = [2, 16], strides = [1, 1]} : vector<2x64xf32> to vector<2x16xf32>
    %374 = arith.negf %373 : vector<2x16xf32>
    %375 = math.exp %374 : vector<2x16xf32>
    %cst_165 = arith.constant 1.000000e+00 : f32
    %376 = vector.broadcast %cst_165 : f32 to vector<2x16xf32>
    %377 = arith.addf %376, %375 : vector<2x16xf32>
    %378 = arith.divf %376, %377 : vector<2x16xf32>
    %379 = vector.extract_strided_slice %345 {offsets = [0, 16], sizes = [2, 16], strides = [1, 1]} : vector<2x64xf32> to vector<2x16xf32>
    %380 = arith.negf %379 : vector<2x16xf32>
    %381 = math.exp %380 : vector<2x16xf32>
    %cst_166 = arith.constant 1.000000e+00 : f32
    %382 = vector.broadcast %cst_166 : f32 to vector<2x16xf32>
    %383 = arith.addf %382, %381 : vector<2x16xf32>
    %384 = arith.divf %382, %383 : vector<2x16xf32>
    %385 = vector.extract_strided_slice %345 {offsets = [0, 32], sizes = [2, 16], strides = [1, 1]} : vector<2x64xf32> to vector<2x16xf32>
    %386 = math.tanh %385 : vector<2x16xf32>
    %387 = vector.extract_strided_slice %345 {offsets = [0, 48], sizes = [2, 16], strides = [1, 1]} : vector<2x64xf32> to vector<2x16xf32>
    %388 = arith.negf %387 : vector<2x16xf32>
    %389 = math.exp %388 : vector<2x16xf32>
    %cst_167 = arith.constant 1.000000e+00 : f32
    %390 = vector.broadcast %cst_167 : f32 to vector<2x16xf32>
    %391 = arith.addf %390, %389 : vector<2x16xf32>
    %392 = arith.divf %390, %391 : vector<2x16xf32>
    %393 = arith.mulf %384, %372 : vector<2x16xf32>
    %394 = arith.mulf %378, %386 : vector<2x16xf32>
    %395 = arith.addf %393, %394 : vector<2x16xf32>
    %396 = math.tanh %395 : vector<2x16xf32>
    %397 = arith.mulf %392, %396 : vector<2x16xf32>
    %398 = arith.truncf %371 : vector<2x16xf32> to vector<2x16xbf16>
    %399 = arith.truncf %397 : vector<2x16xf32> to vector<2x16xbf16>
    %c0_168 = arith.constant 0 : index
    %c0_169 = arith.constant 0 : index
    %400 = vector.load %arg8[%c0_168, %c0_169] : memref<2x16xbf16, #tpu.memory_space<vmem>>, vector<2x16xbf16>
    tpu.vector_store %arg8[%c0_168, %c0_169], %398 {strides = array<i32>} : memref<2x16xbf16, #tpu.memory_space<vmem>>, vector<2x16xbf16>,
    %c0_170 = arith.constant 0 : index
    %c0_171 = arith.constant 0 : index
    %401 = vector.load %arg9[%c0_170, %c0_171] : memref<2x16xf32, #tpu.memory_space<vmem>>, vector<2x16xf32>
    tpu.vector_store %arg9[%c0_170, %c0_171], %369 {strides = array<i32>} : memref<2x16xf32, #tpu.memory_space<vmem>>, vector<2x16xf32>,
    %c0_172 = arith.constant 0 : index
    %c0_173 = arith.constant 0 : index
    %402 = vector.load %arg10[%c0_172, %c0_173] : memref<2x16xbf16, #tpu.memory_space<vmem>>, vector<2x16xbf16>
    tpu.vector_store %arg10[%c0_172, %c0_173], %399 {strides = array<i32>} : memref<2x16xbf16, #tpu.memory_space<vmem>>, vector<2x16xbf16>,
    %c0_174 = arith.constant 0 : index
    %c0_175 = arith.constant 0 : index
    %403 = vector.load %arg11[%c0_174, %c0_175] : memref<2x16xf32, #tpu.memory_space<vmem>>, vector<2x16xf32>
    tpu.vector_store %arg11[%c0_174, %c0_175], %395 {strides = array<i32>} : memref<2x16xf32, #tpu.memory_space<vmem>>, vector<2x16xf32>,
    %404 = arith.index_cast %c4_i32 : i32 to index
    %c0_176 = arith.constant 0 : index
    %c0_177 = arith.constant 0 : index
    %405 = vector.load %arg5[%404, %c0_176, %c0_177] : memref<8x2x16xbf16, #tpu.memory_space<vmem>>, vector<1x2x16xbf16>
    %406 = vector.shape_cast %405 : vector<1x2x16xbf16> to vector<2x16xbf16>
    %407 = vector.shape_cast %398 : vector<2x16xbf16> to vector<1x2x16xbf16>
    tpu.vector_store %arg5[%404, %c0_176, %c0_177], %407 {strides = array<i32>} : memref<8x2x16xbf16, #tpu.memory_space<vmem>>, vector<1x2x16xbf16>,
    %408 = arith.index_cast %331 : i32 to index
    %c0_178 = arith.constant 0 : index
    %c0_179 = arith.constant 0 : index
    %409 = vector.load %arg6[%408, %c0_178, %c0_179] : memref<8x2x16xbf16, #tpu.memory_space<vmem>>, vector<1x2x16xbf16>
    %410 = vector.shape_cast %409 : vector<1x2x16xbf16> to vector<2x16xbf16>
    %411 = vector.shape_cast %399 : vector<2x16xbf16> to vector<1x2x16xbf16>
    tpu.vector_store %arg6[%408, %c0_178, %c0_179], %411 {strides = array<i32>} : memref<8x2x16xbf16, #tpu.memory_space<vmem>>, vector<1x2x16xbf16>,
    %c5_i32 = arith.constant 5 : i32
    %c7_i32_180 = arith.constant 7 : i32
    %412 = arith.subi %c7_i32_180, %c5_i32 : i32
    %c0_181 = arith.constant 0 : index
    %413 = arith.index_cast %c5_i32 : i32 to index
    %c0_182 = arith.constant 0 : index
    %c0_183 = arith.constant 0 : index
    %414 = vector.load %arg1[%c0_181, %413, %c0_182, %c0_183] : memref<1x8x2x64xbf16, #tpu.memory_space<vmem>>, vector<1x1x2x64xbf16>
    %415 = vector.shape_cast %414 : vector<1x1x2x64xbf16> to vector<2x64xbf16>
    %416 = arith.extf %415 : vector<2x64xbf16> to vector<2x64xf32>
    %c0_184 = arith.constant 0 : index
    %c0_185 = arith.constant 0 : index
    %417 = vector.load %arg8[%c0_184, %c0_185] : memref<2x16xbf16, #tpu.memory_space<vmem>>, vector<2x16xbf16>
    %cst_186 = arith.constant dense<0.000000e+00> : vector<2x64xf32>
    %418 = tpu.matmul %417, %4, %cst_186 {dimension_numbers = #tpu.dot_dimension_numbers<[1], [0], [0], [1], [0, 0, 1, 1], [], []>} : vector<2x16xbf16>, vector<16x64xbf16>, vector<2x64xf32> -> vector<2x64xf32>
    %419 = arith.addf %416, %418 : vector<2x64xf32>
    %c0_187 = arith.constant 0 : index
    %420 = arith.index_cast %412 : i32 to index
    %c0_188 = arith.constant 0 : index
    %c0_189 = arith.constant 0 : index
    %421 = vector.load %arg2[%c0_187, %420, %c0_188, %c0_189] : memref<1x8x2x64xbf16, #tpu.memory_space<vmem>>, vector<1x1x2x64xbf16>
    %422 = vector.shape_cast %421 : vector<1x1x2x64xbf16> to vector<2x64xbf16>
    %423 = arith.extf %422 : vector<2x64xbf16> to vector<2x64xf32>
    %c0_190 = arith.constant 0 : index
    %c0_191 = arith.constant 0 : index
    %424 = vector.load %arg10[%c0_190, %c0_191] : memref<2x16xbf16, #tpu.memory_space<vmem>>, vector<2x16xbf16>
    %cst_192 = arith.constant dense<0.000000e+00> : vector<2x64xf32>
    %425 = tpu.matmul %424, %6, %cst_192 {dimension_numbers = #tpu.dot_dimension_numbers<[1], [0], [0], [1], [0, 0, 1, 1], [], []>} : vector<2x16xbf16>, vector<16x64xbf16>, vector<2x64xf32> -> vector<2x64xf32>
    %426 = arith.addf %423, %425 : vector<2x64xf32>
    %c0_193 = arith.constant 0 : index
    %c0_194 = arith.constant 0 : index
    %427 = vector.load %arg9[%c0_193, %c0_194] : memref<2x16xf32, #tpu.memory_space<vmem>>, vector<2x16xf32>
    %428 = vector.extract_strided_slice %419 {offsets = [0, 0], sizes = [2, 16], strides = [1, 1]} : vector<2x64xf32> to vector<2x16xf32>
    %429 = arith.negf %428 : vector<2x16xf32>
    %430 = math.exp %429 : vector<2x16xf32>
    %cst_195 = arith.constant 1.000000e+00 : f32
    %431 = vector.broadcast %cst_195 : f32 to vector<2x16xf32>
    %432 = arith.addf %431, %430 : vector<2x16xf32>
    %433 = arith.divf %431, %432 : vector<2x16xf32>
    %434 = vector.extract_strided_slice %419 {offsets = [0, 16], sizes = [2, 16], strides = [1, 1]} : vector<2x64xf32> to vector<2x16xf32>
    %435 = arith.negf %434 : vector<2x16xf32>
    %436 = math.exp %435 : vector<2x16xf32>
    %cst_196 = arith.constant 1.000000e+00 : f32
    %437 = vector.broadcast %cst_196 : f32 to vector<2x16xf32>
    %438 = arith.addf %437, %436 : vector<2x16xf32>
    %439 = arith.divf %437, %438 : vector<2x16xf32>
    %440 = vector.extract_strided_slice %419 {offsets = [0, 32], sizes = [2, 16], strides = [1, 1]} : vector<2x64xf32> to vector<2x16xf32>
    %441 = math.tanh %440 : vector<2x16xf32>
    %442 = vector.extract_strided_slice %419 {offsets = [0, 48], sizes = [2, 16], strides = [1, 1]} : vector<2x64xf32> to vector<2x16xf32>
    %443 = arith.negf %442 : vector<2x16xf32>
    %444 = math.exp %443 : vector<2x16xf32>
    %cst_197 = arith.constant 1.000000e+00 : f32
    %445 = vector.broadcast %cst_197 : f32 to vector<2x16xf32>
    %446 = arith.addf %445, %444 : vector<2x16xf32>
    %447 = arith.divf %445, %446 : vector<2x16xf32>
    %448 = arith.mulf %439, %427 : vector<2x16xf32>
    %449 = arith.mulf %433, %441 : vector<2x16xf32>
    %450 = arith.addf %448, %449 : vector<2x16xf32>
    %451 = math.tanh %450 : vector<2x16xf32>
    %452 = arith.mulf %447, %451 : vector<2x16xf32>
    %c0_198 = arith.constant 0 : index
    %c0_199 = arith.constant 0 : index
    %453 = vector.load %arg11[%c0_198, %c0_199] : memref<2x16xf32, #tpu.memory_space<vmem>>, vector<2x16xf32>
    %454 = vector.extract_strided_slice %426 {offsets = [0, 0], sizes = [2, 16], strides = [1, 1]} : vector<2x64xf32> to vector<2x16xf32>
    %455 = arith.negf %454 : vector<2x16xf32>
    %456 = math.exp %455 : vector<2x16xf32>
    %cst_200 = arith.constant 1.000000e+00 : f32
    %457 = vector.broadcast %cst_200 : f32 to vector<2x16xf32>
    %458 = arith.addf %457, %456 : vector<2x16xf32>
    %459 = arith.divf %457, %458 : vector<2x16xf32>
    %460 = vector.extract_strided_slice %426 {offsets = [0, 16], sizes = [2, 16], strides = [1, 1]} : vector<2x64xf32> to vector<2x16xf32>
    %461 = arith.negf %460 : vector<2x16xf32>
    %462 = math.exp %461 : vector<2x16xf32>
    %cst_201 = arith.constant 1.000000e+00 : f32
    %463 = vector.broadcast %cst_201 : f32 to vector<2x16xf32>
    %464 = arith.addf %463, %462 : vector<2x16xf32>
    %465 = arith.divf %463, %464 : vector<2x16xf32>
    %466 = vector.extract_strided_slice %426 {offsets = [0, 32], sizes = [2, 16], strides = [1, 1]} : vector<2x64xf32> to vector<2x16xf32>
    %467 = math.tanh %466 : vector<2x16xf32>
    %468 = vector.extract_strided_slice %426 {offsets = [0, 48], sizes = [2, 16], strides = [1, 1]} : vector<2x64xf32> to vector<2x16xf32>
    %469 = arith.negf %468 : vector<2x16xf32>
    %470 = math.exp %469 : vector<2x16xf32>
    %cst_202 = arith.constant 1.000000e+00 : f32
    %471 = vector.broadcast %cst_202 : f32 to vector<2x16xf32>
    %472 = arith.addf %471, %470 : vector<2x16xf32>
    %473 = arith.divf %471, %472 : vector<2x16xf32>
    %474 = arith.mulf %465, %453 : vector<2x16xf32>
    %475 = arith.mulf %459, %467 : vector<2x16xf32>
    %476 = arith.addf %474, %475 : vector<2x16xf32>
    %477 = math.tanh %476 : vector<2x16xf32>
    %478 = arith.mulf %473, %477 : vector<2x16xf32>
    %479 = arith.truncf %452 : vector<2x16xf32> to vector<2x16xbf16>
    %480 = arith.truncf %478 : vector<2x16xf32> to vector<2x16xbf16>
    %c0_203 = arith.constant 0 : index
    %c0_204 = arith.constant 0 : index
    %481 = vector.load %arg8[%c0_203, %c0_204] : memref<2x16xbf16, #tpu.memory_space<vmem>>, vector<2x16xbf16>
    tpu.vector_store %arg8[%c0_203, %c0_204], %479 {strides = array<i32>} : memref<2x16xbf16, #tpu.memory_space<vmem>>, vector<2x16xbf16>,
    %c0_205 = arith.constant 0 : index
    %c0_206 = arith.constant 0 : index
    %482 = vector.load %arg9[%c0_205, %c0_206] : memref<2x16xf32, #tpu.memory_space<vmem>>, vector<2x16xf32>
    tpu.vector_store %arg9[%c0_205, %c0_206], %450 {strides = array<i32>} : memref<2x16xf32, #tpu.memory_space<vmem>>, vector<2x16xf32>,
    %c0_207 = arith.constant 0 : index
    %c0_208 = arith.constant 0 : index
    %483 = vector.load %arg10[%c0_207, %c0_208] : memref<2x16xbf16, #tpu.memory_space<vmem>>, vector<2x16xbf16>
    tpu.vector_store %arg10[%c0_207, %c0_208], %480 {strides = array<i32>} : memref<2x16xbf16, #tpu.memory_space<vmem>>, vector<2x16xbf16>,
    %c0_209 = arith.constant 0 : index
    %c0_210 = arith.constant 0 : index
    %484 = vector.load %arg11[%c0_209, %c0_210] : memref<2x16xf32, #tpu.memory_space<vmem>>, vector<2x16xf32>
    tpu.vector_store %arg11[%c0_209, %c0_210], %476 {strides = array<i32>} : memref<2x16xf32, #tpu.memory_space<vmem>>, vector<2x16xf32>,
    %485 = arith.index_cast %c5_i32 : i32 to index
    %c0_211 = arith.constant 0 : index
    %c0_212 = arith.constant 0 : index
    %486 = vector.load %arg5[%485, %c0_211, %c0_212] : memref<8x2x16xbf16, #tpu.memory_space<vmem>>, vector<1x2x16xbf16>
    %487 = vector.shape_cast %486 : vector<1x2x16xbf16> to vector<2x16xbf16>
    %488 = vector.shape_cast %479 : vector<2x16xbf16> to vector<1x2x16xbf16>
    tpu.vector_store %arg5[%485, %c0_211, %c0_212], %488 {strides = array<i32>} : memref<8x2x16xbf16, #tpu.memory_space<vmem>>, vector<1x2x16xbf16>,
    %489 = arith.index_cast %412 : i32 to index
    %c0_213 = arith.constant 0 : index
    %c0_214 = arith.constant 0 : index
    %490 = vector.load %arg6[%489, %c0_213, %c0_214] : memref<8x2x16xbf16, #tpu.memory_space<vmem>>, vector<1x2x16xbf16>
    %491 = vector.shape_cast %490 : vector<1x2x16xbf16> to vector<2x16xbf16>
    %492 = vector.shape_cast %480 : vector<2x16xbf16> to vector<1x2x16xbf16>
    tpu.vector_store %arg6[%489, %c0_213, %c0_214], %492 {strides = array<i32>} : memref<8x2x16xbf16, #tpu.memory_space<vmem>>, vector<1x2x16xbf16>,
    %c6_i32 = arith.constant 6 : i32
    %c7_i32_215 = arith.constant 7 : i32
    %493 = arith.subi %c7_i32_215, %c6_i32 : i32
    %c0_216 = arith.constant 0 : index
    %494 = arith.index_cast %c6_i32 : i32 to index
    %c0_217 = arith.constant 0 : index
    %c0_218 = arith.constant 0 : index
    %495 = vector.load %arg1[%c0_216, %494, %c0_217, %c0_218] : memref<1x8x2x64xbf16, #tpu.memory_space<vmem>>, vector<1x1x2x64xbf16>
    %496 = vector.shape_cast %495 : vector<1x1x2x64xbf16> to vector<2x64xbf16>
    %497 = arith.extf %496 : vector<2x64xbf16> to vector<2x64xf32>
    %c0_219 = arith.constant 0 : index
    %c0_220 = arith.constant 0 : index
    %498 = vector.load %arg8[%c0_219, %c0_220] : memref<2x16xbf16, #tpu.memory_space<vmem>>, vector<2x16xbf16>
    %cst_221 = arith.constant dense<0.000000e+00> : vector<2x64xf32>
    %499 = tpu.matmul %498, %4, %cst_221 {dimension_numbers = #tpu.dot_dimension_numbers<[1], [0], [0], [1], [0, 0, 1, 1], [], []>} : vector<2x16xbf16>, vector<16x64xbf16>, vector<2x64xf32> -> vector<2x64xf32>
    %500 = arith.addf %497, %499 : vector<2x64xf32>
    %c0_222 = arith.constant 0 : index
    %501 = arith.index_cast %493 : i32 to index
    %c0_223 = arith.constant 0 : index
    %c0_224 = arith.constant 0 : index
    %502 = vector.load %arg2[%c0_222, %501, %c0_223, %c0_224] : memref<1x8x2x64xbf16, #tpu.memory_space<vmem>>, vector<1x1x2x64xbf16>
    %503 = vector.shape_cast %502 : vector<1x1x2x64xbf16> to vector<2x64xbf16>
    %504 = arith.extf %503 : vector<2x64xbf16> to vector<2x64xf32>
    %c0_225 = arith.constant 0 : index
    %c0_226 = arith.constant 0 : index
    %505 = vector.load %arg10[%c0_225, %c0_226] : memref<2x16xbf16, #tpu.memory_space<vmem>>, vector<2x16xbf16>
    %cst_227 = arith.constant dense<0.000000e+00> : vector<2x64xf32>
    %506 = tpu.matmul %505, %6, %cst_227 {dimension_numbers = #tpu.dot_dimension_numbers<[1], [0], [0], [1], [0, 0, 1, 1], [], []>} : vector<2x16xbf16>, vector<16x64xbf16>, vector<2x64xf32> -> vector<2x64xf32>
    %507 = arith.addf %504, %506 : vector<2x64xf32>
    %c0_228 = arith.constant 0 : index
    %c0_229 = arith.constant 0 : index
    %508 = vector.load %arg9[%c0_228, %c0_229] : memref<2x16xf32, #tpu.memory_space<vmem>>, vector<2x16xf32>
    %509 = vector.extract_strided_slice %500 {offsets = [0, 0], sizes = [2, 16], strides = [1, 1]} : vector<2x64xf32> to vector<2x16xf32>
    %510 = arith.negf %509 : vector<2x16xf32>
    %511 = math.exp %510 : vector<2x16xf32>
    %cst_230 = arith.constant 1.000000e+00 : f32
    %512 = vector.broadcast %cst_230 : f32 to vector<2x16xf32>
    %513 = arith.addf %512, %511 : vector<2x16xf32>
    %514 = arith.divf %512, %513 : vector<2x16xf32>
    %515 = vector.extract_strided_slice %500 {offsets = [0, 16], sizes = [2, 16], strides = [1, 1]} : vector<2x64xf32> to vector<2x16xf32>
    %516 = arith.negf %515 : vector<2x16xf32>
    %517 = math.exp %516 : vector<2x16xf32>
    %cst_231 = arith.constant 1.000000e+00 : f32
    %518 = vector.broadcast %cst_231 : f32 to vector<2x16xf32>
    %519 = arith.addf %518, %517 : vector<2x16xf32>
    %520 = arith.divf %518, %519 : vector<2x16xf32>
    %521 = vector.extract_strided_slice %500 {offsets = [0, 32], sizes = [2, 16], strides = [1, 1]} : vector<2x64xf32> to vector<2x16xf32>
    %522 = math.tanh %521 : vector<2x16xf32>
    %523 = vector.extract_strided_slice %500 {offsets = [0, 48], sizes = [2, 16], strides = [1, 1]} : vector<2x64xf32> to vector<2x16xf32>
    %524 = arith.negf %523 : vector<2x16xf32>
    %525 = math.exp %524 : vector<2x16xf32>
    %cst_232 = arith.constant 1.000000e+00 : f32
    %526 = vector.broadcast %cst_232 : f32 to vector<2x16xf32>
    %527 = arith.addf %526, %525 : vector<2x16xf32>
    %528 = arith.divf %526, %527 : vector<2x16xf32>
    %529 = arith.mulf %520, %508 : vector<2x16xf32>
    %530 = arith.mulf %514, %522 : vector<2x16xf32>
    %531 = arith.addf %529, %530 : vector<2x16xf32>
    %532 = math.tanh %531 : vector<2x16xf32>
    %533 = arith.mulf %528, %532 : vector<2x16xf32>
    %c0_233 = arith.constant 0 : index
    %c0_234 = arith.constant 0 : index
    %534 = vector.load %arg11[%c0_233, %c0_234] : memref<2x16xf32, #tpu.memory_space<vmem>>, vector<2x16xf32>
    %535 = vector.extract_strided_slice %507 {offsets = [0, 0], sizes = [2, 16], strides = [1, 1]} : vector<2x64xf32> to vector<2x16xf32>
    %536 = arith.negf %535 : vector<2x16xf32>
    %537 = math.exp %536 : vector<2x16xf32>
    %cst_235 = arith.constant 1.000000e+00 : f32
    %538 = vector.broadcast %cst_235 : f32 to vector<2x16xf32>
    %539 = arith.addf %538, %537 : vector<2x16xf32>
    %540 = arith.divf %538, %539 : vector<2x16xf32>
    %541 = vector.extract_strided_slice %507 {offsets = [0, 16], sizes = [2, 16], strides = [1, 1]} : vector<2x64xf32> to vector<2x16xf32>
    %542 = arith.negf %541 : vector<2x16xf32>
    %543 = math.exp %542 : vector<2x16xf32>
    %cst_236 = arith.constant 1.000000e+00 : f32
    %544 = vector.broadcast %cst_236 : f32 to vector<2x16xf32>
    %545 = arith.addf %544, %543 : vector<2x16xf32>
    %546 = arith.divf %544, %545 : vector<2x16xf32>
    %547 = vector.extract_strided_slice %507 {offsets = [0, 32], sizes = [2, 16], strides = [1, 1]} : vector<2x64xf32> to vector<2x16xf32>
    %548 = math.tanh %547 : vector<2x16xf32>
    %549 = vector.extract_strided_slice %507 {offsets = [0, 48], sizes = [2, 16], strides = [1, 1]} : vector<2x64xf32> to vector<2x16xf32>
    %550 = arith.negf %549 : vector<2x16xf32>
    %551 = math.exp %550 : vector<2x16xf32>
    %cst_237 = arith.constant 1.000000e+00 : f32
    %552 = vector.broadcast %cst_237 : f32 to vector<2x16xf32>
    %553 = arith.addf %552, %551 : vector<2x16xf32>
    %554 = arith.divf %552, %553 : vector<2x16xf32>
    %555 = arith.mulf %546, %534 : vector<2x16xf32>
    %556 = arith.mulf %540, %548 : vector<2x16xf32>
    %557 = arith.addf %555, %556 : vector<2x16xf32>
    %558 = math.tanh %557 : vector<2x16xf32>
    %559 = arith.mulf %554, %558 : vector<2x16xf32>
    %560 = arith.truncf %533 : vector<2x16xf32> to vector<2x16xbf16>
    %561 = arith.truncf %559 : vector<2x16xf32> to vector<2x16xbf16>
    %c0_238 = arith.constant 0 : index
    %c0_239 = arith.constant 0 : index
    %562 = vector.load %arg8[%c0_238, %c0_239] : memref<2x16xbf16, #tpu.memory_space<vmem>>, vector<2x16xbf16>
    tpu.vector_store %arg8[%c0_238, %c0_239], %560 {strides = array<i32>} : memref<2x16xbf16, #tpu.memory_space<vmem>>, vector<2x16xbf16>,
    %c0_240 = arith.constant 0 : index
    %c0_241 = arith.constant 0 : index
    %563 = vector.load %arg9[%c0_240, %c0_241] : memref<2x16xf32, #tpu.memory_space<vmem>>, vector<2x16xf32>
    tpu.vector_store %arg9[%c0_240, %c0_241], %531 {strides = array<i32>} : memref<2x16xf32, #tpu.memory_space<vmem>>, vector<2x16xf32>,
    %c0_242 = arith.constant 0 : index
    %c0_243 = arith.constant 0 : index
    %564 = vector.load %arg10[%c0_242, %c0_243] : memref<2x16xbf16, #tpu.memory_space<vmem>>, vector<2x16xbf16>
    tpu.vector_store %arg10[%c0_242, %c0_243], %561 {strides = array<i32>} : memref<2x16xbf16, #tpu.memory_space<vmem>>, vector<2x16xbf16>,
    %c0_244 = arith.constant 0 : index
    %c0_245 = arith.constant 0 : index
    %565 = vector.load %arg11[%c0_244, %c0_245] : memref<2x16xf32, #tpu.memory_space<vmem>>, vector<2x16xf32>
    tpu.vector_store %arg11[%c0_244, %c0_245], %557 {strides = array<i32>} : memref<2x16xf32, #tpu.memory_space<vmem>>, vector<2x16xf32>,
    %566 = arith.index_cast %c6_i32 : i32 to index
    %c0_246 = arith.constant 0 : index
    %c0_247 = arith.constant 0 : index
    %567 = vector.load %arg5[%566, %c0_246, %c0_247] : memref<8x2x16xbf16, #tpu.memory_space<vmem>>, vector<1x2x16xbf16>
    %568 = vector.shape_cast %567 : vector<1x2x16xbf16> to vector<2x16xbf16>
    %569 = vector.shape_cast %560 : vector<2x16xbf16> to vector<1x2x16xbf16>
    tpu.vector_store %arg5[%566, %c0_246, %c0_247], %569 {strides = array<i32>} : memref<8x2x16xbf16, #tpu.memory_space<vmem>>, vector<1x2x16xbf16>,
    %570 = arith.index_cast %493 : i32 to index
    %c0_248 = arith.constant 0 : index
    %c0_249 = arith.constant 0 : index
    %571 = vector.load %arg6[%570, %c0_248, %c0_249] : memref<8x2x16xbf16, #tpu.memory_space<vmem>>, vector<1x2x16xbf16>
    %572 = vector.shape_cast %571 : vector<1x2x16xbf16> to vector<2x16xbf16>
    %573 = vector.shape_cast %561 : vector<2x16xbf16> to vector<1x2x16xbf16>
    tpu.vector_store %arg6[%570, %c0_248, %c0_249], %573 {strides = array<i32>} : memref<8x2x16xbf16, #tpu.memory_space<vmem>>, vector<1x2x16xbf16>,
    %c7_i32_250 = arith.constant 7 : i32
    %c7_i32_251 = arith.constant 7 : i32
    %574 = arith.subi %c7_i32_251, %c7_i32_250 : i32
    %c0_252 = arith.constant 0 : index
    %575 = arith.index_cast %c7_i32_250 : i32 to index
    %c0_253 = arith.constant 0 : index
    %c0_254 = arith.constant 0 : index
    %576 = vector.load %arg1[%c0_252, %575, %c0_253, %c0_254] : memref<1x8x2x64xbf16, #tpu.memory_space<vmem>>, vector<1x1x2x64xbf16>
    %577 = vector.shape_cast %576 : vector<1x1x2x64xbf16> to vector<2x64xbf16>
    %578 = arith.extf %577 : vector<2x64xbf16> to vector<2x64xf32>
    %c0_255 = arith.constant 0 : index
    %c0_256 = arith.constant 0 : index
    %579 = vector.load %arg8[%c0_255, %c0_256] : memref<2x16xbf16, #tpu.memory_space<vmem>>, vector<2x16xbf16>
    %cst_257 = arith.constant dense<0.000000e+00> : vector<2x64xf32>
    %580 = tpu.matmul %579, %4, %cst_257 {dimension_numbers = #tpu.dot_dimension_numbers<[1], [0], [0], [1], [0, 0, 1, 1], [], []>} : vector<2x16xbf16>, vector<16x64xbf16>, vector<2x64xf32> -> vector<2x64xf32>
    %581 = arith.addf %578, %580 : vector<2x64xf32>
    %c0_258 = arith.constant 0 : index
    %582 = arith.index_cast %574 : i32 to index
    %c0_259 = arith.constant 0 : index
    %c0_260 = arith.constant 0 : index
    %583 = vector.load %arg2[%c0_258, %582, %c0_259, %c0_260] : memref<1x8x2x64xbf16, #tpu.memory_space<vmem>>, vector<1x1x2x64xbf16>
    %584 = vector.shape_cast %583 : vector<1x1x2x64xbf16> to vector<2x64xbf16>
    %585 = arith.extf %584 : vector<2x64xbf16> to vector<2x64xf32>
    %c0_261 = arith.constant 0 : index
    %c0_262 = arith.constant 0 : index
    %586 = vector.load %arg10[%c0_261, %c0_262] : memref<2x16xbf16, #tpu.memory_space<vmem>>, vector<2x16xbf16>
    %cst_263 = arith.constant dense<0.000000e+00> : vector<2x64xf32>
    %587 = tpu.matmul %586, %6, %cst_263 {dimension_numbers = #tpu.dot_dimension_numbers<[1], [0], [0], [1], [0, 0, 1, 1], [], []>} : vector<2x16xbf16>, vector<16x64xbf16>, vector<2x64xf32> -> vector<2x64xf32>
    %588 = arith.addf %585, %587 : vector<2x64xf32>
    %c0_264 = arith.constant 0 : index
    %c0_265 = arith.constant 0 : index
    %589 = vector.load %arg9[%c0_264, %c0_265] : memref<2x16xf32, #tpu.memory_space<vmem>>, vector<2x16xf32>
    %590 = vector.extract_strided_slice %581 {offsets = [0, 0], sizes = [2, 16], strides = [1, 1]} : vector<2x64xf32> to vector<2x16xf32>
    %591 = arith.negf %590 : vector<2x16xf32>
    %592 = math.exp %591 : vector<2x16xf32>
    %cst_266 = arith.constant 1.000000e+00 : f32
    %593 = vector.broadcast %cst_266 : f32 to vector<2x16xf32>
    %594 = arith.addf %593, %592 : vector<2x16xf32>
    %595 = arith.divf %593, %594 : vector<2x16xf32>
    %596 = vector.extract_strided_slice %581 {offsets = [0, 16], sizes = [2, 16], strides = [1, 1]} : vector<2x64xf32> to vector<2x16xf32>
    %597 = arith.negf %596 : vector<2x16xf32>
    %598 = math.exp %597 : vector<2x16xf32>
    %cst_267 = arith.constant 1.000000e+00 : f32
    %599 = vector.broadcast %cst_267 : f32 to vector<2x16xf32>
    %600 = arith.addf %599, %598 : vector<2x16xf32>
    %601 = arith.divf %599, %600 : vector<2x16xf32>
    %602 = vector.extract_strided_slice %581 {offsets = [0, 32], sizes = [2, 16], strides = [1, 1]} : vector<2x64xf32> to vector<2x16xf32>
    %603 = math.tanh %602 : vector<2x16xf32>
    %604 = vector.extract_strided_slice %581 {offsets = [0, 48], sizes = [2, 16], strides = [1, 1]} : vector<2x64xf32> to vector<2x16xf32>
    %605 = arith.negf %604 : vector<2x16xf32>
    %606 = math.exp %605 : vector<2x16xf32>
    %cst_268 = arith.constant 1.000000e+00 : f32
    %607 = vector.broadcast %cst_268 : f32 to vector<2x16xf32>
    %608 = arith.addf %607, %606 : vector<2x16xf32>
    %609 = arith.divf %607, %608 : vector<2x16xf32>
    %610 = arith.mulf %601, %589 : vector<2x16xf32>
    %611 = arith.mulf %595, %603 : vector<2x16xf32>
    %612 = arith.addf %610, %611 : vector<2x16xf32>
    %613 = math.tanh %612 : vector<2x16xf32>
    %614 = arith.mulf %609, %613 : vector<2x16xf32>
    %c0_269 = arith.constant 0 : index
    %c0_270 = arith.constant 0 : index
    %615 = vector.load %arg11[%c0_269, %c0_270] : memref<2x16xf32, #tpu.memory_space<vmem>>, vector<2x16xf32>
    %616 = vector.extract_strided_slice %588 {offsets = [0, 0], sizes = [2, 16], strides = [1, 1]} : vector<2x64xf32> to vector<2x16xf32>
    %617 = arith.negf %616 : vector<2x16xf32>
    %618 = math.exp %617 : vector<2x16xf32>
    %cst_271 = arith.constant 1.000000e+00 : f32
    %619 = vector.broadcast %cst_271 : f32 to vector<2x16xf32>
    %620 = arith.addf %619, %618 : vector<2x16xf32>
    %621 = arith.divf %619, %620 : vector<2x16xf32>
    %622 = vector.extract_strided_slice %588 {offsets = [0, 16], sizes = [2, 16], strides = [1, 1]} : vector<2x64xf32> to vector<2x16xf32>
    %623 = arith.negf %622 : vector<2x16xf32>
    %624 = math.exp %623 : vector<2x16xf32>
    %cst_272 = arith.constant 1.000000e+00 : f32
    %625 = vector.broadcast %cst_272 : f32 to vector<2x16xf32>
    %626 = arith.addf %625, %624 : vector<2x16xf32>
    %627 = arith.divf %625, %626 : vector<2x16xf32>
    %628 = vector.extract_strided_slice %588 {offsets = [0, 32], sizes = [2, 16], strides = [1, 1]} : vector<2x64xf32> to vector<2x16xf32>
    %629 = math.tanh %628 : vector<2x16xf32>
    %630 = vector.extract_strided_slice %588 {offsets = [0, 48], sizes = [2, 16], strides = [1, 1]} : vector<2x64xf32> to vector<2x16xf32>
    %631 = arith.negf %630 : vector<2x16xf32>
    %632 = math.exp %631 : vector<2x16xf32>
    %cst_273 = arith.constant 1.000000e+00 : f32
    %633 = vector.broadcast %cst_273 : f32 to vector<2x16xf32>
    %634 = arith.addf %633, %632 : vector<2x16xf32>
    %635 = arith.divf %633, %634 : vector<2x16xf32>
    %636 = arith.mulf %627, %615 : vector<2x16xf32>
    %637 = arith.mulf %621, %629 : vector<2x16xf32>
    %638 = arith.addf %636, %637 : vector<2x16xf32>
    %639 = math.tanh %638 : vector<2x16xf32>
    %640 = arith.mulf %635, %639 : vector<2x16xf32>
    %641 = arith.truncf %614 : vector<2x16xf32> to vector<2x16xbf16>
    %642 = arith.truncf %640 : vector<2x16xf32> to vector<2x16xbf16>
    %c0_274 = arith.constant 0 : index
    %c0_275 = arith.constant 0 : index
    %643 = vector.load %arg8[%c0_274, %c0_275] : memref<2x16xbf16, #tpu.memory_space<vmem>>, vector<2x16xbf16>
    tpu.vector_store %arg8[%c0_274, %c0_275], %641 {strides = array<i32>} : memref<2x16xbf16, #tpu.memory_space<vmem>>, vector<2x16xbf16>,
    %c0_276 = arith.constant 0 : index
    %c0_277 = arith.constant 0 : index
    %644 = vector.load %arg9[%c0_276, %c0_277] : memref<2x16xf32, #tpu.memory_space<vmem>>, vector<2x16xf32>
    tpu.vector_store %arg9[%c0_276, %c0_277], %612 {strides = array<i32>} : memref<2x16xf32, #tpu.memory_space<vmem>>, vector<2x16xf32>,
    %c0_278 = arith.constant 0 : index
    %c0_279 = arith.constant 0 : index
    %645 = vector.load %arg10[%c0_278, %c0_279] : memref<2x16xbf16, #tpu.memory_space<vmem>>, vector<2x16xbf16>
    tpu.vector_store %arg10[%c0_278, %c0_279], %642 {strides = array<i32>} : memref<2x16xbf16, #tpu.memory_space<vmem>>, vector<2x16xbf16>,
    %c0_280 = arith.constant 0 : index
    %c0_281 = arith.constant 0 : index
    %646 = vector.load %arg11[%c0_280, %c0_281] : memref<2x16xf32, #tpu.memory_space<vmem>>, vector<2x16xf32>
    tpu.vector_store %arg11[%c0_280, %c0_281], %638 {strides = array<i32>} : memref<2x16xf32, #tpu.memory_space<vmem>>, vector<2x16xf32>,
    %647 = arith.index_cast %c7_i32_250 : i32 to index
    %c0_282 = arith.constant 0 : index
    %c0_283 = arith.constant 0 : index
    %648 = vector.load %arg5[%647, %c0_282, %c0_283] : memref<8x2x16xbf16, #tpu.memory_space<vmem>>, vector<1x2x16xbf16>
    %649 = vector.shape_cast %648 : vector<1x2x16xbf16> to vector<2x16xbf16>
    %650 = vector.shape_cast %641 : vector<2x16xbf16> to vector<1x2x16xbf16>
    tpu.vector_store %arg5[%647, %c0_282, %c0_283], %650 {strides = array<i32>} : memref<8x2x16xbf16, #tpu.memory_space<vmem>>, vector<1x2x16xbf16>,
    %651 = arith.index_cast %574 : i32 to index
    %c0_284 = arith.constant 0 : index
    %c0_285 = arith.constant 0 : index
    %652 = vector.load %arg6[%651, %c0_284, %c0_285] : memref<8x2x16xbf16, #tpu.memory_space<vmem>>, vector<1x2x16xbf16>
    %653 = vector.shape_cast %652 : vector<1x2x16xbf16> to vector<2x16xbf16>
    %654 = vector.shape_cast %642 : vector<2x16xbf16> to vector<1x2x16xbf16>
    tpu.vector_store %arg6[%651, %c0_284, %c0_285], %654 {strides = array<i32>} : memref<8x2x16xbf16, #tpu.memory_space<vmem>>, vector<1x2x16xbf16>,
    %c8_i32 = arith.constant 8 : i32
    %c0_286 = arith.constant 0 : index
    %c0_287 = arith.constant 0 : index
    %655 = vector.load %arg9[%c0_286, %c0_287] : memref<2x16xf32, #tpu.memory_space<vmem>>, vector<2x16xf32>
    %c0_288 = arith.constant 0 : index
    %c0_289 = arith.constant 0 : index
    %c0_290 = arith.constant 0 : index
    %656 = vector.load %arg7[%c0_288, %c0_289, %c0_290] : memref<2x2x16xf32, #tpu.memory_space<vmem>>, vector<1x2x16xf32>
    %657 = vector.shape_cast %656 : vector<1x2x16xf32> to vector<2x16xf32>
    %658 = vector.shape_cast %655 : vector<2x16xf32> to vector<1x2x16xf32>
    tpu.vector_store %arg7[%c0_288, %c0_289, %c0_290], %658 {strides = array<i32>} : memref<2x2x16xf32, #tpu.memory_space<vmem>>, vector<1x2x16xf32>,
    %c0_291 = arith.constant 0 : index
    %c0_292 = arith.constant 0 : index
    %659 = vector.load %arg11[%c0_291, %c0_292] : memref<2x16xf32, #tpu.memory_space<vmem>>, vector<2x16xf32>
    %c1 = arith.constant 1 : index
    %c0_293 = arith.constant 0 : index
    %c0_294 = arith.constant 0 : index
    %660 = vector.load %arg7[%c1, %c0_293, %c0_294] : memref<2x2x16xf32, #tpu.memory_space<vmem>>, vector<1x2x16xf32>
    %661 = vector.shape_cast %660 : vector<1x2x16xf32> to vector<2x16xf32>
    %662 = vector.shape_cast %659 : vector<2x16xf32> to vector<1x2x16xf32>
    tpu.vector_store %arg7[%c1, %c0_293, %c0_294], %662 {strides = array<i32>} : memref<2x2x16xf32, #tpu.memory_space<vmem>>, vector<1x2x16xf32>,
    return
  }
  func.func @transform_0(%arg0: i32) -> (i32, i32, i32, i32) {
    %c0_i32 = arith.constant 0 : i32
    %c0_i32_0 = arith.constant 0 : i32
    %c0_i32_1 = arith.constant 0 : i32
    %c0_i32_2 = arith.constant 0 : i32
    return %c0_i32, %arg0, %c0_i32_0, %c0_i32_1 : i32, i32, i32, i32
  }
  func.func @transform_1(%arg0: i32) -> (i32, i32, i32, i32) {
    %c0_i32 = arith.constant 0 : i32
    %0 = arith.subi %c0_i32, %arg0 : i32
    %c1_i32 = arith.constant 1 : i32
    %c0_i32_0 = arith.constant 0 : i32
    %c0_i32_1 = arith.constant 0 : i32
    %c0_i32_2 = arith.constant 0 : i32
    return %c1_i32, %0, %c0_i32_0, %c0_i32_1 : i32, i32, i32, i32
  }
  func.func @transform_2(%arg0: i32) -> (i32, i32, i32) {
    %c0_i32 = arith.constant 0 : i32
    %c0_i32_0 = arith.constant 0 : i32
    %c0_i32_1 = arith.constant 0 : i32
    %c0_i32_2 = arith.constant 0 : i32
    return %c0_i32, %c0_i32_0, %c0_i32_1 : i32, i32, i32
  }
  func.func @transform_3(%arg0: i32) -> (i32, i32, i32) {
    %c1_i32 = arith.constant 1 : i32
    %c0_i32 = arith.constant 0 : i32
    %c0_i32_0 = arith.constant 0 : i32
    %c0_i32_1 = arith.constant 0 : i32
    return %c1_i32, %c0_i32, %c0_i32_0 : i32, i32, i32
  }
  func.func @transform_4(%arg0: i32) -> (i32, i32, i32) {
    %c0_i32 = arith.constant 0 : i32
    %c0_i32_0 = arith.constant 0 : i32
    %c0_i32_1 = arith.constant 0 : i32
    return %arg0, %c0_i32, %c0_i32_0 : i32, i32, i32
  }
  func.func @transform_5(%arg0: i32) -> (i32, i32, i32) {
    %c0_i32 = arith.constant 0 : i32
    %0 = arith.subi %c0_i32, %arg0 : i32
    %c0_i32_0 = arith.constant 0 : i32
    %c0_i32_1 = arith.constant 0 : i32
    %c0_i32_2 = arith.constant 0 : i32
    return %0, %c0_i32_0, %c0_i32_1 : i32, i32, i32
  }
  func.func @transform_6(%arg0: i32) -> (i32, i32, i32) {
    %c0_i32 = arith.constant 0 : i32
    %c0_i32_0 = arith.constant 0 : i32
    %c0_i32_1 = arith.constant 0 : i32
    %c0_i32_2 = arith.constant 0 : i32
    return %c0_i32, %c0_i32_0, %c0_i32_1 : i32, i32, i32
  }
}

module attributes {stable_mosaic.version = 11 : i64} {
  func.func @_dual_fc_ln_kernel(%arg0: i32, %arg1: memref<24x16xbf16, #tpu.memory_space<vmem>>, %arg2: memref<24x16xbf16, #tpu.memory_space<vmem>>, %arg3: memref<16x16xbf16, #tpu.memory_space<vmem>>, %arg4: memref<16x16xbf16, #tpu.memory_space<vmem>>, %arg5: memref<1x16xf32, #tpu.memory_space<vmem>>, %arg6: memref<1x16xf32, #tpu.memory_space<vmem>>, %arg7: memref<1x16xf32, #tpu.memory_space<vmem>>, %arg8: memref<24x16xf32, #tpu.memory_space<vmem>>) attributes {dimension_semantics = [#tpu.dimension_semantics<parallel>], iteration_bounds = array<i64: 1>, scalar_prefetch = 0 : i64, scratch_operands = 0 : i64, tpu.core_type = #tpu.core_type<tc>, window_params = [{transform_indices = @transform_0, window_bounds = array<i64: 24, 16>}, {transform_indices = @transform_1, window_bounds = array<i64: 24, 16>}, {pipeline_mode = #tpu.pipeline_mode<synchronous>, transform_indices = @transform_2, window_bounds = array<i64: 16, 16>}, {pipeline_mode = #tpu.pipeline_mode<synchronous>, transform_indices = @transform_3, window_bounds = array<i64: 16, 16>}, {pipeline_mode = #tpu.pipeline_mode<synchronous>, transform_indices = @transform_4, window_bounds = array<i64: 1, 16>}, {pipeline_mode = #tpu.pipeline_mode<synchronous>, transform_indices = @transform_5, window_bounds = array<i64: 1, 16>}, {pipeline_mode = #tpu.pipeline_mode<synchronous>, transform_indices = @transform_6, window_bounds = array<i64: 1, 16>}, {transform_indices = @transform_7, window_bounds = array<i64: 24, 16>}]} {
    %c0 = arith.constant 0 : index
    %c0_0 = arith.constant 0 : index
    %0 = vector.load %arg1[%c0, %c0_0] : memref<24x16xbf16, #tpu.memory_space<vmem>>, vector<24x16xbf16>
    %c0_1 = arith.constant 0 : index
    %c0_2 = arith.constant 0 : index
    %1 = vector.load %arg3[%c0_1, %c0_2] : memref<16x16xbf16, #tpu.memory_space<vmem>>, vector<16x16xbf16>
    %cst = arith.constant dense<0.000000e+00> : vector<24x16xf32>
    %2 = tpu.matmul %0, %1, %cst {dimension_numbers = #tpu.dot_dimension_numbers<[1], [0], [0], [1], [0, 0, 1, 1], [], []>} : vector<24x16xbf16>, vector<16x16xbf16>, vector<24x16xf32> -> vector<24x16xf32>
    %c0_3 = arith.constant 0 : index
    %c0_4 = arith.constant 0 : index
    %3 = vector.load %arg2[%c0_3, %c0_4] : memref<24x16xbf16, #tpu.memory_space<vmem>>, vector<24x16xbf16>
    %c0_5 = arith.constant 0 : index
    %c0_6 = arith.constant 0 : index
    %4 = vector.load %arg4[%c0_5, %c0_6] : memref<16x16xbf16, #tpu.memory_space<vmem>>, vector<16x16xbf16>
    %cst_7 = arith.constant dense<0.000000e+00> : vector<24x16xf32>
    %5 = tpu.matmul %3, %4, %cst_7 {dimension_numbers = #tpu.dot_dimension_numbers<[1], [0], [0], [1], [0, 0, 1, 1], [], []>} : vector<24x16xbf16>, vector<16x16xbf16>, vector<24x16xf32> -> vector<24x16xf32>
    %6 = arith.addf %2, %5 : vector<24x16xf32>
    %c0_8 = arith.constant 0 : index
    %c0_9 = arith.constant 0 : index
    %7 = vector.load %arg5[%c0_8, %c0_9] : memref<1x16xf32, #tpu.memory_space<vmem>>, vector<1x16xf32>
    %8 = vector.broadcast %7 : vector<1x16xf32> to vector<24x16xf32>
    %9 = arith.addf %6, %8 : vector<24x16xf32>
    %cst_10 = arith.constant dense<0.000000e+00> : vector<24xf32>
    %10 = vector.multi_reduction <add>, %9, %cst_10 [1] : vector<24x16xf32> to vector<24xf32>
    %11 = vector.shape_cast %10 : vector<24xf32> to vector<24x1xf32>
    %cst_11 = arith.constant 1.600000e+01 : f32
    %12 = vector.broadcast %cst_11 : f32 to vector<24x1xf32>
    %13 = arith.divf %11, %12 : vector<24x1xf32>
    %14 = arith.mulf %9, %9 : vector<24x16xf32>
    %cst_12 = arith.constant dense<0.000000e+00> : vector<24xf32>
    %15 = vector.multi_reduction <add>, %14, %cst_12 [1] : vector<24x16xf32> to vector<24xf32>
    %16 = vector.shape_cast %15 : vector<24xf32> to vector<24x1xf32>
    %cst_13 = arith.constant 1.600000e+01 : f32
    %17 = vector.broadcast %cst_13 : f32 to vector<24x1xf32>
    %18 = arith.divf %16, %17 : vector<24x1xf32>
    %19 = arith.mulf %13, %13 : vector<24x1xf32>
    %20 = arith.subf %18, %19 : vector<24x1xf32>
    %21 = vector.broadcast %13 : vector<24x1xf32> to vector<24x16xf32>
    %22 = arith.subf %9, %21 : vector<24x16xf32>
    %cst_14 = arith.constant 9.99999974E-6 : f32
    %23 = vector.broadcast %cst_14 : f32 to vector<24x1xf32>
    %24 = arith.addf %20, %23 : vector<24x1xf32>
    %25 = math.rsqrt %24 : vector<24x1xf32>
    %26 = vector.broadcast %25 : vector<24x1xf32> to vector<24x16xf32>
    %27 = arith.mulf %22, %26 : vector<24x16xf32>
    %c0_15 = arith.constant 0 : index
    %c0_16 = arith.constant 0 : index
    %28 = vector.load %arg6[%c0_15, %c0_16] : memref<1x16xf32, #tpu.memory_space<vmem>>, vector<1x16xf32>
    %29 = vector.broadcast %28 : vector<1x16xf32> to vector<24x16xf32>
    %30 = arith.mulf %27, %29 : vector<24x16xf32>
    %c0_17 = arith.constant 0 : index
    %c0_18 = arith.constant 0 : index
    %31 = vector.load %arg7[%c0_17, %c0_18] : memref<1x16xf32, #tpu.memory_space<vmem>>, vector<1x16xf32>
    %32 = vector.broadcast %31 : vector<1x16xf32> to vector<24x16xf32>
    %33 = arith.addf %30, %32 : vector<24x16xf32>
    %c0_19 = arith.constant 0 : index
    %c0_20 = arith.constant 0 : index
    %34 = vector.load %arg8[%c0_19, %c0_20] : memref<24x16xf32, #tpu.memory_space<vmem>>, vector<24x16xf32>
    tpu.vector_store %arg8[%c0_19, %c0_20], %33 {strides = array<i32>} : memref<24x16xf32, #tpu.memory_space<vmem>>, vector<24x16xf32>,
    return
  }
  func.func @transform_0(%arg0: i32) -> (i32, i32) {
    %c0_i32 = arith.constant 0 : i32
    %c0_i32_0 = arith.constant 0 : i32
    return %arg0, %c0_i32 : i32, i32
  }
  func.func @transform_1(%arg0: i32) -> (i32, i32) {
    %c0_i32 = arith.constant 0 : i32
    %c0_i32_0 = arith.constant 0 : i32
    return %arg0, %c0_i32 : i32, i32
  }
  func.func @transform_2(%arg0: i32) -> (i32, i32) {
    %c0_i32 = arith.constant 0 : i32
    %c0_i32_0 = arith.constant 0 : i32
    %c0_i32_1 = arith.constant 0 : i32
    return %c0_i32, %c0_i32_0 : i32, i32
  }
  func.func @transform_3(%arg0: i32) -> (i32, i32) {
    %c0_i32 = arith.constant 0 : i32
    %c0_i32_0 = arith.constant 0 : i32
    %c0_i32_1 = arith.constant 0 : i32
    return %c0_i32, %c0_i32_0 : i32, i32
  }
  func.func @transform_4(%arg0: i32) -> (i32, i32) {
    %c0_i32 = arith.constant 0 : i32
    %c0_i32_0 = arith.constant 0 : i32
    %c0_i32_1 = arith.constant 0 : i32
    return %c0_i32, %c0_i32_0 : i32, i32
  }
  func.func @transform_5(%arg0: i32) -> (i32, i32) {
    %c0_i32 = arith.constant 0 : i32
    %c0_i32_0 = arith.constant 0 : i32
    %c0_i32_1 = arith.constant 0 : i32
    return %c0_i32, %c0_i32_0 : i32, i32
  }
  func.func @transform_6(%arg0: i32) -> (i32, i32) {
    %c0_i32 = arith.constant 0 : i32
    %c0_i32_0 = arith.constant 0 : i32
    %c0_i32_1 = arith.constant 0 : i32
    return %c0_i32, %c0_i32_0 : i32, i32
  }
  func.func @transform_7(%arg0: i32) -> (i32, i32) {
    %c0_i32 = arith.constant 0 : i32
    %c0_i32_0 = arith.constant 0 : i32
    return %arg0, %c0_i32 : i32, i32
  }
}

module attributes {stable_mosaic.version = 11 : i64} {
  func.func @_content_gate_kernel(%arg0: i32, %arg1: i32, %arg2: memref<2x8x16xf32, #tpu.memory_space<vmem>>, %arg3: memref<2x8x16xf32, #tpu.memory_space<vmem>>, %arg4: memref<16x16xbf16, #tpu.memory_space<vmem>>, %arg5: memref<16x16xbf16, #tpu.memory_space<vmem>>, %arg6: memref<16x16xbf16, #tpu.memory_space<vmem>>, %arg7: memref<1x16xf32, #tpu.memory_space<vmem>>, %arg8: memref<1x16xf32, #tpu.memory_space<vmem>>, %arg9: memref<1x16xf32, #tpu.memory_space<vmem>>, %arg10: memref<2x8x16xf32, #tpu.memory_space<vmem>>) attributes {dimension_semantics = [#tpu.dimension_semantics<parallel>, #tpu.dimension_semantics<parallel>], iteration_bounds = array<i64: 1, 1>, scalar_prefetch = 0 : i64, scratch_operands = 0 : i64, tpu.core_type = #tpu.core_type<tc>, window_params = [{transform_indices = @transform_0, window_bounds = array<i64: 2, 8, 16>}, {transform_indices = @transform_1, window_bounds = array<i64: 2, 8, 16>}, {pipeline_mode = #tpu.pipeline_mode<synchronous>, transform_indices = @transform_2, window_bounds = array<i64: 16, 16>}, {pipeline_mode = #tpu.pipeline_mode<synchronous>, transform_indices = @transform_3, window_bounds = array<i64: 16, 16>}, {pipeline_mode = #tpu.pipeline_mode<synchronous>, transform_indices = @transform_4, window_bounds = array<i64: 16, 16>}, {pipeline_mode = #tpu.pipeline_mode<synchronous>, transform_indices = @transform_5, window_bounds = array<i64: 1, 16>}, {pipeline_mode = #tpu.pipeline_mode<synchronous>, transform_indices = @transform_6, window_bounds = array<i64: 1, 16>}, {pipeline_mode = #tpu.pipeline_mode<synchronous>, transform_indices = @transform_7, window_bounds = array<i64: 1, 16>}, {transform_indices = @transform_8, window_bounds = array<i64: 2, 8, 16>}]} {
    %c0 = arith.constant 0 : index
    %c0_0 = arith.constant 0 : index
    %c0_1 = arith.constant 0 : index
    %0 = vector.load %arg2[%c0, %c0_0, %c0_1] : memref<2x8x16xf32, #tpu.memory_space<vmem>>, vector<2x8x16xf32>
    %1 = vector.shape_cast %0 : vector<2x8x16xf32> to vector<16x16xf32>
    %2 = arith.truncf %1 : vector<16x16xf32> to vector<16x16xbf16>
    %c0_2 = arith.constant 0 : index
    %c0_3 = arith.constant 0 : index
    %c0_4 = arith.constant 0 : index
    %3 = vector.load %arg3[%c0_2, %c0_3, %c0_4] : memref<2x8x16xf32, #tpu.memory_space<vmem>>, vector<2x8x16xf32>
    %4 = arith.truncf %3 : vector<2x8x16xf32> to vector<2x8x16xbf16>
    %c0_5 = arith.constant 0 : index
    %c0_6 = arith.constant 0 : index
    %5 = vector.load %arg4[%c0_5, %c0_6] : memref<16x16xbf16, #tpu.memory_space<vmem>>, vector<16x16xbf16>
    %cst = arith.constant dense<0.000000e+00> : vector<16x16xf32>
    %6 = tpu.matmul %2, %5, %cst {dimension_numbers = #tpu.dot_dimension_numbers<[1], [0], [0], [1], [0, 0, 1, 1], [], []>} : vector<16x16xbf16>, vector<16x16xbf16>, vector<16x16xf32> -> vector<16x16xf32>
    %7 = vector.shape_cast %6 : vector<16x16xf32> to vector<2x8x16xf32>
    %8 = arith.truncf %7 : vector<2x8x16xf32> to vector<2x8x16xbf16>
    "tpu.trace_start"() <{level = 10 : i32, message = "bqk,btk->bqt"}> : () -> ()
    %cst_7 = arith.constant dense<0.000000e+00> : vector<2x8x8xf32>
    %9 = tpu.matmul %8, %4, %cst_7 {dimension_numbers = #tpu.dot_dimension_numbers<[2], [2], [1], [1], [0, 0, 0, 1, 1, 1], [0], [0]>} : vector<2x8x16xbf16>, vector<2x8x16xbf16>, vector<2x8x8xf32> -> vector<2x8x8xf32>
    "tpu.trace_stop"() : () -> ()
    %cst_8 = arith.constant dense<0xFF800000> : vector<2x8xf32>
    %10 = vector.multi_reduction <maximumf>, %9, %cst_8 [2] : vector<2x8x8xf32> to vector<2x8xf32>
    %11 = vector.shape_cast %10 : vector<2x8xf32> to vector<2x8x1xf32>
    %12 = vector.broadcast %11 : vector<2x8x1xf32> to vector<2x8x8xf32>
    %13 = arith.subf %9, %12 : vector<2x8x8xf32>
    %14 = math.exp %13 : vector<2x8x8xf32>
    %cst_9 = arith.constant dense<0.000000e+00> : vector<2x8xf32>
    %15 = vector.multi_reduction <add>, %14, %cst_9 [2] : vector<2x8x8xf32> to vector<2x8xf32>
    %16 = vector.shape_cast %15 : vector<2x8xf32> to vector<2x8x1xf32>
    %17 = tpu.reciprocal %16 {approx = true} : vector<2x8x1xf32> -> vector<2x8x1xf32>
    %18 = vector.broadcast %17 : vector<2x8x1xf32> to vector<2x8x8xf32>
    %19 = arith.mulf %14, %18 : vector<2x8x8xf32>
    %20 = arith.truncf %19 : vector<2x8x8xf32> to vector<2x8x8xbf16>
    "tpu.trace_start"() <{level = 10 : i32, message = "bqt,bth->bqh"}> : () -> ()
    %cst_10 = arith.constant dense<0.000000e+00> : vector<2x8x16xf32>
    %21 = tpu.matmul %20, %4, %cst_10 {dimension_numbers = #tpu.dot_dimension_numbers<[2], [1], [1], [2], [0, 0, 0, 1, 1, 2], [0], [0]>} : vector<2x8x8xbf16>, vector<2x8x16xbf16>, vector<2x8x16xf32> -> vector<2x8x16xf32>
    "tpu.trace_stop"() : () -> ()
    %c0_11 = arith.constant 0 : index
    %c0_12 = arith.constant 0 : index
    %22 = vector.load %arg5[%c0_11, %c0_12] : memref<16x16xbf16, #tpu.memory_space<vmem>>, vector<16x16xbf16>
    %cst_13 = arith.constant dense<0.000000e+00> : vector<16x16xf32>
    %23 = tpu.matmul %2, %22, %cst_13 {dimension_numbers = #tpu.dot_dimension_numbers<[1], [0], [0], [1], [0, 0, 1, 1], [], []>} : vector<16x16xbf16>, vector<16x16xbf16>, vector<16x16xf32> -> vector<16x16xf32>
    %24 = vector.shape_cast %21 : vector<2x8x16xf32> to vector<16x16xf32>
    %25 = arith.truncf %24 : vector<16x16xf32> to vector<16x16xbf16>
    %c0_14 = arith.constant 0 : index
    %c0_15 = arith.constant 0 : index
    %26 = vector.load %arg6[%c0_14, %c0_15] : memref<16x16xbf16, #tpu.memory_space<vmem>>, vector<16x16xbf16>
    %cst_16 = arith.constant dense<0.000000e+00> : vector<16x16xf32>
    %27 = tpu.matmul %25, %26, %cst_16 {dimension_numbers = #tpu.dot_dimension_numbers<[1], [0], [0], [1], [0, 0, 1, 1], [], []>} : vector<16x16xbf16>, vector<16x16xbf16>, vector<16x16xf32> -> vector<16x16xf32>
    %28 = arith.addf %23, %27 : vector<16x16xf32>
    %c0_17 = arith.constant 0 : index
    %c0_18 = arith.constant 0 : index
    %29 = vector.load %arg7[%c0_17, %c0_18] : memref<1x16xf32, #tpu.memory_space<vmem>>, vector<1x16xf32>
    %30 = vector.broadcast %29 : vector<1x16xf32> to vector<16x16xf32>
    %31 = arith.addf %28, %30 : vector<16x16xf32>
    %cst_19 = arith.constant dense<0.000000e+00> : vector<16xf32>
    %32 = vector.multi_reduction <add>, %31, %cst_19 [1] : vector<16x16xf32> to vector<16xf32>
    %33 = vector.shape_cast %32 : vector<16xf32> to vector<16x1xf32>
    %cst_20 = arith.constant 1.600000e+01 : f32
    %34 = vector.broadcast %cst_20 : f32 to vector<16x1xf32>
    %35 = arith.divf %33, %34 : vector<16x1xf32>
    %36 = arith.mulf %31, %31 : vector<16x16xf32>
    %cst_21 = arith.constant dense<0.000000e+00> : vector<16xf32>
    %37 = vector.multi_reduction <add>, %36, %cst_21 [1] : vector<16x16xf32> to vector<16xf32>
    %38 = vector.shape_cast %37 : vector<16xf32> to vector<16x1xf32>
    %cst_22 = arith.constant 1.600000e+01 : f32
    %39 = vector.broadcast %cst_22 : f32 to vector<16x1xf32>
    %40 = arith.divf %38, %39 : vector<16x1xf32>
    %41 = arith.mulf %35, %35 : vector<16x1xf32>
    %42 = arith.subf %40, %41 : vector<16x1xf32>
    %43 = vector.broadcast %35 : vector<16x1xf32> to vector<16x16xf32>
    %44 = arith.subf %31, %43 : vector<16x16xf32>
    %cst_23 = arith.constant 9.99999974E-6 : f32
    %45 = vector.broadcast %cst_23 : f32 to vector<16x1xf32>
    %46 = arith.addf %42, %45 : vector<16x1xf32>
    %47 = math.rsqrt %46 : vector<16x1xf32>
    %48 = vector.broadcast %47 : vector<16x1xf32> to vector<16x16xf32>
    %49 = arith.mulf %44, %48 : vector<16x16xf32>
    %c0_24 = arith.constant 0 : index
    %c0_25 = arith.constant 0 : index
    %50 = vector.load %arg8[%c0_24, %c0_25] : memref<1x16xf32, #tpu.memory_space<vmem>>, vector<1x16xf32>
    %51 = vector.broadcast %50 : vector<1x16xf32> to vector<16x16xf32>
    %52 = arith.mulf %49, %51 : vector<16x16xf32>
    %c0_26 = arith.constant 0 : index
    %c0_27 = arith.constant 0 : index
    %53 = vector.load %arg9[%c0_26, %c0_27] : memref<1x16xf32, #tpu.memory_space<vmem>>, vector<1x16xf32>
    %54 = vector.broadcast %53 : vector<1x16xf32> to vector<16x16xf32>
    %55 = arith.addf %52, %54 : vector<16x16xf32>
    %56 = arith.negf %55 : vector<16x16xf32>
    %57 = math.exp %56 : vector<16x16xf32>
    %cst_28 = arith.constant 1.000000e+00 : f32
    %58 = vector.broadcast %cst_28 : f32 to vector<16x16xf32>
    %59 = arith.addf %58, %57 : vector<16x16xf32>
    %60 = arith.divf %58, %59 : vector<16x16xf32>
    %61 = vector.shape_cast %60 : vector<16x16xf32> to vector<2x8x16xf32>
    %62 = arith.mulf %61, %0 : vector<2x8x16xf32>
    %c0_29 = arith.constant 0 : index
    %c0_30 = arith.constant 0 : index
    %c0_31 = arith.constant 0 : index
    %63 = vector.load %arg10[%c0_29, %c0_30, %c0_31] : memref<2x8x16xf32, #tpu.memory_space<vmem>>, vector<2x8x16xf32>
    tpu.vector_store %arg10[%c0_29, %c0_30, %c0_31], %62 {strides = array<i32>} : memref<2x8x16xf32, #tpu.memory_space<vmem>>, vector<2x8x16xf32>,
    return
  }
  func.func @transform_0(%arg0: i32, %arg1: i32) -> (i32, i32, i32) {
    %c0_i32 = arith.constant 0 : i32
    %c0_i32_0 = arith.constant 0 : i32
    return %arg0, %arg1, %c0_i32 : i32, i32, i32
  }
  func.func @transform_1(%arg0: i32, %arg1: i32) -> (i32, i32, i32) {
    %c0_i32 = arith.constant 0 : i32
    %c0_i32_0 = arith.constant 0 : i32
    %c0_i32_1 = arith.constant 0 : i32
    return %arg0, %c0_i32, %c0_i32_0 : i32, i32, i32
  }
  func.func @transform_2(%arg0: i32, %arg1: i32) -> (i32, i32) {
    %c0_i32 = arith.constant 0 : i32
    %c0_i32_0 = arith.constant 0 : i32
    %c0_i32_1 = arith.constant 0 : i32
    return %c0_i32, %c0_i32_0 : i32, i32
  }
  func.func @transform_3(%arg0: i32, %arg1: i32) -> (i32, i32) {
    %c0_i32 = arith.constant 0 : i32
    %c0_i32_0 = arith.constant 0 : i32
    %c0_i32_1 = arith.constant 0 : i32
    return %c0_i32, %c0_i32_0 : i32, i32
  }
  func.func @transform_4(%arg0: i32, %arg1: i32) -> (i32, i32) {
    %c0_i32 = arith.constant 0 : i32
    %c0_i32_0 = arith.constant 0 : i32
    %c0_i32_1 = arith.constant 0 : i32
    return %c0_i32, %c0_i32_0 : i32, i32
  }
  func.func @transform_5(%arg0: i32, %arg1: i32) -> (i32, i32) {
    %c0_i32 = arith.constant 0 : i32
    %c0_i32_0 = arith.constant 0 : i32
    %c0_i32_1 = arith.constant 0 : i32
    return %c0_i32, %c0_i32_0 : i32, i32
  }
  func.func @transform_6(%arg0: i32, %arg1: i32) -> (i32, i32) {
    %c0_i32 = arith.constant 0 : i32
    %c0_i32_0 = arith.constant 0 : i32
    %c0_i32_1 = arith.constant 0 : i32
    return %c0_i32, %c0_i32_0 : i32, i32
  }
  func.func @transform_7(%arg0: i32, %arg1: i32) -> (i32, i32) {
    %c0_i32 = arith.constant 0 : i32
    %c0_i32_0 = arith.constant 0 : i32
    %c0_i32_1 = arith.constant 0 : i32
    return %c0_i32, %c0_i32_0 : i32, i32
  }
  func.func @transform_8(%arg0: i32, %arg1: i32) -> (i32, i32, i32) {
    %c0_i32 = arith.constant 0 : i32
    %c0_i32_0 = arith.constant 0 : i32
    return %arg0, %arg1, %c0_i32 : i32, i32, i32
  }
}

</mosaic_0001>

<bundles_post_ra>
// kernel: encoder_attn_forward.4
= control target key start
LH: loop header
LB: loop body
LE: loop exit
PB: predicated region body
PF: predicated region fallthrough
CT: control target
= control target key end

     0   :  { %vm51_vm0 = vcmask 130048   ;;  %s389_s3 = inlined_call_operand.vmem [shape: bf16[16,16], index: 3, kind: input, shape index: {}]   ;;  %s390_s2 = inlined_call_operand.vmem [shape: bf16[16,16], index: 2, kind: input, shape index: {}]   ;;  %s391_s1 = inlined_call_operand.vmem [shape: bf16[24,16], index: 1, kind: input, shape index: {}]   ;;  %s392_s0 = inlined_call_operand.vmem [shape: bf16[24,16], index: 0, kind: input, shape index: {}]   ;;  %s393_s4 = inlined_call_operand.vmem [shape: f32[1,16], index: 4, kind: input, shape index: {}]   ;;  %s394_s5 = inlined_call_operand.vmem [shape: f32[1,16], index: 5, kind: input, shape index: {}]   ;;  %s395_s6 = inlined_call_operand.vmem [shape: f32[1,16], index: 6, kind: input, shape index: {}]   ;;  %s396_s7 = inlined_call_operand.vmem [shape: f32[24,16], index: 7, kind: output, shape index: {}]  }
   0x1   :  { %v288_v0 = vld [vmem:[%s389_s3] sm:$0xff]   ;;  %v291_v3 = vld [vmem:[%s391_s1 + $0x8] ss:$0 sps:$4 sm:$0xff]  }
   0x2   :  { %v289_v1 = vld [vmem:[%s390_s2] sm:$0xff]   ;;  %276 = vmatprep.subr.bf16.mxu0 %v288_v0  ;;  %v293_v5 = vld [vmem:[%s392_s0 + $0x8] ss:$0 sps:$4 sm:$0xff]  }
   0x3   :  { %282 = vmatprep.subr.bf16.mxu1 %v289_v1  ;;  %277 = vmatpush3.bf16.msra.mxu0 %v288_v0  ;;  %v290_v2 = vld [vmem:[%s391_s1] sm:$0xff]  }
   0x4   :  { %283 = vmatpush3.bf16.msra.mxu1 %v289_v1  ;;  %v292_v4 = vld [vmem:[%s392_s0] sm:$0xff]   ;;  %278 = vmatprep.mubr.msk.bf16.mxu0 %vm51_vm0, %v290_v2 }
   0x5   :  { %284 = vmatprep.mubr.msk.bf16.mxu1 %vm51_vm0, %v292_v4  ;;  %v267_v8 = vld [vmem:[%s393_s4] ss:$0 sm:$0xff] }
   0x6   :  { %279 = vmatmul.mubr.msk.bf16.vlgmr.msra.gmra.mxu0 %vm51_vm0, %v291_v3  ;;  %v268_v53 = vld [vmem:[%s394_s5] ss:$0 sm:$0xff] }
   0x7   :  { %285 = vmatmul.mubr.msk.bf16.vlgmr.msra.gmra.mxu1 %vm51_vm0, %v293_v5  ;;  %v269_v55 = vld [vmem:[%s395_s6] ss:$0 sm:$0xff] }
  0xc6   :  { %v280_v6 = vpop.f32.mrf.mxu0 }
  0xc7   :  { %v286_v7 = vpop.f32.mrf.mxu1 }
  0xc8   :  { %v169_v9 = vadd.f32 %v286_v7, %v280_v6  ;;  %v92_v10 = vpop.f32.mrf.mxu0 }
  0xc9   :  { %v160_v11 = vpop.f32.mrf.mxu1 }
  0xca   :  { %v183_v12 = vadd.f32 %v267_v8, %v169_v9  ;;  %v161_v13 = vadd.f32 %v160_v11, %v92_v10  ;;  %v281_v14 = vpop.f32.mrf.mxu0 }
  0xcb   :  { %v287_v15 = vpop.f32.mrf.mxu1 }
  0xcc   :  { %v181_v16 = vadd.f32 %v267_v8, %v161_v13  ;;  %v95_v17 = vpop.f32.mrf.mxu0  ;;  %v190_v18 = vsel %vm51_vm0, %v183_v12, 0.0  ;;  %v199_v25 = vmul.f32 %v183_v12, %v183_v12 }
  0xcd   :  { %191 = vadd.xlane.f32.xlu1 %v190_v18  ;;  %v163_v19 = vpop.f32.mrf.mxu1 }
  0xce   :  { %v164_v20 = vadd.f32 %v163_v19, %v95_v17  ;;  %v184_v21 = vsel %vm51_vm0, %v181_v16, 0.0  ;;  %v197_v22 = vmul.f32 %v181_v16, %v181_v16  ;;  %v206_v28 = vsel %vm51_vm0, %v199_v25, 0.0 }
  0xcf   :  { %185 = vadd.xlane.f32.xlu0 %v184_v21 }
  0xd0   :  { %v182_v23 = vadd.f32 %v267_v8, %v164_v20  ;;  %v200_v24 = vsel %vm51_vm0, %v197_v22, 0.0 }
  0xd1   :  { %201 = vadd.xlane.f32.xlu1 %v200_v24 }
  0xd2   :  { %v187_v26 = vsel %vm51_vm0, %v182_v23, 0.0  ;;  %v198_v27 = vmul.f32 %v182_v23, %v182_v23 }
  0xd3   :  { %188 = vadd.xlane.f32.xlu0 %v187_v26 }
  0xd4   :  { %v203_v29 = vsel %vm51_vm0, %v198_v27, 0.0 }
  0xd5   :  { %207 = vadd.xlane.f32.xlu1 %v206_v28 }
  0xd7   :  { %204 = vadd.xlane.f32.xlu0 %v203_v29 }
 0x156   :  { %v192_v30 = vpop.xlane.xlu1 %191 }
 0x157   :  { %v196_v34 = vmul.f32 0.0625, %v192_v30 }
 0x158   :  { %v186_v31 = vpop.xlane.xlu0 %185 }
 0x159   :  { %v194_v32 = vmul.f32 0.0625, %v186_v31  ;;  %v214_v41 = vmul.f32 %v196_v34, %v196_v34  ;;  %v220_v56 = vsub.f32 %v183_v12, %v196_v34 }
 0x15a   :  { %v202_v33 = vpop.xlane.xlu1 %201 }
 0x15b   :  { %v212_v35 = vmul.f32 %v194_v32, %v194_v32  ;;  %v209_v36 = vmul.f32 0.0625, %v202_v33  ;;  %v218_v51 = vsub.f32 %v181_v16, %v194_v32 }
 0x15c   :  { %v189_v37 = vpop.xlane.xlu0 %188 }
 0x15d   :  { %v215_v38 = vsub.f32 %v209_v36, %v212_v35  ;;  %v195_v39 = vmul.f32 0.0625, %v189_v37 }
 0x15e   :  { %v208_v40 = vpop.xlane.xlu1 %207 }
 0x15f   :  { %v221_v42 = vadd.f32 1e-05, %v215_v38  ;;  %v211_v43 = vmul.f32 0.0625, %v208_v40  ;;  %v213_v45 = vmul.f32 %v195_v39, %v195_v39  ;;  %v219_v60 = vsub.f32 %v182_v23, %v195_v39 }
 0x160   :  { %v205_v44 = vpop.xlane.xlu0 %204 }
 0x161   :  { %294 = vrsqrt.f32 %v221_v42  ;;  %v217_v46 = vsub.f32 %v211_v43, %v214_v41  ;;  %v210_v47 = vmul.f32 0.0625, %v205_v44 }
 0x163   :  { %v223_v48 = vadd.f32 1e-05, %v217_v46  ;;  %v216_v49 = vsub.f32 %v210_v47, %v213_v45 }
 0x165   :  { %296 = vrsqrt.f32 %v223_v48  ;;  %v222_v50 = vadd.f32 1e-05, %v216_v49 }
 0x167   :  { %298 = vrsqrt.f32 %v222_v50 }
 0x16e   :  { %v295_v52 = vpop.eup %294 }
 0x16f   :  { %v227_v54 = vmul.f32 %v295_v52, %v218_v51 }
 0x171   :  { %v237_v57 = vmul.f32 %v268_v53, %v227_v54 }
 0x172   :  { %v297_v58 = vpop.eup %296 }
 0x173   :  { %v247_v59 = vadd.f32 %v269_v55, %v237_v57  ;;  %v229_v61 = vmul.f32 %v297_v58, %v220_v56 }
 0x174   :  { %v299_v62 = vpop.eup %298 }
 0x175   :  { %250 = vst.msk [vmem:[%s396_s7] sm:$0xff] %vm51_vm0, %v247_v59  ;;  %v239_v63 = vmul.f32 %v268_v53, %v229_v61  ;;  %v228_v0 = vmul.f32 %v299_v62, %v219_v60 }
 0x177   :  { %v249_v1 = vadd.f32 %v269_v55, %v239_v63  ;;  %v238_v2 = vmul.f32 %v268_v53, %v228_v0 }
 0x179   :  { %252 = vst.msk [vmem:[%s396_s7 + $0x10] sm:$0xff] %vm51_vm0, %v249_v1  ;;  %v248_v3 = vadd.f32 %v269_v55, %v238_v2 }
 0x17b   :  { %251 = vst.msk [vmem:[%s396_s7 + $0x8] sm:$0xff] %vm51_vm0, %v248_v3 }

// kernel: encoder_attn_forward.5
= control target key start
LH: loop header
LB: loop body
LE: loop exit
PB: predicated region body
PF: predicated region fallthrough
CT: control target
= control target key end

     0   :  { %v614_v1 = vmov 0.0   ;;  %vm615_vm0 = vmmov 0   ;;  %vm46_vm1 = vcmask 130048   ;;  %s749_s0 = inlined_call_operand.vmem [shape: f32[2,8,16], index: 0, kind: input, shape index: {}, may-alias: {0,1}]   ;;  %s750_s1 = inlined_call_operand.vmem [shape: f32[2,8,16], index: 1, kind: input, shape index: {}, may-alias: {0,1}]   ;;  %s751_s2 = inlined_call_operand.vmem [shape: bf16[16,16], index: 2, kind: input, shape index: {}]   ;;  %s752_s3 = inlined_call_operand.vmem [shape: bf16[16,16], index: 3, kind: input, shape index: {}]   ;;  %s753_s4 = inlined_call_operand.vmem [shape: bf16[16,16], index: 4, kind: input, shape index: {}]   ;;  %s754_s5 = inlined_call_operand.vmem [shape: f32[1,16], index: 5, kind: input, shape index: {}]   ;;  %s755_s6 = inlined_call_operand.vmem [shape: f32[1,16], index: 6, kind: input, shape index: {}]   ;;  %s756_s7 = inlined_call_operand.vmem [shape: f32[1,16], index: 7, kind: input, shape index: {}]   ;;  %s757_s8 = inlined_call_operand.hbm [shape: f32[2,8,16], index: 8, kind: output, shape index: {}]  }
   0x1   :  { %v569_v0 = vld [vmem:[%s751_s2] sm:$0xff]   ;;  %522 = vmatprep.subr.bf16.mxu0 %v614_v1  ;;  %v676_v3 = vld [vmem:[%s749_s0 + $0x8] sm:$0xff]  ;;  %528 = vmatprep.subr.bf16.mxu1 %v614_v1 }
   0x2   :  { %v671_v2 = vld [vmem:[%s749_s0] sm:$0xff]  ;;  %523 = vmatpush3.bf16.msra.mxu0 %v569_v0  ;;  %524 = vmatprep.mubr.msk.bf16.mxu0 %vm615_vm0, %v614_v1  ;;  %v35_v7 = vld [vmem:[%s750_s1 + $0x8] sm:$0xff] }
   0x3   :  { %v34_v4 = vld [vmem:[%s750_s1] sm:$0xff]  ;;  %v686_v5 = vpack.c.bf16 %v676_v3, %v671_v2  ;;  %534 = vmatprep.subr.bf16.mxu0 %v614_v1  ;;  %v37_v8 = vpack.c.bf16 %v35_v7, %v35_v7  ;;  %530 = vmatprep.mubr.msk.bf16.mxu1 %vm615_vm0, %v614_v1 }
   0x4   :  { %v36_v6 = vpack.c.bf16 %v34_v4, %v34_v4 }
   0x5   :  { %13 = vsyncpa [#allocation3], 0  ;;  %525 = vmatmul.mubr.msk.bf16.vlgmr.msra.gmra.mxu0 %vm46_vm1, %v686_v5  ;;  %v143_v10 = vsel %vm46_vm1, %v37_v8, 0  ;;  %vm185_vm2 = vcmask 64512   ;;  %vm213_vm3 = vcmask 1043456   ;;  %v571_v43 = vld [vmem:[%s753_s4] sm:$0xff]  }
   0x6   :  { %v97_v9 = vsel %vm46_vm1, %v36_v6, 0  ;;  %535 = vmatpush3.bf16.xpose.msra.mxu0 %v143_v10  ;;  %536 = vmatprep.mubr.msk.bf16.mxu0 %vm615_vm0, %v614_v1  ;;  %v214_v37 = vsel %vm213_vm3, %v36_v6, 0  ;;  %v259_v38 = vsel %vm213_vm3, %v37_v8, 0  ;;  %v570_v47 = vld [vmem:[%s752_s3] sm:$0xff]  }
   0x7   :  { %529 = vmatpush3.bf16.xpose.msra.mxu1 %v97_v9  ;;  %546 = vmatprep.subr.bf16.mxu0 %v614_v1  ;;  %v503_v63 = vld [vmem:[%s754_s5] ss:$0 sm:$0xff] }
   0x8   :  { %540 = vmatprep.subr.bf16.mxu1 %v614_v1 }
  0xc5   :  { %v84_v11 = vpop.f32.mrf.mxu0 }
  0xc6   :  { %v91_v12 = vpack.c.bf16 %v84_v11, %v84_v11 }
  0xc7   :  { %v526_v13 = vpop.f32.mrf.mxu0 }
  0xc8   :  { %531 = vmatmul.mubr.msk.bf16.vlgmr.msra.gmra.mxu1 %vm46_vm1, %v91_v12 }
  0xc9   :  { %v87_v14 = vpop.f32.mrf.mxu0  ;;  %542 = vmatprep.mubr.msk.bf16.mxu1 %vm615_vm0, %v614_v1  ;;  %541 = vmatpush3.bf16.msra.mxu1 %v214_v37 }
  0xca   :  { %v92_v15 = vpack.c.bf16 %v87_v14, %v87_v14  ;;  %552 = vmatprep.subr.bf16.mxu1 %v614_v1 }
  0xcb   :  { %v527_v16 = vpop.f32.mrf.mxu0 }
  0xcc   :  { %537 = vmatmul.mubr.msk.bf16.vlgmr.msra.gmra.mxu0 %vm46_vm1, %v92_v15 }
  0xcd   :  { %548 = vmatprep.mubr.msk.bf16.mxu0 %vm615_vm0, %v614_v1  ;;  %547 = vmatpush3.bf16.msra.mxu0 %v259_v38 }
  0xce   :  { %558 = vmatprep.subr.bf16.mxu0 %v614_v1 }
 0x188   :  { %v133_v17 = vpop.f32.mrf.mxu1 }
 0x189   :  { %v186_v18 = vsel %vm185_vm2, %v133_v17, -inf }
 0x18a   :  { %187 = vmax.xlane.f32.xlu0 %v186_v18  ;;  %v532_v19 = vpop.f32.mrf.mxu1 }
 0x18c   :  { %v136_v20 = vpop.f32.mrf.mxu1  ;;  %v179_v21 = vpop.f32.mrf.mxu0 }
 0x18d   :  { %v189_v22 = vsel %vm185_vm2, %v179_v21, -inf }
 0x18e   :  { %v533_v23 = vpop.f32.mrf.mxu1  ;;  %190 = vmax.xlane.f32.xlu0 %v189_v22  ;;  %v538_v24 = vpop.f32.mrf.mxu0 }
 0x190   :  { %v182_v25 = vpop.f32.mrf.mxu0 }
 0x192   :  { %v539_v26 = vpop.f32.mrf.mxu0 }
 0x213   :  { %v188_v27 = vpop.xlane.xlu0 %187 }
 0x214   :  { %v192_v28 = vsub.f32 %v133_v17, %v188_v27 }
 0x216   :  { %v194_v29 = vmul.f32 1.442695, %v192_v28 }
 0x217   :  { %v191_v30 = vpop.xlane.xlu0 %190 }
 0x218   :  { %572 = vpow2.f32 %v194_v29  ;;  %v193_v31 = vsub.f32 %v179_v21, %v191_v30 }
 0x21a   :  { %v196_v32 = vmul.f32 1.442695, %v193_v31  ;;  %v504_v31 = vld [vmem:[%s755_s6] ss:$0 sm:$0xff]  ;;  %s616_s6 = smov [#allocation2]  }
 0x21c   :  { %574 = vpow2.f32 %v196_v32 }
 0x225   :  { %v573_v33 = vpop.eup %572 }
 0x226   :  { %v198_v34 = vsel %vm185_vm2, %v573_v33, 0.0 }
 0x227   :  { %199 = vadd.xlane.f32.xlu1 %v198_v34 }
 0x229   :  { %v575_v35 = vpop.eup %574 }
 0x22a   :  { %v201_v36 = vsel %vm185_vm2, %v575_v35, 0.0 }
 0x22b   :  { %202 = vadd.xlane.f32.xlu1 %v201_v36 }
 0x2b0   :  { %v200_v39 = vpop.xlane.xlu1 %199 }
 0x2b1   :  { %576 = vrcp.f32 %v200_v39 }
 0x2b4   :  { %v203_v40 = vpop.xlane.xlu1 %202 }
 0x2b5   :  { %578 = vrcp.f32 %v203_v40 }
 0x2be   :  { %v577_v41 = vpop.eup %576 }
 0x2bf   :  { %v206_v42 = vmul.f32 %v577_v41, %v573_v33  ;;  %v505_v33 = vld [vmem:[%s756_s7] ss:$0 sm:$0xff]  ;;  %s482_s7 = sshll.u32 %s616_s6, 4  ;;  %s483_s7 = int_to_ptr.vmem [resolvable:$true] %s482_s7 }
 0x2c0   :  { %s592_s19 = scalar_lea.vmem %s483_s7, 256  ;;  %p597_p1 = scmp.lt.s32.totalorder %s483_s7, %s483_s7 }
 0x2c1   :  { %v208_v44 = vpack.c.bf16 %v206_v42, %v206_v42  ;;  %p593_p0 = scmp.ne.s32.totalorder %s483_s7, %s592_s19  ;;  %p598_p2 = scmp.lt.s32.totalorder %s592_s19, %s592_s19 }
 0x2c2   :  { %v579_v45 = vpop.eup %578 }
 0x2c3   :  { %543 = vmatmul.mubr.msk.bf16.vlgmr.msra.gmra.mxu1 %vm185_vm2, %v208_v44  ;;  %v207_v46 = vmul.f32 %v579_v45, %v575_v35  ;;  %p599_p3 = por %p598_p2, %p597_p1 }
 0x2c4   :  { %553 = vmatpush3.bf16.msra.mxu1 %v571_v43  ;;  %554 = vmatprep.mubr.msk.bf16.mxu1 %vm615_vm0, %v614_v1 }
 0x2c5   :  { %v209_v48 = vpack.c.bf16 %v207_v46, %v207_v46  ;;  %p600_p4 = pnand %p599_p3, %p593_p0 }
 0x2c7   :  { %549 = vmatmul.mubr.msk.bf16.vlgmr.msra.gmra.mxu0 %vm185_vm2, %v209_v48 }
 0x2c8   :  { %559 = vmatpush3.bf16.msra.mxu0 %v570_v47  ;;  %560 = vmatprep.mubr.msk.bf16.mxu0 %vm615_vm0, %v614_v1 }
 0x2cf   :  { %561 = vmatmul.mubr.msk.bf16.vlgmr.msra.gmra.mxu0 %vm46_vm1, %v686_v5 }
 0x383   :  { %v250_v49 = vpop.f32.mrf.mxu1 }
 0x385   :  { %v544_v50 = vpop.f32.mrf.mxu1 }
 0x387   :  { %v253_v51 = vpop.f32.mrf.mxu1  ;;  %v295_v52 = vpop.f32.mrf.mxu0 }
 0x388   :  { %v303_v53 = vpack.c.bf16 %v295_v52, %v250_v49 }
 0x389   :  { %v545_v54 = vpop.f32.mrf.mxu1  ;;  %v550_v55 = vpop.f32.mrf.mxu0 }
 0x38a   :  { %555 = vmatmul.mubr.msk.bf16.vlgmr.msra.gmra.mxu1 %vm46_vm1, %v303_v53 }
 0x38b   :  { %v298_v56 = vpop.f32.mrf.mxu0 }
 0x38d   :  { %v551_v57 = vpop.f32.mrf.mxu0 }
 0x38f   :  { %v396_v58 = vpop.f32.mrf.mxu0 }
 0x391   :  { %v562_v59 = vpop.f32.mrf.mxu0 }
 0x393   :  { %v399_v60 = vpop.f32.mrf.mxu0 }
 0x395   :  { %v563_v61 = vpop.f32.mrf.mxu0 }
 0x44a   :  { %v349_v62 = vpop.f32.mrf.mxu1 }
 0x44b   :  { %v397_v0 = vadd.f32 %v396_v58, %v349_v62 }
 0x44c   :  { %v556_v1 = vpop.f32.mrf.mxu1 }
 0x44d   :  { %v410_v4 = vadd.f32 %v503_v63, %v397_v0 }
 0x44e   :  { %v352_v5 = vpop.f32.mrf.mxu1 }
 0x44f   :  { %v400_v6 = vadd.f32 %v399_v60, %v352_v5  ;;  %v412_v7 = vsel %vm46_vm1, %v410_v4, 0.0  ;;  %v421_v8 = vmul.f32 %v410_v4, %v410_v4 }
 0x450   :  { %v557_v9 = vpop.f32.mrf.mxu1  ;;  %413 = vadd.xlane.f32.xlu0 %v412_v7 }
 0x451   :  { %v411_v10 = vadd.f32 %v503_v63, %v400_v6  ;;  %v423_v11 = vsel %vm46_vm1, %v421_v8, 0.0 }
 0x453   :  { %v415_v12 = vsel %vm46_vm1, %v411_v10, 0.0  ;;  %v422_v13 = vmul.f32 %v411_v10, %v411_v10 }
 0x454   :  { %424 = vadd.xlane.f32.xlu0 %v423_v11  ;;  %416 = vadd.xlane.f32.xlu1 %v415_v12 }
 0x455   :  { %v426_v14 = vsel %vm46_vm1, %v422_v13, 0.0 }
 0x458   :  { %427 = vadd.xlane.f32.xlu1 %v426_v14 }
 0x4d9   :  { %v414_v15 = vpop.xlane.xlu0 %413 }
 0x4da   :  { %v419_v16 = vmul.f32 0.0625, %v414_v15 }
 0x4dc   :  { %v431_v19 = vmul.f32 %v419_v16, %v419_v16  ;;  %v435_v29 = vsub.f32 %v410_v4, %v419_v16 }
 0x4dd   :  { %v425_v17 = vpop.xlane.xlu0 %424  ;;  %v417_v18 = vpop.xlane.xlu1 %416 }
 0x4de   :  { %v429_v20 = vmul.f32 0.0625, %v425_v17  ;;  %v420_v21 = vmul.f32 0.0625, %v417_v18 }
 0x4e0   :  { %v433_v22 = vsub.f32 %v429_v20, %v431_v19  ;;  %v432_v25 = vmul.f32 %v420_v21, %v420_v21  ;;  %v436_v35 = vsub.f32 %v411_v10, %v420_v21 }
 0x4e1   :  { %v428_v23 = vpop.xlane.xlu1 %427 }
 0x4e2   :  { %v437_v24 = vadd.f32 1e-05, %v433_v22  ;;  %v430_v26 = vmul.f32 0.0625, %v428_v23 }
 0x4e4   :  { %580 = vrsqrt.f32 %v437_v24  ;;  %v434_v27 = vsub.f32 %v430_v26, %v432_v25 }
 0x4e6   :  { %v438_v28 = vadd.f32 1e-05, %v434_v27 }
 0x4e8   :  { %582 = vrsqrt.f32 %v438_v28 }
 0x4f1   :  { %v581_v30 = vpop.eup %580 }
 0x4f2   :  { %v441_v32 = vmul.f32 %v581_v30, %v435_v29 }
 0x4f4   :  { %v450_v34 = vmul.f32 %v504_v31, %v441_v32 }
 0x4f5   :  { %v583_v36 = vpop.eup %582 }
 0x4f6   :  { %v459_v37 = vadd.f32 %v505_v33, %v450_v34  ;;  %v442_v38 = vmul.f32 %v583_v36, %v436_v35 }
 0x4f8   :  { %v506_v39 = vmul.f32 -1.442695, %v459_v37  ;;  %v451_v40 = vmul.f32 %v504_v31, %v442_v38 }
 0x4fa   :  { %584 = vpow2.f32 %v506_v39  ;;  %v460_v41 = vadd.f32 %v505_v33, %v451_v40 }
 0x4fc   :  { %v507_v42 = vmul.f32 -1.442695, %v460_v41 }
 0x4fe   :  { %586 = vpow2.f32 %v507_v42 }
 0x507   :  { %v585_v43 = vpop.eup %584 }
 0x508   :  { %v467_v44 = vadd.f32 1.0, %v585_v43 }
 0x50a   :  { %588 = vrcp.f32 %v467_v44 }
 0x50b   :  { %v587_v45 = vpop.eup %586 }
 0x50c   :  { %v468_v46 = vadd.f32 1.0, %v587_v45 }
 0x50e   :  { %590 = vrcp.f32 %v468_v46 }
 0x517   :  { %v589_v47 = vpop.eup %588 }
 0x518   :  { %v473_v48 = vmul.f32 %v589_v47, %v671_v2 }
 0x51a   :  { %475 = vst.msk [vmem:[#allocation2] sm:$0xff] %vm46_vm1, %v473_v48 }
 0x51b   :  { %v591_v49 = vpop.eup %590 }
 0x51c   :  { %v474_v50 = vmul.f32 %v591_v49, %v676_v3 }
 0x51e   :  { %476 = vst.msk [vmem:[#allocation2 + $0x8] sm:$0xff] %vm46_vm1, %v474_v50 }
 0x51f   :  { %603 = shalt.err (!%p600_p4)
}
 0x520   :  { %s617_s20 = smov 128   ;;  %s618_s21 = smov 8  }
 0x521   :  { %488 = dma.vmem_to_hbm [thread:$0]  %s483_s7, 256, %s757_s8, [#allocation3], %s617_s20, %s617_s20, %s618_s21  }
 0x522   :  { %612 = dma.done.wait [#allocation3], 256  }
 0x523   :  { %613 = vsyncadd [#allocation3], 4294967040 }
 0x524   :  { %492 = vsyncpa [#allocation3], 1 }

// kernel: encoder_attn_forward.3
= control target key start
LH: loop header
LB: loop body
LE: loop exit
PB: predicated region body
PF: predicated region fallthrough
CT: control target
= control target key end

     0   :  { %vm62_vm0 = vcmask 122880   ;;  %v2369_v0 = vmov 0.0   ;;  %v2370_v2 = vmov 0   ;;  %vm2371_vm1 = vmmov 0   ;;  %s2372_s25 = smov 16   ;;  %s2373_s30 = smov 96   ;;  %s2814_s2 = inlined_call_operand.vmem [shape: bf16[2,16,64], index: 2, kind: input, shape index: {}, may-alias: {2,3}]   ;;  %s2815_s3 = inlined_call_operand.vmem [shape: bf16[2,16,64], index: 3, kind: input, shape index: {}, may-alias: {2,3}]   ;;  %s2816_s0 = inlined_call_operand.vmem [shape: bf16[2,8,2,64], index: 0, kind: input, shape index: {}, may-alias: {0,1}]   ;;  %s2817_s1 = inlined_call_operand.vmem [shape: bf16[2,8,2,64], index: 1, kind: input, shape index: {}, may-alias: {0,1}]   ;;  %s2818_s4 = inlined_call_operand.vmem [shape: bf16[8,2,16], index: 4, kind: output, shape index: {0}]   ;;  %s2819_s5 = inlined_call_operand.vmem [shape: bf16[8,2,16], index: 5, kind: output, shape index: {1}]   ;;  %s2820_s6 = inlined_call_operand.vmem [shape: f32[2,2,16], index: 6, kind: output, shape index: {2}]  }
   0x1   :  { %2131 = vmatprep.subr.bf16.mxu0 %v2369_v0  ;;  %2137 = vmatprep.subr.bf16.mxu1 %v2369_v0  ;;  %v2419_v1 = vld [vmem:[%s2814_s2] sm:$0xff]   ;;  %63 = vst.msk [vmem:[#allocation2] sm:$0x1] %vm62_vm0, %v2370_v2  ;;  %66 = vst.msk [vmem:[#allocation4] sm:$0x1] %vm62_vm0, %v2370_v2  ;;  %v2426_v3 = vld [vmem:[%s2815_s3 + $0x8] sm:$0xff]   ;;  %v258_v48 = vlaneseq }
   0x2   :  { %2133 = vmatprep.mubr.msk.bf16.mxu0 %vm2371_vm1, %v2369_v0  ;;  %2139 = vmatprep.mubr.msk.bf16.mxu1 %vm2371_vm1, %v2369_v0  ;;  %vm64_vm2 = vcmask 123904   ;;  %vm81_vm3 = vcmask 130048   ;;  %v72_v8 = vld [vmem:[%s2816_s0] sm:$0x1]  ;;  %v2021_v9 = vld [vmem:[%s2817_s1 + $0xf] sm:$0x1] }
   0x3   :  { %2132 = vmatpush3.bf16.msra.mxu0 %v2419_v1  ;;  %65 = vst.msk [vmem:[#allocation3] sm:$0x3] %vm64_vm2, %v2369_v0  ;;  %67 = vst.msk [vmem:[#allocation5] sm:$0x3] %vm64_vm2, %v2369_v0  ;;  %2138 = vmatpush3.bf16.msra.mxu1 %v2426_v3  ;;  %v73_v10 = vunpack.c.l.bf16 %v72_v8  ;;  %v128_v11 = vunpack.c.l.bf16 %v2021_v9  ;;  %s2374_s7 = smov 32   ;;  %v259_v50 = vshrl.u32 %v258_v48, 7 }
   0x4   :  { %2143 = vmatprep.subr.bf16.mxu0 %v2369_v0  ;;  %2149 = vmatprep.subr.bf16.mxu1 %v2369_v0  ;;  %v2375_v46 = vmov 1966171168   ;;  %v2376_v51 = vmov 1983009808   ;;  %s2377_s8 = smov 80   ;;  %s2378_s9 = smov 112  }
   0x5   :  { %v256_v47 = vunpack.c.l.s4 %v2375_v46  ;;  %v276_v52 = vunpack.c.l.s4 %v2376_v51 }
   0x7   :  { %v257_v49 = vunpack.c.0.s8 %v256_v47  ;;  %v277_v56 = vunpack.c.0.s8 %v276_v52 }
   0x8   :  { %v74_v4 = vld [vmem:[#allocation2] sm:$0x1]  ;;  %v129_v5 = vld [vmem:[#allocation4] sm:$0x1] }
   0x9   :  { %2134 = vmatmul.mubr.msk.bf16.vlgmr.msra.gmra.mxu0 %vm81_vm3, %v74_v4  ;;  %2140 = vmatmul.mubr.msk.bf16.vlgmr.msra.gmra.mxu1 %vm81_vm3, %v129_v5  ;;  %v2464_v54 = vsub.s32 %v257_v49, %v259_v50  ;;  %v2467_v61 = vsub.s32 %v277_v56, %v259_v50 }
   0xa   :  { %v2025_v6 = vld.sshfl [vmem:[#allocation3] sm:$0x3 pattern:$0x76325410]  ;;  %2144 = vmatpush3.bf16.msra.mxu0 %v2419_v1  ;;  %2150 = vmatpush3.bf16.msra.mxu1 %v2426_v3 }
   0xb   :  { %196 = vrot.lane.b32.xlu1 %v2025_v6, %s2372_s25  ;;  %2145 = vmatprep.mubr.msk.bf16.mxu0 %vm2371_vm1, %v2369_v0  ;;  %v2027_v7 = vld.sshfl [vmem:[#allocation5] sm:$0x3 pattern:$0x76325410] }
   0xc   :  { %2151 = vmatprep.mubr.msk.bf16.mxu1 %vm2371_vm1, %v2369_v0  ;;  %2155 = vmatprep.subr.bf16.mxu0 %v2369_v0 }
   0xd   :  { %2161 = vmatprep.subr.bf16.mxu1 %v2369_v0 }
   0xf   :  { %232 = vrot.lane.b32.xlu1 %v2027_v7, %s2372_s25 }
  0x7d   :  { %v197_v36 = vpop.permute.xlu1 %196 }
  0x81   :  { %v233_v38 = vpop.permute.xlu1 %232 }
  0xc9   :  { %v119_v12 = vpop.f32.mrf.mxu0  ;;  %v173_v13 = vpop.f32.mrf.mxu1 }
  0xca   :  { %v125_v14 = vadd.f32 %v119_v12, %v73_v10  ;;  %v179_v15 = vadd.f32 %v173_v13, %v128_v11  ;;  %v2029_v13 = vld [vmem:[%s2816_s0 + $0x1] sm:$0x1] }
  0xcb   :  { %v2135_v16 = vpop.f32.mrf.mxu0  ;;  %v2141_v17 = vpop.f32.mrf.mxu1 }
  0xcc   :  { %2239 = vtanh.f32 %v125_v14  ;;  %v2024_v24 = vmul.f32 -1.442695, %v125_v14  ;;  %v2026_v25 = vmul.f32 -1.442695, %v179_v15  ;;  %v323_v14 = vunpack.c.l.bf16 %v2029_v13 }
  0xcd   :  { %v122_v18 = vpop.f32.mrf.mxu0  ;;  %v176_v19 = vpop.f32.mrf.mxu1  ;;  %2241 = vtanh.f32 %v179_v15  ;;  %v2031_v15 = vld [vmem:[%s2817_s1 + $0xe] sm:$0x1] }
  0xce   :  { %2243 = vpow2.f32 %v2024_v24  ;;  %v371_v18 = vunpack.c.l.bf16 %v2031_v15 }
  0xcf   :  { %v2136_v20 = vpop.f32.mrf.mxu0  ;;  %v2142_v21 = vpop.f32.mrf.mxu1  ;;  %2245 = vpow2.f32 %v2026_v25 }
  0xd9   :  { %v2240_v22 = vpop.eup %2239 }
  0xda   :  { %201 = vrot.lane.b32.xlu0 %v2240_v22, %s2373_s30  ;;  %v2242_v23 = vpop.eup %2241 }
  0xdb   :  { %v2244_v26 = vpop.eup %2243 }
  0xdc   :  { %v184_v27 = vadd.f32 1.0, %v2244_v26  ;;  %v2246_v28 = vpop.eup %2245 }
  0xdd   :  { %v220_v29 = vadd.f32 1.0, %v2246_v28 }
  0xde   :  { %237 = vrot.lane.b32.xlu0 %v2242_v23, %s2373_s30  ;;  %2247 = vrcp.f32 %v184_v27 }
  0xdf   :  { %2249 = vrcp.f32 %v220_v29 }
  0xeb   :  { %v2248_v30 = vpop.eup %2247 }
  0xec   :  { %v2250_v33 = vpop.eup %2249  ;;  %v199_v37 = vmul.f32 %v2248_v30, %v197_v36 }
  0xed   :  { %v235_v41 = vmul.f32 %v2250_v33, %v233_v38 }
 0x14c   :  { %v202_v31 = vpop.permute.xlu0 %201 }
 0x14d   :  { %v204_v32 = vmul.f32 %v2248_v30, %v202_v31 }
 0x14f   :  { %206 = vrot.lane.b32.xlu0 %v204_v32, %s2372_s25 }
 0x150   :  { %v238_v34 = vpop.permute.xlu0 %237 }
 0x151   :  { %v240_v35 = vmul.f32 %v2250_v33, %v238_v34 }
 0x153   :  { %242 = vrot.lane.b32.xlu1 %v240_v35, %s2372_s25 }
 0x1c1   :  { %v207_v39 = vpop.permute.xlu0 %206 }
 0x1c2   :  { %v209_v40 = vadd.f32 %v207_v39, %v199_v37 }
 0x1c4   :  { %2251 = vtanh.f32 %v209_v40  ;;  %v281_v4 = vrot.slane %v209_v40, %v2467_v61 }
 0x1c5   :  { %v243_v42 = vpop.permute.xlu1 %242 }
 0x1c6   :  { %v245_v43 = vadd.f32 %v243_v42, %v235_v41 }
 0x1c8   :  { %2253 = vtanh.f32 %v245_v43  ;;  %v313_v6 = vrot.slane %v245_v43, %v2467_v61 }
 0x1d1   :  { %v2252_v44 = vpop.eup %2251 }
 0x1d2   :  { %212 = vrot.lane.b32.xlu0 %v2252_v44, %s2374_s7 }
 0x1d5   :  { %v2254_v45 = vpop.eup %2253 }
 0x1d6   :  { %248 = vrot.lane.b32.xlu1 %v2254_v45, %s2374_s7 }
 0x244   :  { %v213_v53 = vpop.permute.xlu0 %212 }
 0x245   :  { %v215_v55 = vmul.f32 %v2248_v30, %v213_v53 }
 0x247   :  { %v252_v57 = vpack.c.bf16 %v215_v55, %v215_v55 }
 0x248   :  { %v249_v58 = vpop.permute.xlu1 %248 }
 0x249   :  { %v261_v59 = vrot.slane %v252_v57, %v2464_v54  ;;  %v251_v60 = vmul.f32 %v2250_v33, %v249_v58 }
 0x24b   :  { %v253_v62 = vpack.c.bf16 %v251_v60, %v251_v60  ;;  %v268_v63 = vrot.slane %v261_v59, %v2464_v54 }
 0x24d   :  { %v294_v2 = vrot.slane %v253_v62, %v2464_v54  ;;  %269 = vrot.lane.b32.xlu0 %v268_v63, %s2377_s8 }
 0x24f   :  { %v301_v5 = vrot.slane %v294_v2, %v2464_v54 }
 0x251   :  { %302 = vrot.lane.b32.xlu1 %v301_v5, %s2377_s8  ;;  %282 = vrot.lane.b32.xlu0 %v281_v4, %s2378_s9 }
 0x255   :  { %314 = vrot.lane.b32.xlu1 %v313_v6, %s2378_s9 }
 0x2bf   :  { %v270_v7 = vpop.permute.xlu0 %269 }
 0x2c0   :  { %273 = vst.msk [vmem:[#allocation2] sm:$0x1] %vm62_vm0, %v270_v7  ;;  %318 = vst.msk [vmem:[%s2818_s4] sm:$0x1] %vm62_vm0, %v270_v7 }
 0x2c3   :  { %v303_v8 = vpop.permute.xlu1 %302  ;;  %v283_v9 = vpop.permute.xlu0 %282 }
 0x2c4   :  { %305 = vst.msk [vmem:[#allocation4] sm:$0x1] %vm62_vm0, %v303_v8  ;;  %2028 = vst.msk [vmem:[%s2819_s5 + $0x7] sm:$0x1] %vm62_vm0, %v303_v8 }
 0x2c5   :  { %286 = vst.msk [vmem:[#allocation3] sm:$0x3] %vm64_vm2, %v283_v9 }
 0x2c7   :  { %v315_v10 = vpop.permute.xlu1 %314  ;;  %v324_v11 = vld [vmem:[#allocation2] sm:$0x1] }
 0x2c8   :  { %317 = vst.msk [vmem:[#allocation5] sm:$0x3] %vm64_vm2, %v315_v10  ;;  %2146 = vmatmul.mubr.msk.bf16.vlgmr.msra.gmra.mxu0 %vm81_vm3, %v324_v11 }
 0x2c9   :  { %2156 = vmatpush3.bf16.msra.mxu0 %v2419_v1  ;;  %2157 = vmatprep.mubr.msk.bf16.mxu0 %vm2371_vm1, %v2369_v0 }
 0x2ca   :  { %2167 = vmatprep.subr.bf16.mxu0 %v2369_v0 }
 0x2cb   :  { %v372_v12 = vld [vmem:[#allocation4] sm:$0x1] }
 0x2cc   :  { %2152 = vmatmul.mubr.msk.bf16.vlgmr.msra.gmra.mxu1 %vm81_vm3, %v372_v12  ;;  %v2034_v29 = vld.sshfl [vmem:[#allocation3] sm:$0x3 pattern:$0x76325410] }
 0x2cd   :  { %2162 = vmatpush3.bf16.msra.mxu1 %v2426_v3  ;;  %2163 = vmatprep.mubr.msk.bf16.mxu1 %vm2371_vm1, %v2369_v0  ;;  %v2039_v12 = vld [vmem:[%s2816_s0 + $0x2] sm:$0x1] }
 0x2ce   :  { %2173 = vmatprep.subr.bf16.mxu1 %v2369_v0  ;;  %v559_v13 = vunpack.c.l.bf16 %v2039_v12 }
 0x2cf   :  { %v2036_v30 = vld.sshfl [vmem:[#allocation5] sm:$0x3 pattern:$0x76325410] }
 0x388   :  { %v362_v16 = vpop.f32.mrf.mxu0 }
 0x389   :  { %v368_v17 = vadd.f32 %v362_v16, %v323_v14  ;;  %v2041_v14 = vld [vmem:[%s2817_s1 + $0xd] sm:$0x1] }
 0x38a   :  { %v2147_v19 = vpop.f32.mrf.mxu0 }
 0x38b   :  { %2255 = vtanh.f32 %v368_v17  ;;  %v2033_v31 = vmul.f32 -1.442695, %v368_v17  ;;  %v607_v17 = vunpack.c.l.bf16 %v2041_v14 }
 0x38c   :  { %v365_v20 = vpop.f32.mrf.mxu0  ;;  %v410_v21 = vpop.f32.mrf.mxu1 }
 0x38d   :  { %v416_v22 = vadd.f32 %v410_v21, %v371_v18 }
 0x38e   :  { %v2148_v23 = vpop.f32.mrf.mxu0  ;;  %v2153_v24 = vpop.f32.mrf.mxu1 }
 0x38f   :  { %2257 = vtanh.f32 %v416_v22  ;;  %v2035_v32 = vmul.f32 -1.442695, %v416_v22 }
 0x390   :  { %v413_v25 = vpop.f32.mrf.mxu1  ;;  %2259 = vpow2.f32 %v2033_v31 }
 0x391   :  { %2261 = vpow2.f32 %v2035_v32 }
 0x392   :  { %v2154_v26 = vpop.f32.mrf.mxu1 }
 0x398   :  { %v2256_v27 = vpop.eup %2255 }
 0x399   :  { %438 = vrot.lane.b32.xlu0 %v2256_v27, %s2373_s30 }
 0x39c   :  { %v2258_v28 = vpop.eup %2257 }
 0x39d   :  { %474 = vrot.lane.b32.xlu1 %v2258_v28, %s2373_s30  ;;  %433 = vrot.lane.b32.xlu0 %v2034_v29, %s2372_s25  ;;  %v2260_v33 = vpop.eup %2259 }
 0x39e   :  { %v421_v34 = vadd.f32 1.0, %v2260_v33  ;;  %v2262_v35 = vpop.eup %2261 }
 0x39f   :  { %v457_v36 = vadd.f32 1.0, %v2262_v35 }
 0x3a0   :  { %2263 = vrcp.f32 %v421_v34 }
 0x3a1   :  { %469 = vrot.lane.b32.xlu1 %v2036_v30, %s2372_s25  ;;  %2265 = vrcp.f32 %v457_v36 }
 0x3ad   :  { %v2264_v37 = vpop.eup %2263 }
 0x3ae   :  { %v2266_v40 = vpop.eup %2265 }
 0x40b   :  { %v439_v38 = vpop.permute.xlu0 %438 }
 0x40c   :  { %v441_v39 = vmul.f32 %v2264_v37, %v439_v38 }
 0x40e   :  { %443 = vrot.lane.b32.xlu0 %v441_v39, %s2372_s25 }
 0x40f   :  { %v475_v41 = vpop.permute.xlu1 %474  ;;  %v434_v43 = vpop.permute.xlu0 %433 }
 0x410   :  { %v477_v42 = vmul.f32 %v2266_v40, %v475_v41  ;;  %v436_v44 = vmul.f32 %v2264_v37, %v434_v43 }
 0x412   :  { %479 = vrot.lane.b32.xlu1 %v477_v42, %s2372_s25 }
 0x413   :  { %v470_v45 = vpop.permute.xlu1 %469 }
 0x414   :  { %v472_v48 = vmul.f32 %v2266_v40, %v470_v45 }
 0x480   :  { %v444_v46 = vpop.permute.xlu0 %443 }
 0x481   :  { %v446_v47 = vadd.f32 %v444_v46, %v436_v44 }
 0x483   :  { %2267 = vtanh.f32 %v446_v47  ;;  %v517_v2 = vrot.slane %v446_v47, %v2467_v61 }
 0x484   :  { %v480_v49 = vpop.permute.xlu1 %479 }
 0x485   :  { %v482_v50 = vadd.f32 %v480_v49, %v472_v48 }
 0x487   :  { %2269 = vtanh.f32 %v482_v50  ;;  %v548_v5 = vrot.slane %v482_v50, %v2467_v61 }
 0x490   :  { %v2268_v51 = vpop.eup %2267 }
 0x491   :  { %449 = vrot.lane.b32.xlu0 %v2268_v51, %s2374_s7 }
 0x494   :  { %v2270_v52 = vpop.eup %2269 }
 0x495   :  { %485 = vrot.lane.b32.xlu1 %v2270_v52, %s2374_s7 }
 0x503   :  { %v450_v53 = vpop.permute.xlu0 %449 }
 0x504   :  { %v452_v55 = vmul.f32 %v2264_v37, %v450_v53 }
 0x506   :  { %v489_v56 = vpack.c.bf16 %v452_v55, %v452_v55 }
 0x507   :  { %v486_v57 = vpop.permute.xlu1 %485 }
 0x508   :  { %v498_v58 = vrot.slane %v489_v56, %v2464_v54  ;;  %v488_v59 = vmul.f32 %v2266_v40, %v486_v57 }
 0x50a   :  { %v490_v60 = vpack.c.bf16 %v488_v59, %v488_v59  ;;  %v505_v62 = vrot.slane %v498_v58, %v2464_v54 }
 0x50c   :  { %v529_v63 = vrot.slane %v490_v60, %v2464_v54  ;;  %506 = vrot.lane.b32.xlu0 %v505_v62, %s2377_s8 }
 0x50e   :  { %v536_v4 = vrot.slane %v529_v63, %v2464_v54 }
 0x510   :  { %537 = vrot.lane.b32.xlu1 %v536_v4, %s2377_s8  ;;  %518 = vrot.lane.b32.xlu0 %v517_v2, %s2378_s9 }
 0x514   :  { %549 = vrot.lane.b32.xlu1 %v548_v5, %s2378_s9 }
 0x57e   :  { %v507_v6 = vpop.permute.xlu0 %506 }
 0x57f   :  { %509 = vst.msk [vmem:[#allocation2] sm:$0x1] %vm62_vm0, %v507_v6  ;;  %2037 = vst.msk [vmem:[%s2818_s4 + $0x1] sm:$0x1] %vm62_vm0, %v507_v6 }
 0x582   :  { %v538_v7 = vpop.permute.xlu1 %537  ;;  %v519_v8 = vpop.permute.xlu0 %518 }
 0x583   :  { %540 = vst.msk [vmem:[#allocation4] sm:$0x1] %vm62_vm0, %v538_v7  ;;  %2038 = vst.msk [vmem:[%s2819_s5 + $0x6] sm:$0x1] %vm62_vm0, %v538_v7 }
 0x584   :  { %521 = vst.msk [vmem:[#allocation3] sm:$0x3] %vm64_vm2, %v519_v8 }
 0x586   :  { %v550_v9 = vpop.permute.xlu1 %549  ;;  %v560_v10 = vld [vmem:[#allocation2] sm:$0x1] }
 0x587   :  { %552 = vst.msk [vmem:[#allocation5] sm:$0x3] %vm64_vm2, %v550_v9  ;;  %2158 = vmatmul.mubr.msk.bf16.vlgmr.msra.gmra.mxu0 %vm81_vm3, %v560_v10 }
 0x588   :  { %2168 = vmatpush3.bf16.msra.mxu0 %v2419_v1  ;;  %2169 = vmatprep.mubr.msk.bf16.mxu0 %vm2371_vm1, %v2369_v0 }
 0x589   :  { %2179 = vmatprep.subr.bf16.mxu0 %v2369_v0 }
 0x58a   :  { %v608_v11 = vld [vmem:[#allocation4] sm:$0x1] }
 0x58b   :  { %2164 = vmatmul.mubr.msk.bf16.vlgmr.msra.gmra.mxu1 %vm81_vm3, %v608_v11  ;;  %v2044_v28 = vld.sshfl [vmem:[#allocation3] sm:$0x3 pattern:$0x76325410]  ;;  %v2049_v11 = vld [vmem:[%s2816_s0 + $0x3] sm:$0x1] }
 0x58c   :  { %2174 = vmatpush3.bf16.msra.mxu1 %v2426_v3  ;;  %2175 = vmatprep.mubr.msk.bf16.mxu1 %vm2371_vm1, %v2369_v0  ;;  %v795_v12 = vunpack.c.l.bf16 %v2049_v11 }
 0x58d   :  { %2185 = vmatprep.subr.bf16.mxu1 %v2369_v0 }
 0x58e   :  { %v2046_v29 = vld.sshfl [vmem:[#allocation5] sm:$0x3 pattern:$0x76325410] }
 0x647   :  { %v598_v15 = vpop.f32.mrf.mxu0 }
 0x648   :  { %v604_v16 = vadd.f32 %v598_v15, %v559_v13  ;;  %v2051_v13 = vld [vmem:[%s2817_s1 + $0xc] sm:$0x1] }
 0x649   :  { %v2159_v18 = vpop.f32.mrf.mxu0 }
 0x64a   :  { %2271 = vtanh.f32 %v604_v16  ;;  %v2043_v30 = vmul.f32 -1.442695, %v604_v16  ;;  %v843_v16 = vunpack.c.l.bf16 %v2051_v13 }
 0x64b   :  { %v601_v19 = vpop.f32.mrf.mxu0  ;;  %v646_v20 = vpop.f32.mrf.mxu1 }
 0x64c   :  { %v652_v21 = vadd.f32 %v646_v20, %v607_v17 }
 0x64d   :  { %v2160_v22 = vpop.f32.mrf.mxu0  ;;  %v2165_v23 = vpop.f32.mrf.mxu1 }
 0x64e   :  { %2273 = vtanh.f32 %v652_v21  ;;  %v2045_v31 = vmul.f32 -1.442695, %v652_v21 }
 0x64f   :  { %v649_v24 = vpop.f32.mrf.mxu1  ;;  %2275 = vpow2.f32 %v2043_v30 }
 0x650   :  { %2277 = vpow2.f32 %v2045_v31 }
 0x651   :  { %v2166_v25 = vpop.f32.mrf.mxu1 }
 0x657   :  { %v2272_v26 = vpop.eup %2271 }
 0x658   :  { %674 = vrot.lane.b32.xlu0 %v2272_v26, %s2373_s30 }
 0x65b   :  { %v2274_v27 = vpop.eup %2273 }
 0x65c   :  { %710 = vrot.lane.b32.xlu1 %v2274_v27, %s2373_s30  ;;  %669 = vrot.lane.b32.xlu0 %v2044_v28, %s2372_s25  ;;  %v2276_v32 = vpop.eup %2275 }
 0x65d   :  { %v657_v33 = vadd.f32 1.0, %v2276_v32  ;;  %v2278_v34 = vpop.eup %2277 }
 0x65e   :  { %v693_v35 = vadd.f32 1.0, %v2278_v34 }
 0x65f   :  { %2279 = vrcp.f32 %v657_v33 }
 0x660   :  { %705 = vrot.lane.b32.xlu1 %v2046_v29, %s2372_s25  ;;  %2281 = vrcp.f32 %v693_v35 }
 0x66c   :  { %v2280_v36 = vpop.eup %2279 }
 0x66d   :  { %v2282_v39 = vpop.eup %2281 }
 0x6ca   :  { %v675_v37 = vpop.permute.xlu0 %674 }
 0x6cb   :  { %v677_v38 = vmul.f32 %v2280_v36, %v675_v37 }
 0x6cd   :  { %679 = vrot.lane.b32.xlu0 %v677_v38, %s2372_s25 }
 0x6ce   :  { %v711_v40 = vpop.permute.xlu1 %710  ;;  %v670_v42 = vpop.permute.xlu0 %669 }
 0x6cf   :  { %v713_v41 = vmul.f32 %v2282_v39, %v711_v40  ;;  %v672_v43 = vmul.f32 %v2280_v36, %v670_v42 }
 0x6d1   :  { %715 = vrot.lane.b32.xlu1 %v713_v41, %s2372_s25 }
 0x6d2   :  { %v706_v44 = vpop.permute.xlu1 %705 }
 0x6d3   :  { %v708_v47 = vmul.f32 %v2282_v39, %v706_v44 }
 0x73f   :  { %v680_v45 = vpop.permute.xlu0 %679 }
 0x740   :  { %v682_v46 = vadd.f32 %v680_v45, %v672_v43 }
 0x742   :  { %2283 = vtanh.f32 %v682_v46  ;;  %v753_v63 = vrot.slane %v682_v46, %v2467_v61 }
 0x743   :  { %v716_v48 = vpop.permute.xlu1 %715 }
 0x744   :  { %v718_v49 = vadd.f32 %v716_v48, %v708_v47 }
 0x746   :  { %2285 = vtanh.f32 %v718_v49  ;;  %v784_v4 = vrot.slane %v718_v49, %v2467_v61 }
 0x74f   :  { %v2284_v50 = vpop.eup %2283 }
 0x750   :  { %685 = vrot.lane.b32.xlu0 %v2284_v50, %s2374_s7 }
 0x753   :  { %v2286_v51 = vpop.eup %2285 }
 0x754   :  { %721 = vrot.lane.b32.xlu1 %v2286_v51, %s2374_s7 }
 0x7c2   :  { %v686_v52 = vpop.permute.xlu0 %685 }
 0x7c3   :  { %v688_v53 = vmul.f32 %v2280_v36, %v686_v52 }
 0x7c5   :  { %v725_v55 = vpack.c.bf16 %v688_v53, %v688_v53 }
 0x7c6   :  { %v722_v56 = vpop.permute.xlu1 %721 }
 0x7c7   :  { %v734_v57 = vrot.slane %v725_v55, %v2464_v54  ;;  %v724_v58 = vmul.f32 %v2282_v39, %v722_v56 }
 0x7c9   :  { %v726_v59 = vpack.c.bf16 %v724_v58, %v724_v58  ;;  %v741_v60 = vrot.slane %v734_v57, %v2464_v54 }
 0x7cb   :  { %v765_v62 = vrot.slane %v726_v59, %v2464_v54  ;;  %742 = vrot.lane.b32.xlu0 %v741_v60, %s2377_s8 }
 0x7cd   :  { %v772_v2 = vrot.slane %v765_v62, %v2464_v54 }
 0x7cf   :  { %773 = vrot.lane.b32.xlu1 %v772_v2, %s2377_s8  ;;  %754 = vrot.lane.b32.xlu0 %v753_v63, %s2378_s9 }
 0x7d3   :  { %785 = vrot.lane.b32.xlu1 %v784_v4, %s2378_s9 }
 0x83d   :  { %v743_v5 = vpop.permute.xlu0 %742 }
 0x83e   :  { %745 = vst.msk [vmem:[#allocation2] sm:$0x1] %vm62_vm0, %v743_v5  ;;  %2047 = vst.msk [vmem:[%s2818_s4 + $0x2] sm:$0x1] %vm62_vm0, %v743_v5 }
 0x841   :  { %v774_v6 = vpop.permute.xlu1 %773  ;;  %v755_v7 = vpop.permute.xlu0 %754 }
 0x842   :  { %776 = vst.msk [vmem:[#allocation4] sm:$0x1] %vm62_vm0, %v774_v6  ;;  %2048 = vst.msk [vmem:[%s2819_s5 + $0x5] sm:$0x1] %vm62_vm0, %v774_v6 }
 0x843   :  { %757 = vst.msk [vmem:[#allocation3] sm:$0x3] %vm64_vm2, %v755_v7 }
 0x845   :  { %v786_v8 = vpop.permute.xlu1 %785  ;;  %v796_v9 = vld [vmem:[#allocation2] sm:$0x1] }
 0x846   :  { %788 = vst.msk [vmem:[#allocation5] sm:$0x3] %vm64_vm2, %v786_v8  ;;  %2170 = vmatmul.mubr.msk.bf16.vlgmr.msra.gmra.mxu0 %vm81_vm3, %v796_v9 }
 0x847   :  { %2180 = vmatpush3.bf16.msra.mxu0 %v2419_v1  ;;  %2181 = vmatprep.mubr.msk.bf16.mxu0 %vm2371_vm1, %v2369_v0 }
 0x848   :  { %2191 = vmatprep.subr.bf16.mxu0 %v2369_v0 }
 0x849   :  { %v844_v10 = vld [vmem:[#allocation4] sm:$0x1] }
 0x84a   :  { %2176 = vmatmul.mubr.msk.bf16.vlgmr.msra.gmra.mxu1 %vm81_vm3, %v844_v10  ;;  %v2054_v27 = vld.sshfl [vmem:[#allocation3] sm:$0x3 pattern:$0x76325410]  ;;  %v2059_v10 = vld [vmem:[%s2816_s0 + $0x4] sm:$0x1] }
 0x84b   :  { %2186 = vmatpush3.bf16.msra.mxu1 %v2426_v3  ;;  %2187 = vmatprep.mubr.msk.bf16.mxu1 %vm2371_vm1, %v2369_v0  ;;  %v1031_v11 = vunpack.c.l.bf16 %v2059_v10  ;;  %v2071_v10 = vld [vmem:[%s2817_s1 + $0xa] sm:$0x1] }
 0x84c   :  { %2197 = vmatprep.subr.bf16.mxu1 %v2369_v0 }
 0x84d   :  { %v2056_v28 = vld.sshfl [vmem:[#allocation5] sm:$0x3 pattern:$0x76325410] }
 0x906   :  { %v834_v14 = vpop.f32.mrf.mxu0 }
 0x907   :  { %v840_v15 = vadd.f32 %v834_v14, %v795_v12  ;;  %v2061_v12 = vld [vmem:[%s2817_s1 + $0xb] sm:$0x1] }
 0x908   :  { %v2171_v17 = vpop.f32.mrf.mxu0 }
 0x909   :  { %2287 = vtanh.f32 %v840_v15  ;;  %v2053_v29 = vmul.f32 -1.442695, %v840_v15  ;;  %v1079_v15 = vunpack.c.l.bf16 %v2061_v12 }
 0x90a   :  { %v837_v18 = vpop.f32.mrf.mxu0  ;;  %v882_v19 = vpop.f32.mrf.mxu1 }
 0x90b   :  { %v888_v20 = vadd.f32 %v882_v19, %v843_v16 }
 0x90c   :  { %v2172_v21 = vpop.f32.mrf.mxu0  ;;  %v2177_v22 = vpop.f32.mrf.mxu1 }
 0x90d   :  { %2289 = vtanh.f32 %v888_v20  ;;  %v2055_v30 = vmul.f32 -1.442695, %v888_v20 }
 0x90e   :  { %v885_v23 = vpop.f32.mrf.mxu1  ;;  %2291 = vpow2.f32 %v2053_v29 }
 0x90f   :  { %2293 = vpow2.f32 %v2055_v30 }
 0x910   :  { %v2178_v24 = vpop.f32.mrf.mxu1 }
 0x916   :  { %v2288_v25 = vpop.eup %2287 }
 0x917   :  { %910 = vrot.lane.b32.xlu0 %v2288_v25, %s2373_s30 }
 0x91a   :  { %v2290_v26 = vpop.eup %2289 }
 0x91b   :  { %946 = vrot.lane.b32.xlu1 %v2290_v26, %s2373_s30  ;;  %905 = vrot.lane.b32.xlu0 %v2054_v27, %s2372_s25  ;;  %v2292_v31 = vpop.eup %2291 }
 0x91c   :  { %v893_v32 = vadd.f32 1.0, %v2292_v31  ;;  %v2294_v33 = vpop.eup %2293 }
 0x91d   :  { %v929_v34 = vadd.f32 1.0, %v2294_v33 }
 0x91e   :  { %2295 = vrcp.f32 %v893_v32 }
 0x91f   :  { %941 = vrot.lane.b32.xlu1 %v2056_v28, %s2372_s25  ;;  %2297 = vrcp.f32 %v929_v34 }
 0x92b   :  { %v2296_v35 = vpop.eup %2295 }
 0x92c   :  { %v2298_v38 = vpop.eup %2297 }
 0x989   :  { %v911_v36 = vpop.permute.xlu0 %910 }
 0x98a   :  { %v913_v37 = vmul.f32 %v2296_v35, %v911_v36 }
 0x98c   :  { %915 = vrot.lane.b32.xlu0 %v913_v37, %s2372_s25 }
 0x98d   :  { %v947_v39 = vpop.permute.xlu1 %946  ;;  %v906_v41 = vpop.permute.xlu0 %905 }
 0x98e   :  { %v949_v40 = vmul.f32 %v2298_v38, %v947_v39  ;;  %v908_v42 = vmul.f32 %v2296_v35, %v906_v41 }
 0x990   :  { %951 = vrot.lane.b32.xlu1 %v949_v40, %s2372_s25 }
 0x991   :  { %v942_v43 = vpop.permute.xlu1 %941 }
 0x992   :  { %v944_v46 = vmul.f32 %v2298_v38, %v942_v43 }
 0x9fe   :  { %v916_v44 = vpop.permute.xlu0 %915 }
 0x9ff   :  { %v918_v45 = vadd.f32 %v916_v44, %v908_v42 }
 0xa01   :  { %2299 = vtanh.f32 %v918_v45  ;;  %v989_v62 = vrot.slane %v918_v45, %v2467_v61 }
 0xa02   :  { %v952_v47 = vpop.permute.xlu1 %951 }
 0xa03   :  { %v954_v48 = vadd.f32 %v952_v47, %v944_v46 }
 0xa05   :  { %2301 = vtanh.f32 %v954_v48  ;;  %v1020_v2 = vrot.slane %v954_v48, %v2467_v61 }
 0xa0e   :  { %v2300_v49 = vpop.eup %2299 }
 0xa0f   :  { %921 = vrot.lane.b32.xlu0 %v2300_v49, %s2374_s7 }
 0xa12   :  { %v2302_v50 = vpop.eup %2301 }
 0xa13   :  { %957 = vrot.lane.b32.xlu1 %v2302_v50, %s2374_s7 }
 0xa81   :  { %v922_v51 = vpop.permute.xlu0 %921 }
 0xa82   :  { %v924_v52 = vmul.f32 %v2296_v35, %v922_v51 }
 0xa84   :  { %v961_v53 = vpack.c.bf16 %v924_v52, %v924_v52 }
 0xa85   :  { %v958_v55 = vpop.permute.xlu1 %957 }
 0xa86   :  { %v970_v56 = vrot.slane %v961_v53, %v2464_v54  ;;  %v960_v57 = vmul.f32 %v2298_v38, %v958_v55 }
 0xa88   :  { %v962_v58 = vpack.c.bf16 %v960_v57, %v960_v57  ;;  %v977_v59 = vrot.slane %v970_v56, %v2464_v54 }
 0xa8a   :  { %v1001_v60 = vrot.slane %v962_v58, %v2464_v54  ;;  %978 = vrot.lane.b32.xlu0 %v977_v59, %s2377_s8 }
 0xa8c   :  { %v1008_v63 = vrot.slane %v1001_v60, %v2464_v54 }
 0xa8e   :  { %1009 = vrot.lane.b32.xlu1 %v1008_v63, %s2377_s8  ;;  %990 = vrot.lane.b32.xlu0 %v989_v62, %s2378_s9 }
 0xa92   :  { %1021 = vrot.lane.b32.xlu1 %v1020_v2, %s2378_s9 }
 0xafc   :  { %v979_v4 = vpop.permute.xlu0 %978 }
 0xafd   :  { %981 = vst.msk [vmem:[#allocation2] sm:$0x1] %vm62_vm0, %v979_v4  ;;  %2057 = vst.msk [vmem:[%s2818_s4 + $0x3] sm:$0x1] %vm62_vm0, %v979_v4 }
 0xb00   :  { %v1010_v5 = vpop.permute.xlu1 %1009  ;;  %v991_v6 = vpop.permute.xlu0 %990 }
 0xb01   :  { %1012 = vst.msk [vmem:[#allocation4] sm:$0x1] %vm62_vm0, %v1010_v5  ;;  %2058 = vst.msk [vmem:[%s2819_s5 + $0x4] sm:$0x1] %vm62_vm0, %v1010_v5 }
 0xb02   :  { %993 = vst.msk [vmem:[#allocation3] sm:$0x3] %vm64_vm2, %v991_v6 }
 0xb04   :  { %v1022_v7 = vpop.permute.xlu1 %1021  ;;  %v1032_v8 = vld [vmem:[#allocation2] sm:$0x1] }
 0xb05   :  { %1024 = vst.msk [vmem:[#allocation5] sm:$0x3] %vm64_vm2, %v1022_v7  ;;  %2182 = vmatmul.mubr.msk.bf16.vlgmr.msra.gmra.mxu0 %vm81_vm3, %v1032_v8 }
 0xb06   :  { %2192 = vmatpush3.bf16.msra.mxu0 %v2419_v1  ;;  %2193 = vmatprep.mubr.msk.bf16.mxu0 %vm2371_vm1, %v2369_v0 }
 0xb07   :  { %2203 = vmatprep.subr.bf16.mxu0 %v2369_v0 }
 0xb08   :  { %v1080_v9 = vld [vmem:[#allocation4] sm:$0x1] }
 0xb09   :  { %2188 = vmatmul.mubr.msk.bf16.vlgmr.msra.gmra.mxu1 %vm81_vm3, %v1080_v9  ;;  %v2064_v26 = vld.sshfl [vmem:[#allocation3] sm:$0x3 pattern:$0x76325410]  ;;  %v2069_v9 = vld [vmem:[%s2816_s0 + $0x5] sm:$0x1] }
 0xb0a   :  { %2198 = vmatpush3.bf16.msra.mxu1 %v2426_v3  ;;  %2199 = vmatprep.mubr.msk.bf16.mxu1 %vm2371_vm1, %v2369_v0 }
 0xb0b   :  { %2209 = vmatprep.subr.bf16.mxu1 %v2369_v0 }
 0xb0c   :  { %v2066_v27 = vld.sshfl [vmem:[#allocation5] sm:$0x3 pattern:$0x76325410] }
 0xbc5   :  { %v1070_v13 = vpop.f32.mrf.mxu0 }
 0xbc6   :  { %v1076_v14 = vadd.f32 %v1070_v13, %v1031_v11  ;;  %v1315_v13 = vunpack.c.l.bf16 %v2071_v10 }
 0xbc7   :  { %v2183_v16 = vpop.f32.mrf.mxu0 }
 0xbc8   :  { %2303 = vtanh.f32 %v1076_v14  ;;  %v2063_v28 = vmul.f32 -1.442695, %v1076_v14 }
 0xbc9   :  { %v1073_v17 = vpop.f32.mrf.mxu0  ;;  %v1118_v18 = vpop.f32.mrf.mxu1 }
 0xbca   :  { %v1124_v19 = vadd.f32 %v1118_v18, %v1079_v15 }
 0xbcb   :  { %v2184_v20 = vpop.f32.mrf.mxu0  ;;  %v2189_v21 = vpop.f32.mrf.mxu1 }
 0xbcc   :  { %2305 = vtanh.f32 %v1124_v19  ;;  %v2065_v29 = vmul.f32 -1.442695, %v1124_v19 }
 0xbcd   :  { %v1121_v22 = vpop.f32.mrf.mxu1  ;;  %2307 = vpow2.f32 %v2063_v28 }
 0xbce   :  { %2309 = vpow2.f32 %v2065_v29 }
 0xbcf   :  { %v2190_v23 = vpop.f32.mrf.mxu1 }
 0xbd5   :  { %v2304_v24 = vpop.eup %2303 }
 0xbd6   :  { %1146 = vrot.lane.b32.xlu0 %v2304_v24, %s2373_s30 }
 0xbd9   :  { %v2306_v25 = vpop.eup %2305 }
 0xbda   :  { %1182 = vrot.lane.b32.xlu1 %v2306_v25, %s2373_s30  ;;  %1141 = vrot.lane.b32.xlu0 %v2064_v26, %s2372_s25  ;;  %v2308_v30 = vpop.eup %2307 }
 0xbdb   :  { %v1129_v31 = vadd.f32 1.0, %v2308_v30  ;;  %v2310_v32 = vpop.eup %2309 }
 0xbdc   :  { %v1165_v33 = vadd.f32 1.0, %v2310_v32 }
 0xbdd   :  { %2311 = vrcp.f32 %v1129_v31 }
 0xbde   :  { %1177 = vrot.lane.b32.xlu1 %v2066_v27, %s2372_s25  ;;  %2313 = vrcp.f32 %v1165_v33 }
 0xbea   :  { %v2312_v34 = vpop.eup %2311 }
 0xbeb   :  { %v2314_v37 = vpop.eup %2313 }
 0xc48   :  { %v1147_v35 = vpop.permute.xlu0 %1146 }
 0xc49   :  { %v1149_v36 = vmul.f32 %v2312_v34, %v1147_v35 }
 0xc4b   :  { %1151 = vrot.lane.b32.xlu0 %v1149_v36, %s2372_s25 }
 0xc4c   :  { %v1183_v38 = vpop.permute.xlu1 %1182  ;;  %v1142_v40 = vpop.permute.xlu0 %1141 }
 0xc4d   :  { %v1185_v39 = vmul.f32 %v2314_v37, %v1183_v38  ;;  %v1144_v41 = vmul.f32 %v2312_v34, %v1142_v40 }
 0xc4f   :  { %1187 = vrot.lane.b32.xlu1 %v1185_v39, %s2372_s25 }
 0xc50   :  { %v1178_v42 = vpop.permute.xlu1 %1177 }
 0xc51   :  { %v1180_v45 = vmul.f32 %v2314_v37, %v1178_v42 }
 0xcbd   :  { %v1152_v43 = vpop.permute.xlu0 %1151 }
 0xcbe   :  { %v1154_v44 = vadd.f32 %v1152_v43, %v1144_v41 }
 0xcc0   :  { %2315 = vtanh.f32 %v1154_v44  ;;  %v1225_v60 = vrot.slane %v1154_v44, %v2467_v61 }
 0xcc1   :  { %v1188_v46 = vpop.permute.xlu1 %1187 }
 0xcc2   :  { %v1190_v47 = vadd.f32 %v1188_v46, %v1180_v45 }
 0xcc4   :  { %2317 = vtanh.f32 %v1190_v47  ;;  %v1256_v63 = vrot.slane %v1190_v47, %v2467_v61 }
 0xccd   :  { %v2316_v48 = vpop.eup %2315 }
 0xcce   :  { %1157 = vrot.lane.b32.xlu0 %v2316_v48, %s2374_s7 }
 0xcd1   :  { %v2318_v49 = vpop.eup %2317 }
 0xcd2   :  { %1193 = vrot.lane.b32.xlu1 %v2318_v49, %s2374_s7 }
 0xd40   :  { %v1158_v50 = vpop.permute.xlu0 %1157 }
 0xd41   :  { %v1160_v51 = vmul.f32 %v2312_v34, %v1158_v50 }
 0xd43   :  { %v1197_v52 = vpack.c.bf16 %v1160_v51, %v1160_v51 }
 0xd44   :  { %v1194_v53 = vpop.permute.xlu1 %1193 }
 0xd45   :  { %v1206_v55 = vrot.slane %v1197_v52, %v2464_v54  ;;  %v1196_v56 = vmul.f32 %v2314_v37, %v1194_v53 }
 0xd47   :  { %v1198_v57 = vpack.c.bf16 %v1196_v56, %v1196_v56  ;;  %v1213_v58 = vrot.slane %v1206_v55, %v2464_v54 }
 0xd49   :  { %v1237_v59 = vrot.slane %v1198_v57, %v2464_v54  ;;  %1214 = vrot.lane.b32.xlu0 %v1213_v58, %s2377_s8 }
 0xd4b   :  { %v1244_v62 = vrot.slane %v1237_v59, %v2464_v54 }
 0xd4d   :  { %1245 = vrot.lane.b32.xlu1 %v1244_v62, %s2377_s8  ;;  %1226 = vrot.lane.b32.xlu0 %v1225_v60, %s2378_s9 }
 0xd51   :  { %1257 = vrot.lane.b32.xlu1 %v1256_v63, %s2378_s9 }
 0xdbb   :  { %v1215_v2 = vpop.permute.xlu0 %1214 }
 0xdbc   :  { %1217 = vst.msk [vmem:[#allocation2] sm:$0x1] %vm62_vm0, %v1215_v2  ;;  %2067 = vst.msk [vmem:[%s2818_s4 + $0x4] sm:$0x1] %vm62_vm0, %v1215_v2 }
 0xdbf   :  { %v1246_v4 = vpop.permute.xlu1 %1245  ;;  %v1227_v5 = vpop.permute.xlu0 %1226 }
 0xdc0   :  { %1248 = vst.msk [vmem:[#allocation4] sm:$0x1] %vm62_vm0, %v1246_v4  ;;  %2068 = vst.msk [vmem:[%s2819_s5 + $0x3] sm:$0x1] %vm62_vm0, %v1246_v4 }
 0xdc1   :  { %1229 = vst.msk [vmem:[#allocation3] sm:$0x3] %vm64_vm2, %v1227_v5  ;;  %v2367_v5 = vld [vmem:[%s2814_s2] sm:$0xff]  }
 0xdc3   :  { %v1258_v6 = vpop.permute.xlu1 %1257  ;;  %v1268_v7 = vld [vmem:[#allocation2] sm:$0x1] }
 0xdc4   :  { %1260 = vst.msk [vmem:[#allocation5] sm:$0x3] %vm64_vm2, %v1258_v6  ;;  %2194 = vmatmul.mubr.msk.bf16.vlgmr.msra.gmra.mxu0 %vm81_vm3, %v1268_v7  ;;  %v2368_v7 = vld [vmem:[%s2815_s3 + $0x8] sm:$0xff]  }
 0xdc5   :  { %2204 = vmatpush3.bf16.msra.mxu0 %v2419_v1  ;;  %2205 = vmatprep.mubr.msk.bf16.mxu0 %vm2371_vm1, %v2369_v0  ;;  %v1267_v1 = vunpack.c.l.bf16 %v2069_v9 }
 0xdc6   :  { %2215 = vmatprep.subr.bf16.mxu0 %v2369_v0 }
 0xdc7   :  { %v1316_v8 = vld [vmem:[#allocation4] sm:$0x1] }
 0xdc8   :  { %2200 = vmatmul.mubr.msk.bf16.vlgmr.msra.gmra.mxu1 %vm81_vm3, %v1316_v8  ;;  %v2074_v23 = vld.sshfl [vmem:[#allocation3] sm:$0x3 pattern:$0x76325410]  ;;  %v2079_v8 = vld [vmem:[%s2816_s0 + $0x6] sm:$0x1] }
 0xdc9   :  { %2210 = vmatpush3.bf16.msra.mxu1 %v2426_v3  ;;  %2211 = vmatprep.mubr.msk.bf16.mxu1 %vm2371_vm1, %v2369_v0  ;;  %v1503_v9 = vunpack.c.l.bf16 %v2079_v8 }
 0xdca   :  { %2221 = vmatprep.subr.bf16.mxu1 %v2369_v0 }
 0xdcb   :  { %v2076_v24 = vld.sshfl [vmem:[#allocation5] sm:$0x3 pattern:$0x76325410] }
 0xe84   :  { %v1306_v11 = vpop.f32.mrf.mxu0 }
 0xe85   :  { %v1312_v12 = vadd.f32 %v1306_v11, %v1267_v1  ;;  %v2081_v1 = vld [vmem:[%s2817_s1 + $0x9] sm:$0x1] }
 0xe86   :  { %v2195_v14 = vpop.f32.mrf.mxu0 }
 0xe87   :  { %2319 = vtanh.f32 %v1312_v12  ;;  %v2073_v25 = vmul.f32 -1.442695, %v1312_v12  ;;  %v1551_v12 = vunpack.c.l.bf16 %v2081_v1 }
 0xe88   :  { %v1309_v3 = vpop.f32.mrf.mxu0  ;;  %v1354_v15 = vpop.f32.mrf.mxu1 }
 0xe89   :  { %v1360_v16 = vadd.f32 %v1354_v15, %v1315_v13 }
 0xe8a   :  { %v2196_v17 = vpop.f32.mrf.mxu0  ;;  %v2201_v18 = vpop.f32.mrf.mxu1 }
 0xe8b   :  { %2321 = vtanh.f32 %v1360_v16  ;;  %v2075_v26 = vmul.f32 -1.442695, %v1360_v16 }
 0xe8c   :  { %v1357_v19 = vpop.f32.mrf.mxu1  ;;  %2323 = vpow2.f32 %v2073_v25 }
 0xe8d   :  { %2325 = vpow2.f32 %v2075_v26 }
 0xe8e   :  { %v2202_v20 = vpop.f32.mrf.mxu1 }
 0xe94   :  { %v2320_v21 = vpop.eup %2319 }
 0xe95   :  { %1382 = vrot.lane.b32.xlu0 %v2320_v21, %s2373_s30 }
 0xe98   :  { %v2322_v22 = vpop.eup %2321 }
 0xe99   :  { %1418 = vrot.lane.b32.xlu1 %v2322_v22, %s2373_s30  ;;  %1377 = vrot.lane.b32.xlu0 %v2074_v23, %s2372_s25  ;;  %v2324_v27 = vpop.eup %2323 }
 0xe9a   :  { %v1365_v28 = vadd.f32 1.0, %v2324_v27  ;;  %v2326_v29 = vpop.eup %2325 }
 0xe9b   :  { %v1401_v30 = vadd.f32 1.0, %v2326_v29 }
 0xe9c   :  { %2327 = vrcp.f32 %v1365_v28 }
 0xe9d   :  { %1413 = vrot.lane.b32.xlu1 %v2076_v24, %s2372_s25  ;;  %2329 = vrcp.f32 %v1401_v30 }
 0xea9   :  { %v2328_v31 = vpop.eup %2327 }
 0xeaa   :  { %v2330_v34 = vpop.eup %2329 }
 0xf07   :  { %v1383_v32 = vpop.permute.xlu0 %1382 }
 0xf08   :  { %v1385_v33 = vmul.f32 %v2328_v31, %v1383_v32 }
 0xf0a   :  { %1387 = vrot.lane.b32.xlu0 %v1385_v33, %s2372_s25 }
 0xf0b   :  { %v1419_v35 = vpop.permute.xlu1 %1418  ;;  %v1378_v37 = vpop.permute.xlu0 %1377 }
 0xf0c   :  { %v1421_v36 = vmul.f32 %v2330_v34, %v1419_v35  ;;  %v1380_v38 = vmul.f32 %v2328_v31, %v1378_v37 }
 0xf0e   :  { %1423 = vrot.lane.b32.xlu1 %v1421_v36, %s2372_s25 }
 0xf0f   :  { %v1414_v39 = vpop.permute.xlu1 %1413 }
 0xf10   :  { %v1416_v42 = vmul.f32 %v2330_v34, %v1414_v39 }
 0xf7c   :  { %v1388_v40 = vpop.permute.xlu0 %1387 }
 0xf7d   :  { %v1390_v41 = vadd.f32 %v1388_v40, %v1380_v38 }
 0xf7f   :  { %2331 = vtanh.f32 %v1390_v41  ;;  %v1461_v57 = vrot.slane %v1390_v41, %v2467_v61 }
 0xf80   :  { %v1424_v43 = vpop.permute.xlu1 %1423 }
 0xf81   :  { %v1426_v44 = vadd.f32 %v1424_v43, %v1416_v42 }
 0xf83   :  { %2333 = vtanh.f32 %v1426_v44  ;;  %v1492_v59 = vrot.slane %v1426_v44, %v2467_v61 }
 0xf8c   :  { %v2332_v45 = vpop.eup %2331 }
 0xf8d   :  { %1393 = vrot.lane.b32.xlu0 %v2332_v45, %s2374_s7 }
 0xf90   :  { %v2334_v46 = vpop.eup %2333 }
 0xf91   :  { %1429 = vrot.lane.b32.xlu1 %v2334_v46, %s2374_s7 }
 0xfff   :  { %v1394_v47 = vpop.permute.xlu0 %1393 }
0x1000   :  { %v1396_v48 = vmul.f32 %v2328_v31, %v1394_v47 }
0x1002   :  { %v1433_v49 = vpack.c.bf16 %v1396_v48, %v1396_v48 }
0x1003   :  { %v1430_v50 = vpop.permute.xlu1 %1429 }
0x1004   :  { %v1442_v51 = vrot.slane %v1433_v49, %v2464_v54  ;;  %v1432_v52 = vmul.f32 %v2330_v34, %v1430_v50 }
0x1006   :  { %v1434_v53 = vpack.c.bf16 %v1432_v52, %v1432_v52  ;;  %v1449_v55 = vrot.slane %v1442_v51, %v2464_v54 }
0x1008   :  { %v1473_v56 = vrot.slane %v1434_v53, %v2464_v54  ;;  %1450 = vrot.lane.b32.xlu0 %v1449_v55, %s2377_s8 }
0x100a   :  { %v1480_v58 = vrot.slane %v1473_v56, %v2464_v54 }
0x100c   :  { %1481 = vrot.lane.b32.xlu1 %v1480_v58, %s2377_s8  ;;  %1462 = vrot.lane.b32.xlu0 %v1461_v57, %s2378_s9 }
0x1010   :  { %1493 = vrot.lane.b32.xlu1 %v1492_v59, %s2378_s9 }
0x107a   :  { %v1451_v60 = vpop.permute.xlu0 %1450 }
0x107b   :  { %1453 = vst.msk [vmem:[#allocation2] sm:$0x1] %vm62_vm0, %v1451_v60  ;;  %2077 = vst.msk [vmem:[%s2818_s4 + $0x5] sm:$0x1] %vm62_vm0, %v1451_v60 }
0x107e   :  { %v1482_v62 = vpop.permute.xlu1 %1481  ;;  %v1463_v63 = vpop.permute.xlu0 %1462 }
0x107f   :  { %1484 = vst.msk [vmem:[#allocation4] sm:$0x1] %vm62_vm0, %v1482_v62  ;;  %2078 = vst.msk [vmem:[%s2819_s5 + $0x2] sm:$0x1] %vm62_vm0, %v1482_v62 }
0x1080   :  { %1465 = vst.msk [vmem:[#allocation3] sm:$0x3] %vm64_vm2, %v1463_v63 }
0x1082   :  { %v1494_v2 = vpop.permute.xlu1 %1493  ;;  %v1504_v4 = vld [vmem:[#allocation2] sm:$0x1] }
0x1083   :  { %1496 = vst.msk [vmem:[#allocation5] sm:$0x3] %vm64_vm2, %v1494_v2  ;;  %2206 = vmatmul.mubr.msk.bf16.vlgmr.msra.gmra.mxu0 %vm81_vm3, %v1504_v4  ;;  %v2089_v4 = vld [vmem:[%s2816_s0 + $0x7] sm:$0x1] }
0x1084   :  { %2216 = vmatpush3.bf16.msra.mxu0 %v2367_v5  ;;  %2217 = vmatprep.mubr.msk.bf16.mxu0 %vm2371_vm1, %v2369_v0  ;;  %v1739_v5 = vunpack.c.l.bf16 %v2089_v4 }
0x1086   :  { %v1552_v6 = vld [vmem:[#allocation4] sm:$0x1] }
0x1087   :  { %2212 = vmatmul.mubr.msk.bf16.vlgmr.msra.gmra.mxu1 %vm81_vm3, %v1552_v6  ;;  %v2084_v21 = vld.sshfl [vmem:[#allocation3] sm:$0x3 pattern:$0x76325410]  ;;  %v2091_v6 = vld [vmem:[%s2817_s1 + $0x8] sm:$0x1] }
0x1088   :  { %2222 = vmatpush3.bf16.msra.mxu1 %v2368_v7  ;;  %2223 = vmatprep.mubr.msk.bf16.mxu1 %vm2371_vm1, %v2369_v0 }
0x108a   :  { %v2086_v22 = vld.sshfl [vmem:[#allocation5] sm:$0x3 pattern:$0x76325410] }
0x1143   :  { %v1542_v10 = vpop.f32.mrf.mxu0 }
0x1144   :  { %v1548_v11 = vadd.f32 %v1542_v10, %v1503_v9  ;;  %v1786_v9 = vunpack.c.l.bf16 %v2091_v6 }
0x1145   :  { %v2207_v13 = vpop.f32.mrf.mxu0 }
0x1146   :  { %2335 = vtanh.f32 %v1548_v11  ;;  %v2083_v23 = vmul.f32 -1.442695, %v1548_v11 }
0x1147   :  { %v1545_v14 = vpop.f32.mrf.mxu0  ;;  %v1590_v3 = vpop.f32.mrf.mxu1 }
0x1148   :  { %v1596_v15 = vadd.f32 %v1590_v3, %v1551_v12 }
0x1149   :  { %v2208_v16 = vpop.f32.mrf.mxu0  ;;  %v2213_v17 = vpop.f32.mrf.mxu1 }
0x114a   :  { %2337 = vtanh.f32 %v1596_v15  ;;  %v2085_v24 = vmul.f32 -1.442695, %v1596_v15 }
0x114b   :  { %v1593_v0 = vpop.f32.mrf.mxu1  ;;  %2339 = vpow2.f32 %v2083_v23 }
0x114c   :  { %2341 = vpow2.f32 %v2085_v24 }
0x114d   :  { %v2214_v18 = vpop.f32.mrf.mxu1 }
0x1153   :  { %v2336_v19 = vpop.eup %2335 }
0x1154   :  { %1618 = vrot.lane.b32.xlu0 %v2336_v19, %s2373_s30 }
0x1157   :  { %v2338_v20 = vpop.eup %2337 }
0x1158   :  { %1654 = vrot.lane.b32.xlu1 %v2338_v20, %s2373_s30  ;;  %1613 = vrot.lane.b32.xlu0 %v2084_v21, %s2372_s25  ;;  %v2340_v25 = vpop.eup %2339 }
0x1159   :  { %v1601_v26 = vadd.f32 1.0, %v2340_v25  ;;  %v2342_v27 = vpop.eup %2341 }
0x115a   :  { %v1637_v28 = vadd.f32 1.0, %v2342_v27 }
0x115b   :  { %2343 = vrcp.f32 %v1601_v26 }
0x115c   :  { %1649 = vrot.lane.b32.xlu1 %v2086_v22, %s2372_s25  ;;  %2345 = vrcp.f32 %v1637_v28 }
0x1168   :  { %v2344_v29 = vpop.eup %2343 }
0x1169   :  { %v2346_v32 = vpop.eup %2345 }
0x11c6   :  { %v1619_v30 = vpop.permute.xlu0 %1618 }
0x11c7   :  { %v1621_v31 = vmul.f32 %v2344_v29, %v1619_v30 }
0x11c9   :  { %1623 = vrot.lane.b32.xlu0 %v1621_v31, %s2372_s25 }
0x11ca   :  { %v1655_v33 = vpop.permute.xlu1 %1654  ;;  %v1614_v35 = vpop.permute.xlu0 %1613 }
0x11cb   :  { %v1657_v34 = vmul.f32 %v2346_v32, %v1655_v33  ;;  %v1616_v36 = vmul.f32 %v2344_v29, %v1614_v35 }
0x11cd   :  { %1659 = vrot.lane.b32.xlu1 %v1657_v34, %s2372_s25 }
0x11ce   :  { %v1650_v37 = vpop.permute.xlu1 %1649 }
0x11cf   :  { %v1652_v40 = vmul.f32 %v2346_v32, %v1650_v37 }
0x123b   :  { %v1624_v38 = vpop.permute.xlu0 %1623 }
0x123c   :  { %v1626_v39 = vadd.f32 %v1624_v38, %v1616_v36 }
0x123e   :  { %2347 = vtanh.f32 %v1626_v39  ;;  %v1697_v55 = vrot.slane %v1626_v39, %v2467_v61 }
0x123f   :  { %v1660_v41 = vpop.permute.xlu1 %1659 }
0x1240   :  { %v1662_v42 = vadd.f32 %v1660_v41, %v1652_v40 }
0x1242   :  { %2349 = vtanh.f32 %v1662_v42  ;;  %v1728_v57 = vrot.slane %v1662_v42, %v2467_v61 }
0x124b   :  { %v2348_v43 = vpop.eup %2347 }
0x124c   :  { %1629 = vrot.lane.b32.xlu0 %v2348_v43, %s2374_s7 }
0x124f   :  { %v2350_v44 = vpop.eup %2349 }
0x1250   :  { %1665 = vrot.lane.b32.xlu1 %v2350_v44, %s2374_s7 }
0x12be   :  { %v1630_v45 = vpop.permute.xlu0 %1629 }
0x12bf   :  { %v1632_v46 = vmul.f32 %v2344_v29, %v1630_v45 }
0x12c1   :  { %v1669_v47 = vpack.c.bf16 %v1632_v46, %v1632_v46 }
0x12c2   :  { %v1666_v48 = vpop.permute.xlu1 %1665 }
0x12c3   :  { %v1678_v49 = vrot.slane %v1669_v47, %v2464_v54  ;;  %v1668_v50 = vmul.f32 %v2346_v32, %v1666_v48 }
0x12c5   :  { %v1670_v51 = vpack.c.bf16 %v1668_v50, %v1668_v50  ;;  %v1685_v52 = vrot.slane %v1678_v49, %v2464_v54 }
0x12c7   :  { %v1709_v53 = vrot.slane %v1670_v51, %v2464_v54  ;;  %1686 = vrot.lane.b32.xlu0 %v1685_v52, %s2377_s8 }
0x12c9   :  { %v1716_v56 = vrot.slane %v1709_v53, %v2464_v54 }
0x12cb   :  { %1717 = vrot.lane.b32.xlu1 %v1716_v56, %s2377_s8  ;;  %1698 = vrot.lane.b32.xlu0 %v1697_v55, %s2378_s9 }
0x12cf   :  { %1729 = vrot.lane.b32.xlu1 %v1728_v57, %s2378_s9 }
0x1339   :  { %v1687_v58 = vpop.permute.xlu0 %1686 }
0x133a   :  { %1689 = vst.msk [vmem:[#allocation2] sm:$0x1] %vm62_vm0, %v1687_v58  ;;  %2087 = vst.msk [vmem:[%s2818_s4 + $0x6] sm:$0x1] %vm62_vm0, %v1687_v58 }
0x133d   :  { %v1718_v59 = vpop.permute.xlu1 %1717  ;;  %v1699_v60 = vpop.permute.xlu0 %1698 }
0x133e   :  { %1720 = vst.msk [vmem:[#allocation4] sm:$0x1] %vm62_vm0, %v1718_v59  ;;  %2088 = vst.msk [vmem:[%s2819_s5 + $0x1] sm:$0x1] %vm62_vm0, %v1718_v59 }
0x133f   :  { %1701 = vst.msk [vmem:[#allocation3] sm:$0x3] %vm64_vm2, %v1699_v60 }
0x1341   :  { %v1730_v62 = vpop.permute.xlu1 %1729  ;;  %v1740_v63 = vld [vmem:[#allocation2] sm:$0x1] }
0x1342   :  { %1732 = vst.msk [vmem:[#allocation5] sm:$0x3] %vm64_vm2, %v1730_v62  ;;  %2218 = vmatmul.mubr.msk.bf16.vlgmr.msra.gmra.mxu0 %vm81_vm3, %v1740_v63 }
0x1345   :  { %v1787_v2 = vld [vmem:[#allocation4] sm:$0x1] }
0x1346   :  { %2224 = vmatmul.mubr.msk.bf16.vlgmr.msra.gmra.mxu1 %vm81_vm3, %v1787_v2  ;;  %v2094_v0 = vld.sshfl [vmem:[#allocation3] sm:$0x3 pattern:$0x76325410] }
0x1349   :  { %v2096_v18 = vld.sshfl [vmem:[#allocation5] sm:$0x3 pattern:$0x76325410] }
0x1402   :  { %v1778_v7 = vpop.f32.mrf.mxu0 }
0x1403   :  { %v1784_v8 = vadd.f32 %v1778_v7, %v1739_v5 }
0x1404   :  { %v2219_v1 = vpop.f32.mrf.mxu0 }
0x1405   :  { %2351 = vtanh.f32 %v1784_v8  ;;  %v2093_v19 = vmul.f32 -1.442695, %v1784_v8 }
0x1406   :  { %v1781_v10 = vpop.f32.mrf.mxu0  ;;  %v1825_v11 = vpop.f32.mrf.mxu1 }
0x1407   :  { %v1831_v12 = vadd.f32 %v1825_v11, %v1786_v9 }
0x1408   :  { %v2220_v13 = vpop.f32.mrf.mxu0  ;;  %v2225_v14 = vpop.f32.mrf.mxu1 }
0x1409   :  { %2353 = vtanh.f32 %v1831_v12  ;;  %v2095_v20 = vmul.f32 -1.442695, %v1831_v12 }
0x140a   :  { %v1828_v3 = vpop.f32.mrf.mxu1  ;;  %2355 = vpow2.f32 %v2093_v19 }
0x140b   :  { %2357 = vpow2.f32 %v2095_v20 }
0x140c   :  { %v2226_v15 = vpop.f32.mrf.mxu1 }
0x1412   :  { %v2352_v16 = vpop.eup %2351 }
0x1413   :  { %1853 = vrot.lane.b32.xlu0 %v2352_v16, %s2373_s30 }
0x1416   :  { %v2354_v17 = vpop.eup %2353 }
0x1417   :  { %1889 = vrot.lane.b32.xlu1 %v2354_v17, %s2373_s30  ;;  %1848 = vrot.lane.b32.xlu0 %v2094_v0, %s2372_s25  ;;  %v2356_v21 = vpop.eup %2355 }
0x1418   :  { %v1836_v22 = vadd.f32 1.0, %v2356_v21  ;;  %v2358_v23 = vpop.eup %2357 }
0x1419   :  { %v1872_v24 = vadd.f32 1.0, %v2358_v23 }
0x141a   :  { %2359 = vrcp.f32 %v1836_v22 }
0x141b   :  { %1884 = vrot.lane.b32.xlu1 %v2096_v18, %s2372_s25  ;;  %2361 = vrcp.f32 %v1872_v24 }
0x1427   :  { %v2360_v25 = vpop.eup %2359 }
0x1428   :  { %v2362_v28 = vpop.eup %2361 }
0x1485   :  { %v1854_v26 = vpop.permute.xlu0 %1853 }
0x1486   :  { %v1856_v27 = vmul.f32 %v2360_v25, %v1854_v26 }
0x1488   :  { %1858 = vrot.lane.b32.xlu0 %v1856_v27, %s2372_s25 }
0x1489   :  { %v1890_v29 = vpop.permute.xlu1 %1889  ;;  %v1849_v31 = vpop.permute.xlu0 %1848 }
0x148a   :  { %v1892_v30 = vmul.f32 %v2362_v28, %v1890_v29  ;;  %v1851_v32 = vmul.f32 %v2360_v25, %v1849_v31 }
0x148c   :  { %1894 = vrot.lane.b32.xlu1 %v1892_v30, %s2372_s25 }
0x148d   :  { %v1885_v33 = vpop.permute.xlu1 %1884 }
0x148e   :  { %v1887_v36 = vmul.f32 %v2362_v28, %v1885_v33 }
0x14fa   :  { %v1859_v34 = vpop.permute.xlu0 %1858 }
0x14fb   :  { %v1861_v35 = vadd.f32 %v1859_v34, %v1851_v32 }
0x14fd   :  { %2363 = vtanh.f32 %v1861_v35  ;;  %v1932_v40 = vrot.slane %v1861_v35, %v2467_v61 }
0x14fe   :  { %v1895_v37 = vpop.permute.xlu1 %1894 }
0x14ff   :  { %v1897_v38 = vadd.f32 %v1895_v37, %v1887_v36 }
0x1501   :  { %2365 = vtanh.f32 %v1897_v38  ;;  %v1963_v42 = vrot.slane %v1897_v38, %v2467_v61 }
0x150a   :  { %v2364_v39 = vpop.eup %2363 }
0x150b   :  { %1864 = vrot.lane.b32.xlu0 %v2364_v39, %s2374_s7 }
0x150e   :  { %v2366_v41 = vpop.eup %2365 }
0x150f   :  { %1900 = vrot.lane.b32.xlu1 %v2366_v41, %s2374_s7  ;;  %1933 = vrot.lane.b32.xlu0 %v1932_v40, %s2378_s9 }
0x1513   :  { %1964 = vrot.lane.b32.xlu1 %v1963_v42, %s2378_s9 }
0x157d   :  { %v1865_v43 = vpop.permute.xlu0 %1864 }
0x157e   :  { %v1867_v44 = vmul.f32 %v2360_v25, %v1865_v43 }
0x1580   :  { %v1904_v45 = vpack.c.bf16 %v1867_v44, %v1867_v44 }
0x1581   :  { %v1901_v46 = vpop.permute.xlu1 %1900  ;;  %v1934_v47 = vpop.permute.xlu0 %1933 }
0x1582   :  { %v1913_v48 = vrot.slane %v1904_v45, %v2464_v54  ;;  %v1903_v49 = vmul.f32 %v2362_v28, %v1901_v46  ;;  %1936 = vst.msk [vmem:[#allocation3] sm:$0x3] %vm64_vm2, %v1934_v47 }
0x1584   :  { %v1905_v50 = vpack.c.bf16 %v1903_v49, %v1903_v49  ;;  %v1920_v51 = vrot.slane %v1913_v48, %v2464_v54 }
0x1585   :  { %v1965_v52 = vpop.permute.xlu1 %1964 }
0x1586   :  { %v1944_v53 = vrot.slane %v1905_v50, %v2464_v54  ;;  %1967 = vst.msk [vmem:[#allocation5] sm:$0x3] %vm64_vm2, %v1965_v52  ;;  %1921 = vrot.lane.b32.xlu0 %v1920_v51, %s2377_s8 }
0x1588   :  { %v1951_v61 = vrot.slane %v1944_v53, %v2464_v54 }
0x1589   :  { %v1971_v55 = vld [vmem:[#allocation3] sm:$0x3] }
0x158a   :  { %1972 = vst.msk [vmem:[%s2820_s6] sm:$0x3] %vm64_vm2, %v1971_v55  ;;  %1952 = vrot.lane.b32.xlu1 %v1951_v61, %s2377_s8 }
0x158d   :  { %v1973_v56 = vld [vmem:[#allocation5] sm:$0x3] }
0x158e   :  { %2098 = vst.msk [vmem:[%s2820_s6 + $0x2] sm:$0x3] %vm64_vm2, %v1973_v56 }
0x15f8   :  { %v1922_v57 = vpop.permute.xlu0 %1921 }
0x15f9   :  { %1924 = vst.msk [vmem:[#allocation2] sm:$0x1] %vm62_vm0, %v1922_v57  ;;  %2097 = vst.msk [vmem:[%s2818_s4 + $0x7] sm:$0x1] %vm62_vm0, %v1922_v57 }
0x15fc   :  { %v1953_v54 = vpop.permute.xlu1 %1952 }
0x15fd   :  { %1955 = vst.msk [vmem:[#allocation4] sm:$0x1] %vm62_vm0, %v1953_v54  ;;  %1970 = vst.msk [vmem:[%s2819_s5] sm:$0x1] %vm62_vm0, %v1953_v54 }

</bundles_post_ra>
